<compile_context>
chip_gen: v5e
topology: v5e:2x2
jax: 0.10.0
libtpu: 0.0.40
codegen_flags: <defaults>
</compile_context>

<pallas_src>
import functools

import jax
import jax.numpy as jnp
from jax.experimental import pallas as pl
from jax.experimental.pallas import tpu as pltpu

FEATURE_1_DIM = 978
FEATURE_1_ENCODE_DIM = 64
FEATURE_2_DIM = 4
FEATURE_3_ENCODE_DIM = 32
FEATURE_DIM = FEATURE_1_ENCODE_DIM + FEATURE_2_DIM + FEATURE_3_ENCODE_DIM  # 100

# Lane-padded widths (multiples of 128).
FEATURE_DIM_PAD = 128
FEATURE_1_DIM_PAD = 1024

HIDDEN_DIMS = (512, 256, 512)
BN_EPS = 1e-5
LRELU_SLOPE = 0.2

# Batch rows per grid step (multiple of 8).  Bump to 256-512 for production
# batches; kept small here so the demo exercises a multi-step grid.
TILE_B = 32


# ----------------------------- kernels --------------------------------------

def _bn_linear_lrelu_stats_kernel(h_ref, scale_ref, shift_ref, w_ref, b_ref,
                                  a_ref, sum_ref, sumsq_ref, *, batch, tile_b):
    """Apply previous layer's BN (fused scale/shift), Linear (bf16 in, f32 acc),
    LeakyReLU(0.2), and accumulate this layer's BN sum / sum-of-squares."""
    i = pl.program_id(0)

    h = h_ref[...] * scale_ref[...] + shift_ref[...]
    z = jnp.dot(h.astype(jnp.bfloat16), w_ref[...],
                preferred_element_type=jnp.float32) + b_ref[...]
    a = jnp.where(z > 0, z, LRELU_SLOPE * z)
    a_ref[...] = a

    # Rows beyond the real batch are padding -> exclude from BN statistics.
    row = i * tile_b + jax.lax.broadcasted_iota(jnp.int32, (tile_b, 1), 0)
    a_valid = jnp.where(row < batch, a, 0.0)

    @pl.when(i == 0)
    def _():
        sum_ref[...] = jnp.zeros_like(sum_ref)
        sumsq_ref[...] = jnp.zeros_like(sumsq_ref)

    sum_ref[...] += jnp.sum(a_valid, axis=0, keepdims=True)
    sumsq_ref[...] += jnp.sum(a_valid * a_valid, axis=0, keepdims=True)


def _bn_linear_tanh_kernel(h_ref, scale_ref, shift_ref, w_ref, b_ref, out_ref):
    """Apply BN3 (fused scale/shift), final Linear (bf16 in, f32 acc), Tanh."""
    h = h_ref[...] * scale_ref[...] + shift_ref[...]
    z = jnp.dot(h.astype(jnp.bfloat16), w_ref[...],
                preferred_element_type=jnp.float32) + b_ref[...]
    out_ref[...] = jnp.tanh(z)


# --------------------------- pallas wrappers ---------------------------------

def _block_call(h, scale, shift, w_bf16, b, *, batch):
    b_pad, din = h.shape
    dout = w_bf16.shape[1]
    nb = b_pad // TILE_B
    kernel = functools.partial(_bn_linear_lrelu_stats_kernel,
                               batch=batch, tile_b=TILE_B)
    return pl.pallas_call(
        kernel,
        out_shape=(jax.ShapeDtypeStruct((b_pad, dout), jnp.float32),
                   jax.ShapeDtypeStruct((1, dout), jnp.float32),
                   jax.ShapeDtypeStruct((1, dout), jnp.float32)),
        grid=(nb,),
        in_specs=[
            pl.BlockSpec((TILE_B, din), lambda i: (i, 0)),   # activations (tiled)
            pl.BlockSpec((1, din), lambda i: (0, 0)),        # BN scale (resident)
            pl.BlockSpec((1, din), lambda i: (0, 0)),        # BN shift (resident)
            pl.BlockSpec((din, dout), lambda i: (0, 0)),     # bf16 weight (resident)
            pl.BlockSpec((1, dout), lambda i: (0, 0)),       # bias (resident)
        ],
        out_specs=(
            pl.BlockSpec((TILE_B, dout), lambda i: (i, 0)),  # pre-BN activations
            pl.BlockSpec((1, dout), lambda i: (0, 0)),       # sum accumulator
            pl.BlockSpec((1, dout), lambda i: (0, 0)),       # sumsq accumulator
        ),
        compiler_params=pltpu.CompilerParams(
            dimension_semantics=("arbitrary",)),             # carries BN-stat accumulation
        cost_estimate=pl.CostEstimate(
            flops=2 * b_pad * din * dout,
            transcendentals=0,
            bytes_accessed=(h.size + b_pad * dout) * 4 + w_bf16.size * 2),
    )(h, scale, shift, w_bf16, b)


def _final_call(h, scale, shift, w_bf16, b):
    b_pad, din = h.shape
    dout = w_bf16.shape[1]
    nb = b_pad // TILE_B
    return pl.pallas_call(
        _bn_linear_tanh_kernel,
        out_shape=jax.ShapeDtypeStruct((b_pad, dout), jnp.float32),
        grid=(nb,),
        in_specs=[
            pl.BlockSpec((TILE_B, din), lambda i: (i, 0)),
            pl.BlockSpec((1, din), lambda i: (0, 0)),
            pl.BlockSpec((1, din), lambda i: (0, 0)),
            pl.BlockSpec((din, dout), lambda i: (0, 0)),
            pl.BlockSpec((1, dout), lambda i: (0, 0)),
        ],
        out_specs=pl.BlockSpec((TILE_B, dout), lambda i: (i, 0)),
        compiler_params=pltpu.CompilerParams(
            dimension_semantics=("parallel",)),              # independent batch tiles
        cost_estimate=pl.CostEstimate(
            flops=2 * b_pad * din * dout,
            transcendentals=b_pad * dout,
            bytes_accessed=(h.size + b_pad * dout) * 4 + w_bf16.size * 2),
    )(h, scale, shift, w_bf16, b)


def _bn_scale_shift(s, ss, gamma, beta, batch):
    """Fused training-mode BatchNorm1d affine: scale/shift from sum & sumsq."""
    mean = s / batch
    var = jnp.maximum(ss / batch - mean * mean, 0.0)
    scale = gamma * jax.lax.rsqrt(var + BN_EPS)
    shift = beta - mean * scale
    return scale, shift


def generator_forward(x, prepped):
    """Full forward pass. `prepped` is the output of prepare_params()."""
    (w1, b1, g1, be1, w2, b2, g2, be2, w3, b3, g3, be3, w4, b4) = prepped
    B = x.shape[0]
    b_pad = ((B + TILE_B - 1) // TILE_B) * TILE_B
    x_pad = jnp.pad(x.astype(jnp.float32),
                    ((0, b_pad - B), (0, FEATURE_DIM_PAD - FEATURE_DIM)))

    one = jnp.ones((1, FEATURE_DIM_PAD), jnp.float32)     # identity "BN" for layer 1
    zero = jnp.zeros((1, FEATURE_DIM_PAD), jnp.float32)

    h1, s1, ss1 = _block_call(x_pad, one, zero, w1, b1, batch=B)
    sc1, sh1 = _bn_scale_shift(s1, ss1, g1, be1, B)
    h2, s2, ss2 = _block_call(h1, sc1, sh1, w2, b2, batch=B)
    sc2, sh2 = _bn_scale_shift(s2, ss2, g2, be2, B)
    h3, s3, ss3 = _block_call(h2, sc2, sh2, w3, b3, batch=B)
    sc3, sh3 = _bn_scale_shift(s3, ss3, g3, be3, B)
    out_pad = _final_call(h3, sc3, sh3, w4, b4)
    return out_pad[:B, :FEATURE_1_DIM]


# ------------------------------ params ---------------------------------------

def init_params(key):
    """Deterministic parameter init (synthetic; shapes match the nn.Module)."""
    dims = (FEATURE_DIM,) + HIDDEN_DIMS + (FEATURE_1_DIM,)
    params = []
    keys = jax.random.split(key, len(dims) - 1)
    for li, (din, dout) in enumerate(zip(dims[:-1], dims[1:])):
        kw, kb = jax.random.split(keys[li])
        w = jax.random.normal(kw, (din, dout), jnp.float32) * 0.05
        b = jax.random.normal(kb, (1, dout), jnp.float32) * 0.05
        params.append(w)
        params.append(b)
        if li < 3:  # BatchNorm affine params after the first three Linear layers
            params.append(jnp.ones((1, dout), jnp.float32))   # gamma
            params.append(jnp.zeros((1, dout), jnp.float32))  # beta
    return params  # [w1,b1,g1,be1, w2,b2,g2,be2, w3,b3,g3,be3, w4,b4]


def prepare_params(params):
    """Lane-pad w1 (100->128 rows) and w4/b4 (978->1024 cols); weights -> bf16."""
    (w1, b1, g1, be1, w2, b2, g2, be2, w3, b3, g3, be3, w4, b4) = params
    w1p = jnp.pad(w1, ((0, FEATURE_DIM_PAD - FEATURE_DIM), (0, 0)))
    w4p = jnp.pad(w4, ((0, 0), (0, FEATURE_1_DIM_PAD - FEATURE_1_DIM)))
    b4p = jnp.pad(b4, ((0, 0), (0, FEATURE_1_DIM_PAD - FEATURE_1_DIM)))
    bf = lambda w: w.astype(jnp.bfloat16)
    return [bf(w1p), b1, g1, be1,
            bf(w2), b2, g2, be2,
            bf(w3), b3, g3, be3,
            bf(w4p), b4p]


# ----------------------------- reference --------------------------------------

def reference_forward(x, params):
    """Pure-JAX reference with the same bf16-weight / f32-accumulate matmuls as
    the kernel (PyTorch is full f32; loosen tolerance further to compare to that)."""
    (w1, b1, g1, be1, w2, b2, g2, be2, w3, b3, g3, be3, w4, b4) = params

    def lin(h, w, b):
        return jnp.dot(h.astype(jnp.bfloat16), w.astype(jnp.bfloat16),
                       preferred_element_type=jnp.float32) + b

    def block(h, w, b, g, be):
        z = lin(h, w, b)
        a = jnp.where(z > 0, z, LRELU_SLOPE * z)
        mean = a.mean(0, keepdims=True)
        var = jnp.maximum((a * a).mean(0, keepdims=True) - mean * mean, 0.0)
        scale = g * jax.lax.rsqrt(var + BN_EPS)
        return a * scale + (be - mean * scale)

    h = block(x, w1, b1, g1, be1)
    h = block(h, w2, b2, g2, be2)
    h = block(h, w3, b3, g3, be3)
    return jnp.tanh(lin(h, w4, b4))


# ------------------------------- main -----------------------------------------

if __name__ == "__main__":
    key = jax.random.PRNGKey(0)
    k_x, k_p = jax.random.split(key)

    batch = 48  # deliberately not a multiple of TILE_B: exercises padding/masking
    x = jax.random.normal(k_x, (batch, FEATURE_DIM), jnp.float32)
    params = init_params(k_p)
    prepped = prepare_params(params)

    fwd = jax.jit(generator_forward)
    out = jax.block_until_ready(fwd(x, prepped))

    ref = reference_forward(x, params)
    assert out.shape == (batch, FEATURE_1_DIM), out.shape
    assert jnp.allclose(out, ref, atol=2e-2, rtol=2e-2), (
        "mismatch vs reference, max abs diff = %f"
        % float(jnp.max(jnp.abs(out - ref))))

    print("KERNEL_OK")
</pallas_src>

<mosaic_0001>
module attributes {stable_mosaic.version = 11 : i64} {
  func.func @_bn_linear_lrelu_stats_kernel(%arg0: i32, %arg1: memref<32x128xf32, #tpu.memory_space<vmem>>, %arg2: memref<1x128xf32, #tpu.memory_space<vmem>>, %arg3: memref<1x128xf32, #tpu.memory_space<vmem>>, %arg4: memref<128x512xbf16, #tpu.memory_space<vmem>>, %arg5: memref<1x512xf32, #tpu.memory_space<vmem>>, %arg6: memref<32x512xf32, #tpu.memory_space<vmem>>, %arg7: memref<1x512xf32, #tpu.memory_space<vmem>>, %arg8: memref<1x512xf32, #tpu.memory_space<vmem>>) attributes {dimension_semantics = [#tpu.dimension_semantics<arbitrary>], iteration_bounds = array<i64: 2>, scalar_prefetch = 0 : i64, scratch_operands = 0 : i64, tpu.core_type = #tpu.core_type<tc>, window_params = [{transform_indices = @transform_0, window_bounds = array<i64: 32, 128>}, {pipeline_mode = #tpu.pipeline_mode<synchronous>, transform_indices = @transform_1, window_bounds = array<i64: 1, 128>}, {pipeline_mode = #tpu.pipeline_mode<synchronous>, transform_indices = @transform_2, window_bounds = array<i64: 1, 128>}, {pipeline_mode = #tpu.pipeline_mode<synchronous>, transform_indices = @transform_3, window_bounds = array<i64: 128, 512>}, {pipeline_mode = #tpu.pipeline_mode<synchronous>, transform_indices = @transform_4, window_bounds = array<i64: 1, 512>}, {transform_indices = @transform_5, window_bounds = array<i64: 32, 512>}, {pipeline_mode = #tpu.pipeline_mode<synchronous>, transform_indices = @transform_6, window_bounds = array<i64: 1, 512>}, {pipeline_mode = #tpu.pipeline_mode<synchronous>, transform_indices = @transform_7, window_bounds = array<i64: 1, 512>}]} {
    %c0 = arith.constant 0 : index
    %c0_0 = arith.constant 0 : index
    %0 = vector.load %arg1[%c0, %c0_0] : memref<32x128xf32, #tpu.memory_space<vmem>>, vector<32x128xf32>
    %c0_1 = arith.constant 0 : index
    %c0_2 = arith.constant 0 : index
    %1 = vector.load %arg2[%c0_1, %c0_2] : memref<1x128xf32, #tpu.memory_space<vmem>>, vector<1x128xf32>
    %2 = vector.broadcast %1 : vector<1x128xf32> to vector<32x128xf32>
    %3 = arith.mulf %0, %2 : vector<32x128xf32>
    %c0_3 = arith.constant 0 : index
    %c0_4 = arith.constant 0 : index
    %4 = vector.load %arg3[%c0_3, %c0_4] : memref<1x128xf32, #tpu.memory_space<vmem>>, vector<1x128xf32>
    %5 = vector.broadcast %4 : vector<1x128xf32> to vector<32x128xf32>
    %6 = arith.addf %3, %5 : vector<32x128xf32>
    %7 = arith.truncf %6 : vector<32x128xf32> to vector<32x128xbf16>
    %c0_5 = arith.constant 0 : index
    %c0_6 = arith.constant 0 : index
    %8 = vector.load %arg4[%c0_5, %c0_6] : memref<128x512xbf16, #tpu.memory_space<vmem>>, vector<128x512xbf16>
    %cst = arith.constant dense<0.000000e+00> : vector<32x512xf32>
    %9 = tpu.matmul %7, %8, %cst {dimension_numbers = #tpu.dot_dimension_numbers<[1], [0], [0], [1], [0, 0, 1, 1], [], []>} : vector<32x128xbf16>, vector<128x512xbf16>, vector<32x512xf32> -> vector<32x512xf32>
    %c0_7 = arith.constant 0 : index
    %c0_8 = arith.constant 0 : index
    %10 = vector.load %arg5[%c0_7, %c0_8] : memref<1x512xf32, #tpu.memory_space<vmem>>, vector<1x512xf32>
    %11 = vector.broadcast %10 : vector<1x512xf32> to vector<32x512xf32>
    %12 = arith.addf %9, %11 : vector<32x512xf32>
    %cst_9 = arith.constant 0.000000e+00 : f32
    %13 = vector.broadcast %cst_9 : f32 to vector<32x512xf32>
    %14 = arith.cmpf ogt, %12, %13 : vector<32x512xf32>
    %cst_10 = arith.constant 2.000000e-01 : f32
    %15 = vector.broadcast %cst_10 : f32 to vector<32x512xf32>
    %16 = arith.mulf %15, %12 : vector<32x512xf32>
    %17 = arith.select %14, %12, %16 : vector<32x512xi1>, vector<32x512xf32>
    %c0_11 = arith.constant 0 : index
    %c0_12 = arith.constant 0 : index
    %18 = vector.load %arg6[%c0_11, %c0_12] : memref<32x512xf32, #tpu.memory_space<vmem>>, vector<32x512xf32>
    tpu.vector_store %arg6[%c0_11, %c0_12], %17 {strides = array<i32>} : memref<32x512xf32, #tpu.memory_space<vmem>>, vector<32x512xf32>,
    %c32_i32 = arith.constant 32 : i32
    %19 = arith.muli %arg0, %c32_i32 : i32
    %20 = tpu.iota {dimensions = array<i32: 0>} : vector<32x1xi32>
    %21 = vector.broadcast %19 : i32 to vector<32x1xi32>
    %22 = arith.addi %21, %20 : vector<32x1xi32>
    %c48_i32 = arith.constant 48 : i32
    %23 = vector.broadcast %c48_i32 : i32 to vector<32x1xi32>
    %24 = arith.cmpi slt, %22, %23 : vector<32x1xi32>
    %cst_13 = arith.constant 0.000000e+00 : f32
    %25 = vector.shape_cast %24 : vector<32x1xi1> to vector<32x1xi1>
    %26 = vector.broadcast %25 : vector<32x1xi1> to vector<32x512xi1>
    %27 = vector.broadcast %cst_13 : f32 to vector<32x512xf32>
    %28 = arith.select %26, %17, %27 : vector<32x512xi1>, vector<32x512xf32>
    %c0_i32 = arith.constant 0 : i32
    %29 = arith.cmpi eq, %arg0, %c0_i32 : i32
    %30 = arith.extui %29 : i1 to i32
    %c0_i32_14 = arith.constant 0 : i32
    %31 = arith.cmpi ne, %30, %c0_i32_14 : i32
    scf.if %31 {
      %cst_25 = arith.constant 0.000000e+00 : f32
      %43 = vector.broadcast %cst_25 : f32 to vector<1x512xf32>
      %c0_26 = arith.constant 0 : index
      %c0_27 = arith.constant 0 : index
      %44 = vector.load %arg7[%c0_26, %c0_27] : memref<1x512xf32, #tpu.memory_space<vmem>>, vector<1x512xf32>
      tpu.vector_store %arg7[%c0_26, %c0_27], %43 {strides = array<i32>} : memref<1x512xf32, #tpu.memory_space<vmem>>, vector<1x512xf32>,
      %cst_28 = arith.constant 0.000000e+00 : f32
      %45 = vector.broadcast %cst_28 : f32 to vector<1x512xf32>
      %c0_29 = arith.constant 0 : index
      %c0_30 = arith.constant 0 : index
      %46 = vector.load %arg8[%c0_29, %c0_30] : memref<1x512xf32, #tpu.memory_space<vmem>>, vector<1x512xf32>
      tpu.vector_store %arg8[%c0_29, %c0_30], %45 {strides = array<i32>} : memref<1x512xf32, #tpu.memory_space<vmem>>, vector<1x512xf32>,
    } else {
    }
    %c0_15 = arith.constant 0 : index
    %c0_16 = arith.constant 0 : index
    %32 = vector.load %arg7[%c0_15, %c0_16] : memref<1x512xf32, #tpu.memory_space<vmem>>, vector<1x512xf32>
    %cst_17 = arith.constant dense<0.000000e+00> : vector<512xf32>
    %33 = vector.multi_reduction <add>, %28, %cst_17 [0] : vector<32x512xf32> to vector<512xf32>
    %34 = vector.shape_cast %33 : vector<512xf32> to vector<1x512xf32>
    %35 = arith.addf %32, %34 : vector<1x512xf32>
    %c0_18 = arith.constant 0 : index
    %c0_19 = arith.constant 0 : index
    %36 = vector.load %arg7[%c0_18, %c0_19] : memref<1x512xf32, #tpu.memory_space<vmem>>, vector<1x512xf32>
    tpu.vector_store %arg7[%c0_18, %c0_19], %35 {strides = array<i32>} : memref<1x512xf32, #tpu.memory_space<vmem>>, vector<1x512xf32>,
    %c0_20 = arith.constant 0 : index
    %c0_21 = arith.constant 0 : index
    %37 = vector.load %arg8[%c0_20, %c0_21] : memref<1x512xf32, #tpu.memory_space<vmem>>, vector<1x512xf32>
    %38 = arith.mulf %28, %28 : vector<32x512xf32>
    %cst_22 = arith.constant dense<0.000000e+00> : vector<512xf32>
    %39 = vector.multi_reduction <add>, %38, %cst_22 [0] : vector<32x512xf32> to vector<512xf32>
    %40 = vector.shape_cast %39 : vector<512xf32> to vector<1x512xf32>
    %41 = arith.addf %37, %40 : vector<1x512xf32>
    %c0_23 = arith.constant 0 : index
    %c0_24 = arith.constant 0 : index
    %42 = vector.load %arg8[%c0_23, %c0_24] : memref<1x512xf32, #tpu.memory_space<vmem>>, vector<1x512xf32>
    tpu.vector_store %arg8[%c0_23, %c0_24], %41 {strides = array<i32>} : memref<1x512xf32, #tpu.memory_space<vmem>>, vector<1x512xf32>,
    return
  }
  func.func @transform_0(%arg0: i32) -> (i32, i32) {
    %c0_i32 = arith.constant 0 : i32
    %c0_i32_0 = arith.constant 0 : i32
    return %arg0, %c0_i32 : i32, i32
  }
  func.func @transform_1(%arg0: i32) -> (i32, i32) {
    %c0_i32 = arith.constant 0 : i32
    %c0_i32_0 = arith.constant 0 : i32
    %c0_i32_1 = arith.constant 0 : i32
    return %c0_i32, %c0_i32_0 : i32, i32
  }
  func.func @transform_2(%arg0: i32) -> (i32, i32) {
    %c0_i32 = arith.constant 0 : i32
    %c0_i32_0 = arith.constant 0 : i32
    %c0_i32_1 = arith.constant 0 : i32
    return %c0_i32, %c0_i32_0 : i32, i32
  }
  func.func @transform_3(%arg0: i32) -> (i32, i32) {
    %c0_i32 = arith.constant 0 : i32
    %c0_i32_0 = arith.constant 0 : i32
    %c0_i32_1 = arith.constant 0 : i32
    return %c0_i32, %c0_i32_0 : i32, i32
  }
  func.func @transform_4(%arg0: i32) -> (i32, i32) {
    %c0_i32 = arith.constant 0 : i32
    %c0_i32_0 = arith.constant 0 : i32
    %c0_i32_1 = arith.constant 0 : i32
    return %c0_i32, %c0_i32_0 : i32, i32
  }
  func.func @transform_5(%arg0: i32) -> (i32, i32) {
    %c0_i32 = arith.constant 0 : i32
    %c0_i32_0 = arith.constant 0 : i32
    return %arg0, %c0_i32 : i32, i32
  }
  func.func @transform_6(%arg0: i32) -> (i32, i32) {
    %c0_i32 = arith.constant 0 : i32
    %c0_i32_0 = arith.constant 0 : i32
    %c0_i32_1 = arith.constant 0 : i32
    return %c0_i32, %c0_i32_0 : i32, i32
  }
  func.func @transform_7(%arg0: i32) -> (i32, i32) {
    %c0_i32 = arith.constant 0 : i32
    %c0_i32_0 = arith.constant 0 : i32
    %c0_i32_1 = arith.constant 0 : i32
    return %c0_i32, %c0_i32_0 : i32, i32
  }
}

module attributes {stable_mosaic.version = 11 : i64} {
  func.func @_bn_linear_lrelu_stats_kernel(%arg0: i32, %arg1: memref<32x256xf32, #tpu.memory_space<vmem>>, %arg2: memref<1x256xf32, #tpu.memory_space<vmem>>, %arg3: memref<1x256xf32, #tpu.memory_space<vmem>>, %arg4: memref<256x512xbf16, #tpu.memory_space<vmem>>, %arg5: memref<1x512xf32, #tpu.memory_space<vmem>>, %arg6: memref<32x512xf32, #tpu.memory_space<vmem>>, %arg7: memref<1x512xf32, #tpu.memory_space<vmem>>, %arg8: memref<1x512xf32, #tpu.memory_space<vmem>>) attributes {dimension_semantics = [#tpu.dimension_semantics<arbitrary>], iteration_bounds = array<i64: 2>, scalar_prefetch = 0 : i64, scratch_operands = 0 : i64, tpu.core_type = #tpu.core_type<tc>, window_params = [{transform_indices = @transform_0, window_bounds = array<i64: 32, 256>}, {pipeline_mode = #tpu.pipeline_mode<synchronous>, transform_indices = @transform_1, window_bounds = array<i64: 1, 256>}, {pipeline_mode = #tpu.pipeline_mode<synchronous>, transform_indices = @transform_2, window_bounds = array<i64: 1, 256>}, {pipeline_mode = #tpu.pipeline_mode<synchronous>, transform_indices = @transform_3, window_bounds = array<i64: 256, 512>}, {pipeline_mode = #tpu.pipeline_mode<synchronous>, transform_indices = @transform_4, window_bounds = array<i64: 1, 512>}, {transform_indices = @transform_5, window_bounds = array<i64: 32, 512>}, {pipeline_mode = #tpu.pipeline_mode<synchronous>, transform_indices = @transform_6, window_bounds = array<i64: 1, 512>}, {pipeline_mode = #tpu.pipeline_mode<synchronous>, transform_indices = @transform_7, window_bounds = array<i64: 1, 512>}]} {
    %c0 = arith.constant 0 : index
    %c0_0 = arith.constant 0 : index
    %0 = vector.load %arg1[%c0, %c0_0] : memref<32x256xf32, #tpu.memory_space<vmem>>, vector<32x256xf32>
    %c0_1 = arith.constant 0 : index
    %c0_2 = arith.constant 0 : index
    %1 = vector.load %arg2[%c0_1, %c0_2] : memref<1x256xf32, #tpu.memory_space<vmem>>, vector<1x256xf32>
    %2 = vector.broadcast %1 : vector<1x256xf32> to vector<32x256xf32>
    %3 = arith.mulf %0, %2 : vector<32x256xf32>
    %c0_3 = arith.constant 0 : index
    %c0_4 = arith.constant 0 : index
    %4 = vector.load %arg3[%c0_3, %c0_4] : memref<1x256xf32, #tpu.memory_space<vmem>>, vector<1x256xf32>
    %5 = vector.broadcast %4 : vector<1x256xf32> to vector<32x256xf32>
    %6 = arith.addf %3, %5 : vector<32x256xf32>
    %7 = arith.truncf %6 : vector<32x256xf32> to vector<32x256xbf16>
    %c0_5 = arith.constant 0 : index
    %c0_6 = arith.constant 0 : index
    %8 = vector.load %arg4[%c0_5, %c0_6] : memref<256x512xbf16, #tpu.memory_space<vmem>>, vector<256x512xbf16>
    %cst = arith.constant dense<0.000000e+00> : vector<32x512xf32>
    %9 = tpu.matmul %7, %8, %cst {dimension_numbers = #tpu.dot_dimension_numbers<[1], [0], [0], [1], [0, 0, 1, 1], [], []>} : vector<32x256xbf16>, vector<256x512xbf16>, vector<32x512xf32> -> vector<32x512xf32>
    %c0_7 = arith.constant 0 : index
    %c0_8 = arith.constant 0 : index
    %10 = vector.load %arg5[%c0_7, %c0_8] : memref<1x512xf32, #tpu.memory_space<vmem>>, vector<1x512xf32>
    %11 = vector.broadcast %10 : vector<1x512xf32> to vector<32x512xf32>
    %12 = arith.addf %9, %11 : vector<32x512xf32>
    %cst_9 = arith.constant 0.000000e+00 : f32
    %13 = vector.broadcast %cst_9 : f32 to vector<32x512xf32>
    %14 = arith.cmpf ogt, %12, %13 : vector<32x512xf32>
    %cst_10 = arith.constant 2.000000e-01 : f32
    %15 = vector.broadcast %cst_10 : f32 to vector<32x512xf32>
    %16 = arith.mulf %15, %12 : vector<32x512xf32>
    %17 = arith.select %14, %12, %16 : vector<32x512xi1>, vector<32x512xf32>
    %c0_11 = arith.constant 0 : index
    %c0_12 = arith.constant 0 : index
    %18 = vector.load %arg6[%c0_11, %c0_12] : memref<32x512xf32, #tpu.memory_space<vmem>>, vector<32x512xf32>
    tpu.vector_store %arg6[%c0_11, %c0_12], %17 {strides = array<i32>} : memref<32x512xf32, #tpu.memory_space<vmem>>, vector<32x512xf32>,
    %c32_i32 = arith.constant 32 : i32
    %19 = arith.muli %arg0, %c32_i32 : i32
    %20 = tpu.iota {dimensions = array<i32: 0>} : vector<32x1xi32>
    %21 = vector.broadcast %19 : i32 to vector<32x1xi32>
    %22 = arith.addi %21, %20 : vector<32x1xi32>
    %c48_i32 = arith.constant 48 : i32
    %23 = vector.broadcast %c48_i32 : i32 to vector<32x1xi32>
    %24 = arith.cmpi slt, %22, %23 : vector<32x1xi32>
    %cst_13 = arith.constant 0.000000e+00 : f32
    %25 = vector.shape_cast %24 : vector<32x1xi1> to vector<32x1xi1>
    %26 = vector.broadcast %25 : vector<32x1xi1> to vector<32x512xi1>
    %27 = vector.broadcast %cst_13 : f32 to vector<32x512xf32>
    %28 = arith.select %26, %17, %27 : vector<32x512xi1>, vector<32x512xf32>
    %c0_i32 = arith.constant 0 : i32
    %29 = arith.cmpi eq, %arg0, %c0_i32 : i32
    %30 = arith.extui %29 : i1 to i32
    %c0_i32_14 = arith.constant 0 : i32
    %31 = arith.cmpi ne, %30, %c0_i32_14 : i32
    scf.if %31 {
      %cst_25 = arith.constant 0.000000e+00 : f32
      %43 = vector.broadcast %cst_25 : f32 to vector<1x512xf32>
      %c0_26 = arith.constant 0 : index
      %c0_27 = arith.constant 0 : index
      %44 = vector.load %arg7[%c0_26, %c0_27] : memref<1x512xf32, #tpu.memory_space<vmem>>, vector<1x512xf32>
      tpu.vector_store %arg7[%c0_26, %c0_27], %43 {strides = array<i32>} : memref<1x512xf32, #tpu.memory_space<vmem>>, vector<1x512xf32>,
      %cst_28 = arith.constant 0.000000e+00 : f32
      %45 = vector.broadcast %cst_28 : f32 to vector<1x512xf32>
      %c0_29 = arith.constant 0 : index
      %c0_30 = arith.constant 0 : index
      %46 = vector.load %arg8[%c0_29, %c0_30] : memref<1x512xf32, #tpu.memory_space<vmem>>, vector<1x512xf32>
      tpu.vector_store %arg8[%c0_29, %c0_30], %45 {strides = array<i32>} : memref<1x512xf32, #tpu.memory_space<vmem>>, vector<1x512xf32>,
    } else {
    }
    %c0_15 = arith.constant 0 : index
    %c0_16 = arith.constant 0 : index
    %32 = vector.load %arg7[%c0_15, %c0_16] : memref<1x512xf32, #tpu.memory_space<vmem>>, vector<1x512xf32>
    %cst_17 = arith.constant dense<0.000000e+00> : vector<512xf32>
    %33 = vector.multi_reduction <add>, %28, %cst_17 [0] : vector<32x512xf32> to vector<512xf32>
    %34 = vector.shape_cast %33 : vector<512xf32> to vector<1x512xf32>
    %35 = arith.addf %32, %34 : vector<1x512xf32>
    %c0_18 = arith.constant 0 : index
    %c0_19 = arith.constant 0 : index
    %36 = vector.load %arg7[%c0_18, %c0_19] : memref<1x512xf32, #tpu.memory_space<vmem>>, vector<1x512xf32>
    tpu.vector_store %arg7[%c0_18, %c0_19], %35 {strides = array<i32>} : memref<1x512xf32, #tpu.memory_space<vmem>>, vector<1x512xf32>,
    %c0_20 = arith.constant 0 : index
    %c0_21 = arith.constant 0 : index
    %37 = vector.load %arg8[%c0_20, %c0_21] : memref<1x512xf32, #tpu.memory_space<vmem>>, vector<1x512xf32>
    %38 = arith.mulf %28, %28 : vector<32x512xf32>
    %cst_22 = arith.constant dense<0.000000e+00> : vector<512xf32>
    %39 = vector.multi_reduction <add>, %38, %cst_22 [0] : vector<32x512xf32> to vector<512xf32>
    %40 = vector.shape_cast %39 : vector<512xf32> to vector<1x512xf32>
    %41 = arith.addf %37, %40 : vector<1x512xf32>
    %c0_23 = arith.constant 0 : index
    %c0_24 = arith.constant 0 : index
    %42 = vector.load %arg8[%c0_23, %c0_24] : memref<1x512xf32, #tpu.memory_space<vmem>>, vector<1x512xf32>
    tpu.vector_store %arg8[%c0_23, %c0_24], %41 {strides = array<i32>} : memref<1x512xf32, #tpu.memory_space<vmem>>, vector<1x512xf32>,
    return
  }
  func.func @transform_0(%arg0: i32) -> (i32, i32) {
    %c0_i32 = arith.constant 0 : i32
    %c0_i32_0 = arith.constant 0 : i32
    return %arg0, %c0_i32 : i32, i32
  }
  func.func @transform_1(%arg0: i32) -> (i32, i32) {
    %c0_i32 = arith.constant 0 : i32
    %c0_i32_0 = arith.constant 0 : i32
    %c0_i32_1 = arith.constant 0 : i32
    return %c0_i32, %c0_i32_0 : i32, i32
  }
  func.func @transform_2(%arg0: i32) -> (i32, i32) {
    %c0_i32 = arith.constant 0 : i32
    %c0_i32_0 = arith.constant 0 : i32
    %c0_i32_1 = arith.constant 0 : i32
    return %c0_i32, %c0_i32_0 : i32, i32
  }
  func.func @transform_3(%arg0: i32) -> (i32, i32) {
    %c0_i32 = arith.constant 0 : i32
    %c0_i32_0 = arith.constant 0 : i32
    %c0_i32_1 = arith.constant 0 : i32
    return %c0_i32, %c0_i32_0 : i32, i32
  }
  func.func @transform_4(%arg0: i32) -> (i32, i32) {
    %c0_i32 = arith.constant 0 : i32
    %c0_i32_0 = arith.constant 0 : i32
    %c0_i32_1 = arith.constant 0 : i32
    return %c0_i32, %c0_i32_0 : i32, i32
  }
  func.func @transform_5(%arg0: i32) -> (i32, i32) {
    %c0_i32 = arith.constant 0 : i32
    %c0_i32_0 = arith.constant 0 : i32
    return %arg0, %c0_i32 : i32, i32
  }
  func.func @transform_6(%arg0: i32) -> (i32, i32) {
    %c0_i32 = arith.constant 0 : i32
    %c0_i32_0 = arith.constant 0 : i32
    %c0_i32_1 = arith.constant 0 : i32
    return %c0_i32, %c0_i32_0 : i32, i32
  }
  func.func @transform_7(%arg0: i32) -> (i32, i32) {
    %c0_i32 = arith.constant 0 : i32
    %c0_i32_0 = arith.constant 0 : i32
    %c0_i32_1 = arith.constant 0 : i32
    return %c0_i32, %c0_i32_0 : i32, i32
  }
}

module attributes {stable_mosaic.version = 11 : i64} {
  func.func @_bn_linear_lrelu_stats_kernel(%arg0: i32, %arg1: memref<32x512xf32, #tpu.memory_space<vmem>>, %arg2: memref<1x512xf32, #tpu.memory_space<vmem>>, %arg3: memref<1x512xf32, #tpu.memory_space<vmem>>, %arg4: memref<512x256xbf16, #tpu.memory_space<vmem>>, %arg5: memref<1x256xf32, #tpu.memory_space<vmem>>, %arg6: memref<32x256xf32, #tpu.memory_space<vmem>>, %arg7: memref<1x256xf32, #tpu.memory_space<vmem>>, %arg8: memref<1x256xf32, #tpu.memory_space<vmem>>) attributes {dimension_semantics = [#tpu.dimension_semantics<arbitrary>], iteration_bounds = array<i64: 2>, scalar_prefetch = 0 : i64, scratch_operands = 0 : i64, tpu.core_type = #tpu.core_type<tc>, window_params = [{transform_indices = @transform_0, window_bounds = array<i64: 32, 512>}, {pipeline_mode = #tpu.pipeline_mode<synchronous>, transform_indices = @transform_1, window_bounds = array<i64: 1, 512>}, {pipeline_mode = #tpu.pipeline_mode<synchronous>, transform_indices = @transform_2, window_bounds = array<i64: 1, 512>}, {pipeline_mode = #tpu.pipeline_mode<synchronous>, transform_indices = @transform_3, window_bounds = array<i64: 512, 256>}, {pipeline_mode = #tpu.pipeline_mode<synchronous>, transform_indices = @transform_4, window_bounds = array<i64: 1, 256>}, {transform_indices = @transform_5, window_bounds = array<i64: 32, 256>}, {pipeline_mode = #tpu.pipeline_mode<synchronous>, transform_indices = @transform_6, window_bounds = array<i64: 1, 256>}, {pipeline_mode = #tpu.pipeline_mode<synchronous>, transform_indices = @transform_7, window_bounds = array<i64: 1, 256>}]} {
    %c0 = arith.constant 0 : index
    %c0_0 = arith.constant 0 : index
    %0 = vector.load %arg1[%c0, %c0_0] : memref<32x512xf32, #tpu.memory_space<vmem>>, vector<32x512xf32>
    %c0_1 = arith.constant 0 : index
    %c0_2 = arith.constant 0 : index
    %1 = vector.load %arg2[%c0_1, %c0_2] : memref<1x512xf32, #tpu.memory_space<vmem>>, vector<1x512xf32>
    %2 = vector.broadcast %1 : vector<1x512xf32> to vector<32x512xf32>
    %3 = arith.mulf %0, %2 : vector<32x512xf32>
    %c0_3 = arith.constant 0 : index
    %c0_4 = arith.constant 0 : index
    %4 = vector.load %arg3[%c0_3, %c0_4] : memref<1x512xf32, #tpu.memory_space<vmem>>, vector<1x512xf32>
    %5 = vector.broadcast %4 : vector<1x512xf32> to vector<32x512xf32>
    %6 = arith.addf %3, %5 : vector<32x512xf32>
    %7 = arith.truncf %6 : vector<32x512xf32> to vector<32x512xbf16>
    %c0_5 = arith.constant 0 : index
    %c0_6 = arith.constant 0 : index
    %8 = vector.load %arg4[%c0_5, %c0_6] : memref<512x256xbf16, #tpu.memory_space<vmem>>, vector<512x256xbf16>
    %cst = arith.constant dense<0.000000e+00> : vector<32x256xf32>
    %9 = tpu.matmul %7, %8, %cst {dimension_numbers = #tpu.dot_dimension_numbers<[1], [0], [0], [1], [0, 0, 1, 1], [], []>} : vector<32x512xbf16>, vector<512x256xbf16>, vector<32x256xf32> -> vector<32x256xf32>
    %c0_7 = arith.constant 0 : index
    %c0_8 = arith.constant 0 : index
    %10 = vector.load %arg5[%c0_7, %c0_8] : memref<1x256xf32, #tpu.memory_space<vmem>>, vector<1x256xf32>
    %11 = vector.broadcast %10 : vector<1x256xf32> to vector<32x256xf32>
    %12 = arith.addf %9, %11 : vector<32x256xf32>
    %cst_9 = arith.constant 0.000000e+00 : f32
    %13 = vector.broadcast %cst_9 : f32 to vector<32x256xf32>
    %14 = arith.cmpf ogt, %12, %13 : vector<32x256xf32>
    %cst_10 = arith.constant 2.000000e-01 : f32
    %15 = vector.broadcast %cst_10 : f32 to vector<32x256xf32>
    %16 = arith.mulf %15, %12 : vector<32x256xf32>
    %17 = arith.select %14, %12, %16 : vector<32x256xi1>, vector<32x256xf32>
    %c0_11 = arith.constant 0 : index
    %c0_12 = arith.constant 0 : index
    %18 = vector.load %arg6[%c0_11, %c0_12] : memref<32x256xf32, #tpu.memory_space<vmem>>, vector<32x256xf32>
    tpu.vector_store %arg6[%c0_11, %c0_12], %17 {strides = array<i32>} : memref<32x256xf32, #tpu.memory_space<vmem>>, vector<32x256xf32>,
    %c32_i32 = arith.constant 32 : i32
    %19 = arith.muli %arg0, %c32_i32 : i32
    %20 = tpu.iota {dimensions = array<i32: 0>} : vector<32x1xi32>
    %21 = vector.broadcast %19 : i32 to vector<32x1xi32>
    %22 = arith.addi %21, %20 : vector<32x1xi32>
    %c48_i32 = arith.constant 48 : i32
    %23 = vector.broadcast %c48_i32 : i32 to vector<32x1xi32>
    %24 = arith.cmpi slt, %22, %23 : vector<32x1xi32>
    %cst_13 = arith.constant 0.000000e+00 : f32
    %25 = vector.shape_cast %24 : vector<32x1xi1> to vector<32x1xi1>
    %26 = vector.broadcast %25 : vector<32x1xi1> to vector<32x256xi1>
    %27 = vector.broadcast %cst_13 : f32 to vector<32x256xf32>
    %28 = arith.select %26, %17, %27 : vector<32x256xi1>, vector<32x256xf32>
    %c0_i32 = arith.constant 0 : i32
    %29 = arith.cmpi eq, %arg0, %c0_i32 : i32
    %30 = arith.extui %29 : i1 to i32
    %c0_i32_14 = arith.constant 0 : i32
    %31 = arith.cmpi ne, %30, %c0_i32_14 : i32
    scf.if %31 {
      %cst_25 = arith.constant 0.000000e+00 : f32
      %43 = vector.broadcast %cst_25 : f32 to vector<1x256xf32>
      %c0_26 = arith.constant 0 : index
      %c0_27 = arith.constant 0 : index
      %44 = vector.load %arg7[%c0_26, %c0_27] : memref<1x256xf32, #tpu.memory_space<vmem>>, vector<1x256xf32>
      tpu.vector_store %arg7[%c0_26, %c0_27], %43 {strides = array<i32>} : memref<1x256xf32, #tpu.memory_space<vmem>>, vector<1x256xf32>,
      %cst_28 = arith.constant 0.000000e+00 : f32
      %45 = vector.broadcast %cst_28 : f32 to vector<1x256xf32>
      %c0_29 = arith.constant 0 : index
      %c0_30 = arith.constant 0 : index
      %46 = vector.load %arg8[%c0_29, %c0_30] : memref<1x256xf32, #tpu.memory_space<vmem>>, vector<1x256xf32>
      tpu.vector_store %arg8[%c0_29, %c0_30], %45 {strides = array<i32>} : memref<1x256xf32, #tpu.memory_space<vmem>>, vector<1x256xf32>,
    } else {
    }
    %c0_15 = arith.constant 0 : index
    %c0_16 = arith.constant 0 : index
    %32 = vector.load %arg7[%c0_15, %c0_16] : memref<1x256xf32, #tpu.memory_space<vmem>>, vector<1x256xf32>
    %cst_17 = arith.constant dense<0.000000e+00> : vector<256xf32>
    %33 = vector.multi_reduction <add>, %28, %cst_17 [0] : vector<32x256xf32> to vector<256xf32>
    %34 = vector.shape_cast %33 : vector<256xf32> to vector<1x256xf32>
    %35 = arith.addf %32, %34 : vector<1x256xf32>
    %c0_18 = arith.constant 0 : index
    %c0_19 = arith.constant 0 : index
    %36 = vector.load %arg7[%c0_18, %c0_19] : memref<1x256xf32, #tpu.memory_space<vmem>>, vector<1x256xf32>
    tpu.vector_store %arg7[%c0_18, %c0_19], %35 {strides = array<i32>} : memref<1x256xf32, #tpu.memory_space<vmem>>, vector<1x256xf32>,
    %c0_20 = arith.constant 0 : index
    %c0_21 = arith.constant 0 : index
    %37 = vector.load %arg8[%c0_20, %c0_21] : memref<1x256xf32, #tpu.memory_space<vmem>>, vector<1x256xf32>
    %38 = arith.mulf %28, %28 : vector<32x256xf32>
    %cst_22 = arith.constant dense<0.000000e+00> : vector<256xf32>
    %39 = vector.multi_reduction <add>, %38, %cst_22 [0] : vector<32x256xf32> to vector<256xf32>
    %40 = vector.shape_cast %39 : vector<256xf32> to vector<1x256xf32>
    %41 = arith.addf %37, %40 : vector<1x256xf32>
    %c0_23 = arith.constant 0 : index
    %c0_24 = arith.constant 0 : index
    %42 = vector.load %arg8[%c0_23, %c0_24] : memref<1x256xf32, #tpu.memory_space<vmem>>, vector<1x256xf32>
    tpu.vector_store %arg8[%c0_23, %c0_24], %41 {strides = array<i32>} : memref<1x256xf32, #tpu.memory_space<vmem>>, vector<1x256xf32>,
    return
  }
  func.func @transform_0(%arg0: i32) -> (i32, i32) {
    %c0_i32 = arith.constant 0 : i32
    %c0_i32_0 = arith.constant 0 : i32
    return %arg0, %c0_i32 : i32, i32
  }
  func.func @transform_1(%arg0: i32) -> (i32, i32) {
    %c0_i32 = arith.constant 0 : i32
    %c0_i32_0 = arith.constant 0 : i32
    %c0_i32_1 = arith.constant 0 : i32
    return %c0_i32, %c0_i32_0 : i32, i32
  }
  func.func @transform_2(%arg0: i32) -> (i32, i32) {
    %c0_i32 = arith.constant 0 : i32
    %c0_i32_0 = arith.constant 0 : i32
    %c0_i32_1 = arith.constant 0 : i32
    return %c0_i32, %c0_i32_0 : i32, i32
  }
  func.func @transform_3(%arg0: i32) -> (i32, i32) {
    %c0_i32 = arith.constant 0 : i32
    %c0_i32_0 = arith.constant 0 : i32
    %c0_i32_1 = arith.constant 0 : i32
    return %c0_i32, %c0_i32_0 : i32, i32
  }
  func.func @transform_4(%arg0: i32) -> (i32, i32) {
    %c0_i32 = arith.constant 0 : i32
    %c0_i32_0 = arith.constant 0 : i32
    %c0_i32_1 = arith.constant 0 : i32
    return %c0_i32, %c0_i32_0 : i32, i32
  }
  func.func @transform_5(%arg0: i32) -> (i32, i32) {
    %c0_i32 = arith.constant 0 : i32
    %c0_i32_0 = arith.constant 0 : i32
    return %arg0, %c0_i32 : i32, i32
  }
  func.func @transform_6(%arg0: i32) -> (i32, i32) {
    %c0_i32 = arith.constant 0 : i32
    %c0_i32_0 = arith.constant 0 : i32
    %c0_i32_1 = arith.constant 0 : i32
    return %c0_i32, %c0_i32_0 : i32, i32
  }
  func.func @transform_7(%arg0: i32) -> (i32, i32) {
    %c0_i32 = arith.constant 0 : i32
    %c0_i32_0 = arith.constant 0 : i32
    %c0_i32_1 = arith.constant 0 : i32
    return %c0_i32, %c0_i32_0 : i32, i32
  }
}

module attributes {stable_mosaic.version = 11 : i64} {
  func.func @_bn_linear_tanh_kernel(%arg0: i32, %arg1: memref<32x512xf32, #tpu.memory_space<vmem>>, %arg2: memref<1x512xf32, #tpu.memory_space<vmem>>, %arg3: memref<1x512xf32, #tpu.memory_space<vmem>>, %arg4: memref<512x1024xbf16, #tpu.memory_space<vmem>>, %arg5: memref<1x1024xf32, #tpu.memory_space<vmem>>, %arg6: memref<32x1024xf32, #tpu.memory_space<vmem>>) attributes {dimension_semantics = [#tpu.dimension_semantics<parallel>], iteration_bounds = array<i64: 2>, scalar_prefetch = 0 : i64, scratch_operands = 0 : i64, tpu.core_type = #tpu.core_type<tc>, window_params = [{transform_indices = @transform_0, window_bounds = array<i64: 32, 512>}, {pipeline_mode = #tpu.pipeline_mode<synchronous>, transform_indices = @transform_1, window_bounds = array<i64: 1, 512>}, {pipeline_mode = #tpu.pipeline_mode<synchronous>, transform_indices = @transform_2, window_bounds = array<i64: 1, 512>}, {pipeline_mode = #tpu.pipeline_mode<synchronous>, transform_indices = @transform_3, window_bounds = array<i64: 512, 1024>}, {pipeline_mode = #tpu.pipeline_mode<synchronous>, transform_indices = @transform_4, window_bounds = array<i64: 1, 1024>}, {transform_indices = @transform_5, window_bounds = array<i64: 32, 1024>}]} {
    %c0 = arith.constant 0 : index
    %c0_0 = arith.constant 0 : index
    %0 = vector.load %arg1[%c0, %c0_0] : memref<32x512xf32, #tpu.memory_space<vmem>>, vector<32x512xf32>
    %c0_1 = arith.constant 0 : index
    %c0_2 = arith.constant 0 : index
    %1 = vector.load %arg2[%c0_1, %c0_2] : memref<1x512xf32, #tpu.memory_space<vmem>>, vector<1x512xf32>
    %2 = vector.broadcast %1 : vector<1x512xf32> to vector<32x512xf32>
    %3 = arith.mulf %0, %2 : vector<32x512xf32>
    %c0_3 = arith.constant 0 : index
    %c0_4 = arith.constant 0 : index
    %4 = vector.load %arg3[%c0_3, %c0_4] : memref<1x512xf32, #tpu.memory_space<vmem>>, vector<1x512xf32>
    %5 = vector.broadcast %4 : vector<1x512xf32> to vector<32x512xf32>
    %6 = arith.addf %3, %5 : vector<32x512xf32>
    %7 = arith.truncf %6 : vector<32x512xf32> to vector<32x512xbf16>
    %c0_5 = arith.constant 0 : index
    %c0_6 = arith.constant 0 : index
    %8 = vector.load %arg4[%c0_5, %c0_6] : memref<512x1024xbf16, #tpu.memory_space<vmem>>, vector<512x1024xbf16>
    %cst = arith.constant dense<0.000000e+00> : vector<32x1024xf32>
    %9 = tpu.matmul %7, %8, %cst {dimension_numbers = #tpu.dot_dimension_numbers<[1], [0], [0], [1], [0, 0, 1, 1], [], []>} : vector<32x512xbf16>, vector<512x1024xbf16>, vector<32x1024xf32> -> vector<32x1024xf32>
    %c0_7 = arith.constant 0 : index
    %c0_8 = arith.constant 0 : index
    %10 = vector.load %arg5[%c0_7, %c0_8] : memref<1x1024xf32, #tpu.memory_space<vmem>>, vector<1x1024xf32>
    %11 = vector.broadcast %10 : vector<1x1024xf32> to vector<32x1024xf32>
    %12 = arith.addf %9, %11 : vector<32x1024xf32>
    %13 = math.tanh %12 : vector<32x1024xf32>
    %c0_9 = arith.constant 0 : index
    %c0_10 = arith.constant 0 : index
    %14 = vector.load %arg6[%c0_9, %c0_10] : memref<32x1024xf32, #tpu.memory_space<vmem>>, vector<32x1024xf32>
    tpu.vector_store %arg6[%c0_9, %c0_10], %13 {strides = array<i32>} : memref<32x1024xf32, #tpu.memory_space<vmem>>, vector<32x1024xf32>,
    return
  }
  func.func @transform_0(%arg0: i32) -> (i32, i32) {
    %c0_i32 = arith.constant 0 : i32
    %c0_i32_0 = arith.constant 0 : i32
    return %arg0, %c0_i32 : i32, i32
  }
  func.func @transform_1(%arg0: i32) -> (i32, i32) {
    %c0_i32 = arith.constant 0 : i32
    %c0_i32_0 = arith.constant 0 : i32
    %c0_i32_1 = arith.constant 0 : i32
    return %c0_i32, %c0_i32_0 : i32, i32
  }
  func.func @transform_2(%arg0: i32) -> (i32, i32) {
    %c0_i32 = arith.constant 0 : i32
    %c0_i32_0 = arith.constant 0 : i32
    %c0_i32_1 = arith.constant 0 : i32
    return %c0_i32, %c0_i32_0 : i32, i32
  }
  func.func @transform_3(%arg0: i32) -> (i32, i32) {
    %c0_i32 = arith.constant 0 : i32
    %c0_i32_0 = arith.constant 0 : i32
    %c0_i32_1 = arith.constant 0 : i32
    return %c0_i32, %c0_i32_0 : i32, i32
  }
  func.func @transform_4(%arg0: i32) -> (i32, i32) {
    %c0_i32 = arith.constant 0 : i32
    %c0_i32_0 = arith.constant 0 : i32
    %c0_i32_1 = arith.constant 0 : i32
    return %c0_i32, %c0_i32_0 : i32, i32
  }
  func.func @transform_5(%arg0: i32) -> (i32, i32) {
    %c0_i32 = arith.constant 0 : i32
    %c0_i32_0 = arith.constant 0 : i32
    return %arg0, %c0_i32 : i32, i32
  }
}

</mosaic_0001>

<bundles_post_ra>
// kernel: generator_forward.4
= control target key start
LH: loop header
LB: loop body
LE: loop exit
PB: predicated region body
PF: predicated region fallthrough
CT: control target
= control target key end

     0   :  { %13 = vsyncpa [#allocation3], 0  ;;  %s1510_s0 = inlined_call_operand.vmem [shape: f32[64,128], index: 0, kind: input, shape index: {}]   ;;  %s1511_s1 = inlined_call_operand.vmem [shape: f32[1,128], index: 1, kind: input, shape index: {}]   ;;  %s1512_s2 = inlined_call_operand.vmem [shape: f32[1,128], index: 2, kind: input, shape index: {}]   ;;  %s1513_s3 = inlined_call_operand.hbm [shape: bf16[128,512], index: 3, kind: input, shape index: {}]   ;;  %s1514_s4 = inlined_call_operand.hbm [shape: f32[1,512], index: 4, kind: input, shape index: {}]   ;;  %s1515_s5 = inlined_call_operand.vmem [shape: f32[64,512], index: 5, kind: output, shape index: {0}]   ;;  %s1516_s6 = inlined_call_operand.vmem [shape: f32[1,512], index: 6, kind: output, shape index: {1}]   ;;  %s1517_s7 = inlined_call_operand.vmem [shape: f32[1,512], index: 7, kind: output, shape index: {2}]  }
   0x1   :  { %14 = vsyncpa [#allocation5], 0  ;;  %s1273_s24 = smov 0  }
   0x2 LB: > { %s220_s27 = sshll.u32 %s1513_s3, 4  ;;  %s1282_s28 = sadd.s32 4294967295, %s1226_s24   ;;  %s1226_s24 = sphi %s1273_s24, %s20_s24   ;;  %s221_s27 = int_to_ptr.hbm [resolvable:$true] %s220_s27 }
   0x3   : > { %p941_p0 = scmp.ge.s32.totalorder %s1226_s24, 1  ;;  %p203_p1 = scmp.lt.s32.totalorder %s1226_s24, 3 }
   0x4   : > { %p942_p2 = scmp.ne.s32.totalorder %s1282_s28, 0  ;;  %p1133_p3 = scmp.eq.s32.totalorder %s1282_s28, 0 }
   0x5   : > { %p1288_p4 = pnand %p941_p0, %p203_p1  ;;  %s1228_s30 = smov [#allocation2]  }
   0x6   : > { %s222_s8 = sshll.u32 %s1228_s30, 4  ;;  %s235_s11 = sshll.u32 %s1514_s4, 4  ;;  %s223_s8 = int_to_ptr.vmem [resolvable:$true] %s222_s8  ;;  %s236_s11 = int_to_ptr.hbm [resolvable:$true] %s235_s11 }
   0x7   : > { %p1126_p5 = pneg %p1288_p4  ;;  %s1229_s12 = smov [#allocation4]  }
   0x8   : > { %s237_s13 = sshll.u32 %s1229_s12, 4  ;;  %s1230_s14 = smov 256   ;;  %s238_s13 = int_to_ptr.vmem [resolvable:$true] %s237_s13 }
   0x9   : > { %p1127_p6 = pnand %p1133_p3, %p1126_p5  ;;  %s1231_s15 = smov 16  }
   0xa   : > { %259 = sbr.rel (%p1288_p4) target bundleno = 256 (0x100), region = 40 }
   0xb   : > { %1129 = dma.hbm_to_vmem [thread:$0]  (!%p1127_p6), %s221_s27, 4096, %s223_s8, [#allocation3], %s1230_s14, %s1230_s14, %s1231_s15  }
   0xc   : > { %1132 = dma.hbm_to_vmem [thread:$0]  (!%p1127_p6), %s236_s11, 64, %s238_s13, [#allocation5]  }
   0xf   : > { %1217 = dma.done.wait (%p1133_p3), [#allocation3], 4096  }
  0x10   : > { %1219 = vsyncadd (%p1133_p3), [#allocation3], 4294963200 }
  0x11   : > { %1221 = dma.done.wait (%p1133_p3), [#allocation5], 64  }
  0x12   : > { %1223 = vsyncadd (%p1133_p3), [#allocation5], 4294967232  ;;  %s948_s16 = sshll.u32 %s1282_s28, 2  ;;  %v1067_v0 = vld [vmem:[#allocation2 + $0xe0] sm:$0xf]  ;;  %s1081_s27 = sshll.u32 %s1282_s28, 5 }
  0x13   : > { %p1312_p7 = scmp.lt.s32.totalorder %s948_s16, 7  ;;  %v1116_v1 = vld [vmem:[#allocation2 + $0xec] sm:$0xf0]  ;;  %v1114_v2 = vld [vmem:[#allocation2 + $0xe4] sm:$0xf] }
  0x14   : > { %v1068_v3 = vor.u32 %v1116_v1, %v1067_v0  ;;  %v1069_v4 = vld [vmem:[#allocation2 + $0xf0] sm:$0xf0]  ;;  %v1075_v5 = vld [vmem:[#allocation2 + $0xe8] sm:$0xf]  ;;  %v1117_v6 = vld [vmem:[#allocation2 + $0xf4] sm:$0xf0] }
  0x15   : > { %v1072_v7 = vor.u32 %v1114_v2, %v1069_v4  ;;  %v1076_v8 = vor.u32 %v1117_v6, %v1075_v5  ;;  %v1115_v9 = vld [vmem:[#allocation2 + $0xec] sm:$0xf]  ;;  %v1077_v10 = vld [vmem:[#allocation2 + $0xf8] sm:$0xf0]  ;;  %v1051_v11 = vld [vmem:[#allocation2 + $0xc0] sm:$0xf] }
  0x16   : > { %535 = vmatpush.bf16.msra.mxu0 %v1068_v3  ;;  %v1080_v12 = vor.u32 %v1115_v9, %v1077_v10  ;;  %v1112_v13 = vld [vmem:[#allocation2 + $0xcc] sm:$0xf0]  ;;  %v1110_v14 = vld [vmem:[#allocation2 + $0xc4] sm:$0xf]  ;;  %v1053_v15 = vld [vmem:[#allocation2 + $0xd0] sm:$0xf0] }
  0x17   : > { %554 = vmatpush.bf16.msra.mxu1 %v1072_v7  ;;  %573 = vmatpush.bf16.msra.mxu2 %v1076_v8  ;;  %v1052_v16 = vor.u32 %v1112_v13, %v1051_v11  ;;  %v1056_v17 = vor.u32 %v1110_v14, %v1053_v15  ;;  %v1059_v18 = vld [vmem:[#allocation2 + $0xc8] sm:$0xf]  ;;  %v1113_v19 = vld [vmem:[#allocation2 + $0xd4] sm:$0xf0]  ;;  %v1111_v20 = vld [vmem:[#allocation2 + $0xcc] sm:$0xf] }
  0x18   : > { %592 = vmatpush.bf16.msra.mxu3 %v1080_v12  ;;  %v1060_v21 = vor.u32 %v1113_v19, %v1059_v18  ;;  %v1061_v22 = vld [vmem:[#allocation2 + $0xd8] sm:$0xf0]  ;;  %v1035_v23 = vld [vmem:[#allocation2 + $0xa0] sm:$0xf]  ;;  %v1108_v24 = vld [vmem:[#allocation2 + $0xac] sm:$0xf0] }
  0x19   : > { %v1064_v25 = vor.u32 %v1111_v20, %v1061_v22  ;;  %v1106_v26 = vld [vmem:[#allocation2 + $0xa4] sm:$0xf]  ;;  %v1037_v27 = vld [vmem:[#allocation2 + $0xb0] sm:$0xf0]  ;;  %v1043_v28 = vld [vmem:[#allocation2 + $0xa8] sm:$0xf]  ;;  %v1036_v29 = vor.u32 %v1108_v24, %v1035_v23 }
  0x1a   : > { %536 = vmatpush.bf16.msra.mxu0 %v1052_v16  ;;  %v1109_v30 = vld [vmem:[#allocation2 + $0xb4] sm:$0xf0]  ;;  %v1107_v31 = vld [vmem:[#allocation2 + $0xac] sm:$0xf]  ;;  %v1045_v32 = vld [vmem:[#allocation2 + $0xb8] sm:$0xf0]  ;;  %v1040_v33 = vor.u32 %v1106_v26, %v1037_v27 }
  0x1b   : > { %555 = vmatpush.bf16.msra.mxu1 %v1056_v17  ;;  %574 = vmatpush.bf16.msra.mxu2 %v1060_v21  ;;  %v1044_v34 = vor.u32 %v1109_v30, %v1043_v28  ;;  %v1019_v35 = vld [vmem:[#allocation2 + $0x80] sm:$0xf]  ;;  %v1104_v36 = vld [vmem:[#allocation2 + $0x8c] sm:$0xf0]  ;;  %v1102_v37 = vld [vmem:[#allocation2 + $0x84] sm:$0xf]  ;;  %v1048_v38 = vor.u32 %v1107_v31, %v1045_v32 }
  0x1c   : > { %593 = vmatpush.bf16.msra.mxu3 %v1064_v25  ;;  %v1021_v39 = vld [vmem:[#allocation2 + $0x90] sm:$0xf0]  ;;  %v1027_v40 = vld [vmem:[#allocation2 + $0x88] sm:$0xf]  ;;  %v1105_v41 = vld [vmem:[#allocation2 + $0x94] sm:$0xf0]  ;;  %v1020_v44 = vor.u32 %v1104_v36, %v1019_v35 }
  0x1d   : > { %v1103_v42 = vld [vmem:[#allocation2 + $0x8c] sm:$0xf]  ;;  %v1029_v43 = vld [vmem:[#allocation2 + $0x98] sm:$0xf0]  ;;  %s1523_s16 = smov (!%p1312_p7, %s948_s16), 7  ;;  %v1024_v45 = vor.u32 %v1102_v37, %v1021_v39  ;;  %v1028_v46 = vor.u32 %v1105_v41, %v1027_v40 }
  0x1e   : > { %537 = vmatpush.bf16.msra.mxu0 %v1036_v29  ;;  %v1003_v47 = vld [vmem:[#allocation2 + $0x60] sm:$0xf]  ;;  %v1100_v48 = vld [vmem:[#allocation2 + $0x6c] sm:$0xf0]  ;;  %v1098_v49 = vld [vmem:[#allocation2 + $0x64] sm:$0xf]  ;;  %v1032_v50 = vor.u32 %v1103_v42, %v1029_v43 }
  0x1f   : > { %556 = vmatpush.bf16.msra.mxu1 %v1040_v33  ;;  %575 = vmatpush.bf16.msra.mxu2 %v1044_v34  ;;  %v1005_v51 = vld [vmem:[#allocation2 + $0x70] sm:$0xf0]  ;;  %v1011_v52 = vld [vmem:[#allocation2 + $0x68] sm:$0xf]  ;;  %v1101_v53 = vld [vmem:[#allocation2 + $0x74] sm:$0xf0]  ;;  %v1004_v56 = vor.u32 %v1100_v48, %v1003_v47  ;;  %v676_v48 = vlaneseq }
  0x20   : > { %594 = vmatpush.bf16.msra.mxu3 %v1048_v38  ;;  %v1099_v54 = vld [vmem:[#allocation2 + $0x6c] sm:$0xf]  ;;  %v1013_v55 = vld [vmem:[#allocation2 + $0x78] sm:$0xf0]  ;;  %s949_s18 = sshll.u32 %s1523_s16, 3  ;;  %v1008_v57 = vor.u32 %v1098_v49, %v1005_v51  ;;  %v1012_v58 = vor.u32 %v1101_v53, %v1011_v52  ;;  %v1342_v51 = vstv %s1081_s27  ;;  %s1085_s29 = sshll.u32 %s1523_s16, 5 }
  0x21   : > { %v987_v59 = vld [vmem:[#allocation2 + $0x40] sm:$0xf]  ;;  %v1096_v60 = vld [vmem:[#allocation2 + $0x4c] sm:$0xf0]  ;;  %v1094_v61 = vld [vmem:[#allocation2 + $0x44] sm:$0xf]  ;;  %v1016_v62 = vor.u32 %v1099_v54, %v1013_v55  ;;  %s1326_s21 = scalar_lea.vmem %s1510_s0, %s949_s18  ;;  %s1357_s9 = scalar_lea.vmem %s1515_s5, %s1085_s29 }
  0x22   : > { %538 = vmatpush.bf16.msra.mxu0 %v1020_v44  ;;  %v989_v63 = vld [vmem:[#allocation2 + $0x50] sm:$0xf0]  ;;  %v995_v0 = vld [vmem:[#allocation2 + $0x48] sm:$0xf]  ;;  %v1097_v1 = vld [vmem:[#allocation2 + $0x54] sm:$0xf0]  ;;  %v988_v5 = vor.u32 %v1096_v60, %v987_v59 }
  0x23   : > { %557 = vmatpush.bf16.msra.mxu1 %v1024_v45  ;;  %576 = vmatpush.bf16.msra.mxu2 %v1028_v46  ;;  %v1095_v2 = vld [vmem:[#allocation2 + $0x4c] sm:$0xf]  ;;  %v997_v3 = vld [vmem:[#allocation2 + $0x58] sm:$0xf0]  ;;  %v971_v4 = vld [vmem:[#allocation2 + $0x20] sm:$0xf]  ;;  %v992_v9 = vor.u32 %v1094_v61, %v989_v63  ;;  %v996_v10 = vor.u32 %v1097_v1, %v995_v0 }
  0x24   : > { %595 = vmatpush.bf16.msra.mxu3 %v1032_v50  ;;  %v1092_v6 = vld [vmem:[#allocation2 + $0x2c] sm:$0xf0]  ;;  %v1090_v7 = vld [vmem:[#allocation2 + $0x24] sm:$0xf]  ;;  %v973_v8 = vld [vmem:[#allocation2 + $0x30] sm:$0xf0]  ;;  %v1000_v14 = vor.u32 %v1095_v2, %v997_v3 }
  0x25   : > { %v979_v11 = vld [vmem:[#allocation2 + $0x28] sm:$0xf]  ;;  %v1093_v12 = vld [vmem:[#allocation2 + $0x34] sm:$0xf0]  ;;  %v1091_v13 = vld [vmem:[#allocation2 + $0x2c] sm:$0xf]  ;;  %v972_v19 = vor.u32 %v1092_v6, %v971_v4  ;;  %v976_v20 = vor.u32 %v1090_v7, %v973_v8 }
  0x26   : > { %539 = vmatpush.bf16.msra.mxu0 %v1004_v56  ;;  %v981_v15 = vld [vmem:[#allocation2 + $0x38] sm:$0xf0]  ;;  %v311_v16 = vld [vmem:[%s1326_s21] sm:$0xff]  ;;  %v312_v17 = vld [vmem:[%s1326_s21 + $0x8] sm:$0xff]  ;;  %v980_v22 = vor.u32 %v1093_v12, %v979_v11  ;;  %v1340_v50 = vshrl.u32 %v676_v48, 7 }
  0x27   : > { %558 = vmatpush.bf16.msra.mxu1 %v1008_v57  ;;  %577 = vmatpush.bf16.msra.mxu2 %v1012_v58  ;;  %v1150_v18 = vld [vmem:[%s1511_s1] ss:$0 sm:$0xff]  ;;  %v1088_v24 = vld [vmem:[#allocation2 + $0xc] sm:$0xf0]  ;;  %v1086_v25 = vld [vmem:[#allocation2 + $0x4] sm:$0xf]  ;;  %v984_v28 = vor.u32 %v1091_v13, %v981_v15 }
  0x28   : > { %596 = vmatpush.bf16.msra.mxu3 %v1016_v62  ;;  %v1151_v21 = vld [vmem:[%s1512_s2] ss:$0 sm:$0xff]  ;;  %v319_v26 = vmul.f32 %v1150_v18, %v311_v16  ;;  %v320_v27 = vmul.f32 %v1150_v18, %v312_v17  ;;  %v957_v29 = vld [vmem:[#allocation2 + $0x10] sm:$0xf0]  ;;  %v963_v30 = vld [vmem:[#allocation2 + $0x8] sm:$0xf]  ;;  %v682_v54 = vadd.s32 %v1342_v51, %v1340_v50 }
  0x29   : > { %v955_v23 = vld [vmem:[#allocation2] sm:$0xf]  ;;  %v1089_v31 = vld [vmem:[#allocation2 + $0x14] sm:$0xf0]  ;;  %v1087_v32 = vld [vmem:[#allocation2 + $0xc] sm:$0xf]  ;;  %v960_v37 = vor.u32 %v1086_v25, %v957_v29 }
  0x2a   : > { %540 = vmatpush.bf16.msra.mxu0 %v988_v5  ;;  %v965_v33 = vld [vmem:[#allocation2 + $0x18] sm:$0xf0]  ;;  %v327_v34 = vadd.f32 %v1151_v21, %v319_v26  ;;  %v328_v35 = vadd.f32 %v1151_v21, %v320_v27  ;;  %v956_v36 = vor.u32 %v1088_v24, %v955_v23  ;;  %v964_v38 = vor.u32 %v1089_v31, %v963_v30  ;;  %v313_v41 = vld [vmem:[%s1326_s21 + $0x10] sm:$0xff]  ;;  %v365_v49 = vld [vmem:[#allocation4] sm:$0xf] }
  0x2b   : > { %559 = vmatpush.bf16.msra.mxu1 %v992_v9  ;;  %578 = vmatpush.bf16.msra.mxu2 %v996_v10  ;;  %v968_v39 = vor.u32 %v1087_v32, %v965_v33  ;;  %v314_v42 = vld [vmem:[%s1326_s21 + $0x18] sm:$0xff]  ;;  %v321_v43 = vmul.f32 %v1150_v18, %v313_v41  ;;  %v1344_v52 = vperm.slane %v365_v49, 0  ;;  %v1346_v53 = vperm.slane %v365_v49, 1 }
  0x2c   : > { %597 = vmatpush.bf16.msra.mxu3 %v1000_v14  ;;  %v331_v40 = vpack.c.bf16 %v328_v35, %v327_v34  ;;  %v322_v44 = vmul.f32 %v1150_v18, %v314_v42  ;;  %v678_v59 = vadd.s32 8, %v1340_v50  ;;  %vm686_vm1 = vcmp.lt.s32.totalorder %v682_v54, 48 }
  0x2d   : > { %v329_v45 = vadd.f32 %v1151_v21, %v321_v43  ;;  %v1359_v62 = vperm.slane %v365_v49, 2  ;;  %v1361_v0 = vperm.slane %v365_v49, 3  ;;  %v679_v12 = vadd.s32 16, %v1340_v50 }
  0x2e   : > { %541 = vmatpush.bf16.msra.mxu0 %v972_v19  ;;  %v330_v46 = vadd.f32 %v1151_v21, %v322_v44  ;;  %v683_v3 = vadd.s32 %v1342_v51, %v678_v59 }
  0x2f   : > { %560 = vmatpush.bf16.msra.mxu1 %v976_v20  ;;  %579 = vmatpush.bf16.msra.mxu2 %v980_v22  ;;  %v1382_v22 = vadd.s32 %v1342_v51, %v679_v12 }
  0x30   : > { %598 = vmatpush.bf16.msra.mxu3 %v984_v28  ;;  %v332_v47 = vpack.c.bf16 %v330_v46, %v329_v45  ;;  %vm687_vm4 = vcmp.lt.s32.totalorder %v683_v3, 48 }
  0x31   : > { %vm688_vm8 = vcmp.lt.s32.totalorder %v1382_v22, 48 }
  0x32   : > { %542 = vmatpush.bf16.msra.mxu0 %v956_v36  ;;  %v680_v36 = vadd.s32 24, %v1340_v50 }
  0x33   : > { %561 = vmatpush.bf16.msra.mxu1 %v960_v37  ;;  %580 = vmatpush.bf16.msra.mxu2 %v964_v38 }
  0x34   : > { %599 = vmatpush.bf16.msra.mxu3 %v968_v39 }
  0x35   : > { %543 = vmatmul.bf16.vlgmr.msra.gmra.mxu0 %v331_v40 }
  0x36   : > { %562 = vmatmul.bf16.vlgmr.msra.gmra.mxu1 %v331_v40  ;;  %581 = vmatmul.bf16.vlgmr.msra.gmra.mxu2 %v331_v40 }
  0x37   : > { %600 = vmatmul.bf16.vlgmr.msra.gmra.mxu3 %v331_v40 }
  0x45   : > { %548 = vmatmul.bf16.gmra.mxu0 %v332_v47 }
  0x46   : > { %567 = vmatmul.bf16.gmra.mxu1 %v332_v47  ;;  %586 = vmatmul.bf16.gmra.mxu2 %v332_v47 }
  0x47   : > { %605 = vmatmul.bf16.gmra.mxu3 %v332_v47  ;;  %v685_v47 = vadd.s32 %v1342_v51, %v680_v36 }
  0x49   : > { %vm689_vm14 = vcmp.lt.s32.totalorder %v685_v47, 48 }
  0xb2   : > { %v544_v55 = vpop.f32.mrf.mxu0 }
  0xb3   : > { %v545_v56 = vadd.f32 %v544_v55, %v1344_v52  ;;  %v563_v57 = vpop.f32.mrf.mxu1 }
  0xb4   : > { %v564_v58 = vadd.f32 %v563_v57, %v1346_v53 }
  0xb5   : > { %vm611_vm0 = vcmp.gt.f32.partialorder %v545_v56, 0.0  ;;  %v627_v60 = vmul.f32 0.2, %v545_v56 }
  0xb6   : > { %vm612_vm2 = vcmp.gt.f32.partialorder %v564_v58, 0.0  ;;  %v628_v61 = vmul.f32 0.2, %v564_v58 }
  0xb7   : > { %v643_v63 = vsel %vm611_vm0, %v545_v56, %v627_v60 }
  0xb8   : > { %659 = vst [vmem:[%s1357_s9] sm:$0xff] %v643_v63  ;;  %v1365_v1 = vsel %vm686_vm1, %v643_v63, 0.0  ;;  %v644_v2 = vsel %vm612_vm2, %v564_v58, %v628_v61 }
  0xb9   : > { %660 = vst [vmem:[%s1357_s9 + $0x8] sm:$0xff] %v644_v2  ;;  %v1370_v4 = vsel %vm686_vm1, %v644_v2, 0.0  ;;  %v582_v5 = vpop.f32.mrf.mxu2 }
  0xba   : > { %v583_v6 = vadd.f32 %v582_v5, %v1359_v62  ;;  %v601_v7 = vpop.f32.mrf.mxu3  ;;  %v546_v8 = vpop.f32.mrf.mxu0 }
  0xbb   : > { %v602_v9 = vadd.f32 %v601_v7, %v1361_v0  ;;  %v547_v10 = vadd.f32 %v546_v8, %v1344_v52  ;;  %v565_v11 = vpop.f32.mrf.mxu1 }
  0xbc   : > { %vm613_vm3 = vcmp.gt.f32.partialorder %v583_v6, 0.0  ;;  %v629_v13 = vmul.f32 0.2, %v583_v6  ;;  %v566_v14 = vadd.f32 %v565_v11, %v1346_v53 }
  0xbd   : > { %vm614_vm5 = vcmp.gt.f32.partialorder %v602_v9, 0.0  ;;  %v630_v15 = vmul.f32 0.2, %v602_v9  ;;  %vm615_vm6 = vcmp.gt.f32.partialorder %v547_v10, 0.0  ;;  %v631_v16 = vmul.f32 0.2, %v547_v10 }
  0xbe   : > { %v645_v17 = vsel %vm613_vm3, %v583_v6, %v629_v13  ;;  %vm616_vm7 = vcmp.gt.f32.partialorder %v566_v14, 0.0  ;;  %v632_v18 = vmul.f32 0.2, %v566_v14 }
  0xbf   : > { %661 = vst [vmem:[%s1357_s9 + $0x10] sm:$0xff] %v645_v17  ;;  %v1379_v19 = vsel %vm686_vm1, %v645_v17, 0.0  ;;  %v646_v20 = vsel %vm614_vm5, %v602_v9, %v630_v15  ;;  %v647_v21 = vsel %vm615_vm6, %v547_v10, %v631_v16 }
  0xc0   : > { %662 = vst [vmem:[%s1357_s9 + $0x18] sm:$0xff] %v646_v20  ;;  %v1386_v23 = vsel %vm686_vm1, %v646_v20, 0.0  ;;  %v1389_v24 = vsel %vm687_vm4, %v647_v21, 0.0  ;;  %v648_v25 = vsel %vm616_vm7, %v566_v14, %v632_v18 }
  0xc1   : > { %663 = vst [vmem:[%s1357_s9 + $0x20] sm:$0xff] %v647_v21  ;;  %v1393_v26 = vsel %vm687_vm4, %v648_v25, 0.0  ;;  %v584_v27 = vpop.f32.mrf.mxu2 }
  0xc2   : > { %664 = vst [vmem:[%s1357_s9 + $0x28] sm:$0xff] %v648_v25  ;;  %v585_v28 = vadd.f32 %v584_v27, %v1359_v62  ;;  %v603_v29 = vpop.f32.mrf.mxu3  ;;  %v549_v30 = vpop.f32.mrf.mxu0 }
  0xc3   : > { %v604_v31 = vadd.f32 %v603_v29, %v1361_v0  ;;  %v550_v32 = vadd.f32 %v549_v30, %v1344_v52  ;;  %v568_v33 = vpop.f32.mrf.mxu1 }
  0xc4   : > { %vm617_vm9 = vcmp.gt.f32.partialorder %v585_v28, 0.0  ;;  %v633_v34 = vmul.f32 0.2, %v585_v28  ;;  %v569_v35 = vadd.f32 %v568_v33, %v1346_v53 }
  0xc5   : > { %vm618_vm10 = vcmp.gt.f32.partialorder %v604_v31, 0.0  ;;  %v634_v37 = vmul.f32 0.2, %v604_v31  ;;  %vm619_vm11 = vcmp.gt.f32.partialorder %v550_v32, 0.0  ;;  %v635_v38 = vmul.f32 0.2, %v550_v32 }
  0xc6   : > { %v649_v39 = vsel %vm617_vm9, %v585_v28, %v633_v34  ;;  %vm620_vm12 = vcmp.gt.f32.partialorder %v569_v35, 0.0  ;;  %v636_v40 = vmul.f32 0.2, %v569_v35 }
  0xc7   : > { %665 = vst [vmem:[%s1357_s9 + $0x30] sm:$0xff] %v649_v39  ;;  %v1404_v41 = vsel %vm687_vm4, %v649_v39, 0.0  ;;  %v650_v42 = vsel %vm618_vm10, %v604_v31, %v634_v37  ;;  %v651_v43 = vsel %vm619_vm11, %v550_v32, %v635_v38 }
  0xc8   : > { %666 = vst [vmem:[%s1357_s9 + $0x38] sm:$0xff] %v650_v42  ;;  %v1408_v44 = vsel %vm687_vm4, %v650_v42, 0.0  ;;  %v1412_v45 = vsel %vm688_vm8, %v651_v43, 0.0  ;;  %v652_v46 = vsel %vm620_vm12, %v569_v35, %v636_v40 }
  0xc9   : > { %667 = vst [vmem:[%s1357_s9 + $0x40] sm:$0xff] %v651_v43  ;;  %v1418_v49 = vsel %vm688_vm8, %v652_v46, 0.0  ;;  %v587_v50 = vpop.f32.mrf.mxu2 }
  0xca   : > { %668 = vst [vmem:[%s1357_s9 + $0x48] sm:$0xff] %v652_v46  ;;  %v588_v54 = vadd.f32 %v587_v50, %v1359_v62  ;;  %v606_v55 = vpop.f32.mrf.mxu3  ;;  %v551_v56 = vpop.f32.mrf.mxu0 }
  0xcb   : > { %v607_v57 = vadd.f32 %v606_v55, %v1361_v0  ;;  %v552_v58 = vadd.f32 %v551_v56, %v1344_v52  ;;  %v570_v59 = vpop.f32.mrf.mxu1 }
  0xcc   : > { %vm621_vm13 = vcmp.gt.f32.partialorder %v588_v54, 0.0  ;;  %v637_v51 = vmul.f32 0.2, %v588_v54  ;;  %v571_v60 = vadd.f32 %v570_v59, %v1346_v53 }
  0xcd   : > { %vm622_vm15 = vcmp.gt.f32.partialorder %v607_v57, 0.0  ;;  %v638_v61 = vmul.f32 0.2, %v607_v57  ;;  %vm623_vm0 = vcmp.gt.f32.partialorder %v552_v58, 0.0  ;;  %v639_v63 = vmul.f32 0.2, %v552_v58 }
  0xce   : > { %v653_v2 = vsel %vm621_vm13, %v588_v54, %v637_v51  ;;  %vm624_vm1 = vcmp.gt.f32.partialorder %v571_v60, 0.0  ;;  %v640_v3 = vmul.f32 0.2, %v571_v60 }
  0xcf   : > { %669 = vst [vmem:[%s1357_s9 + $0x50] sm:$0xff] %v653_v2  ;;  %v708_v52 = vsel %vm688_vm8, %v653_v2, 0.0  ;;  %v654_v5 = vsel %vm622_vm15, %v607_v57, %v638_v61  ;;  %v655_v6 = vsel %vm623_vm0, %v552_v58, %v639_v63 }
  0xd0   : > { %670 = vst [vmem:[%s1357_s9 + $0x58] sm:$0xff] %v654_v5  ;;  %v709_v53 = vsel %vm688_vm8, %v654_v5, 0.0  ;;  %v710_v7 = vsel %vm689_vm14, %v655_v6, 0.0  ;;  %v656_v8 = vsel %vm624_vm1, %v571_v60, %v640_v3 }
  0xd1   : > { %671 = vst [vmem:[%s1357_s9 + $0x60] sm:$0xff] %v655_v6  ;;  %v711_v9 = vsel %vm689_vm14, %v656_v8, 0.0  ;;  %v589_v10 = vpop.f32.mrf.mxu2 }
  0xd2   : > { %672 = vst [vmem:[%s1357_s9 + $0x68] sm:$0xff] %v656_v8  ;;  %v590_v11 = vadd.f32 %v589_v10, %v1359_v62  ;;  %v608_v12 = vpop.f32.mrf.mxu3 }
  0xd3   : > { %v609_v13 = vadd.f32 %v608_v12, %v1361_v0 }
  0xd4   : > { %vm625_vm2 = vcmp.gt.f32.partialorder %v590_v11, 0.0  ;;  %v641_v14 = vmul.f32 0.2, %v590_v11  ;;  %717 = sbr.rel (%p942_p2) target bundleno = 220 (0xdc), region = 52 }
  0xd5   : > { %vm626_vm3 = vcmp.gt.f32.partialorder %v609_v13, 0.0  ;;  %v642_v15 = vmul.f32 0.2, %v609_v13 }
  0xd6   : > { %v657_v16 = vsel %vm625_vm2, %v590_v11, %v641_v14 }
  0xd7   : > { %673 = vst [vmem:[%s1357_s9 + $0x70] sm:$0xff] %v657_v16  ;;  %v712_v17 = vsel %vm689_vm14, %v657_v16, 0.0  ;;  %v658_v18 = vsel %vm626_vm3, %v609_v13, %v642_v15 }
  0xd8   : > { %674 = vst [vmem:[%s1357_s9 + $0x78] sm:$0xff] %v658_v18  ;;  %v713_v20 = vsel %vm689_vm14, %v658_v18, 0.0 }
  0xd9   : > { %vm720_vm4 = vcmp.lt.s32.totalorder %v676_v48, 512  ;;  %v1232_v62 = vmov 0.0  }
  0xda   : > { %722 = vst.msk [vmem:[%s1516_s6] sm:$0xf] %vm720_vm4, %v1232_v62 }
  0xdb   : > { %723 = vst.msk [vmem:[%s1517_s7] sm:$0xf] %vm720_vm4, %v1232_v62 }
  0xdc PF: > { %v725_v0 = vadd.f32 %v1389_v24, %v1365_v1  ;;  %v734_v21 = vadd.f32 %v1393_v26, %v1370_v4  ;;  %v743_v22 = vadd.f32 %v1404_v41, %v1379_v19  ;;  %v752_v25 = vadd.f32 %v1408_v44, %v1386_v23 }
  0xdd   : > { %v782_v31 = vmul.f32 %v1365_v1, %v1365_v1  ;;  %v783_v32 = vmul.f32 %v1370_v4, %v1370_v4  ;;  %v784_v33 = vmul.f32 %v1379_v19, %v1379_v19  ;;  %v785_v34 = vmul.f32 %v1386_v23, %v1386_v23 }
  0xde   : > { %v726_v27 = vadd.f32 %v725_v0, %v1412_v45  ;;  %v735_v28 = vadd.f32 %v734_v21, %v1418_v49  ;;  %v744_v29 = vadd.f32 %v743_v22, %v708_v52  ;;  %v753_v30 = vadd.f32 %v752_v25, %v709_v53 }
  0xdf   : > { %v786_v39 = vmul.f32 %v1389_v24, %v1389_v24  ;;  %v787_v40 = vmul.f32 %v1393_v26, %v1393_v26  ;;  %v788_v1 = vmul.f32 %v1404_v41, %v1404_v41  ;;  %v789_v4 = vmul.f32 %v1408_v44, %v1408_v44 }
  0xe0   : > { %v727_v35 = vadd.f32 %v726_v27, %v710_v7  ;;  %v736_v36 = vadd.f32 %v735_v28, %v711_v9  ;;  %v745_v37 = vadd.f32 %v744_v29, %v712_v17  ;;  %v754_v38 = vadd.f32 %v753_v30, %v713_v20 }
  0xe1   : > { %v790_v46 = vmul.f32 %v1412_v45, %v1412_v45  ;;  %v791_v47 = vmul.f32 %v1418_v49, %v1418_v49  ;;  %v792_v24 = vmul.f32 %v708_v52, %v708_v52  ;;  %v793_v50 = vmul.f32 %v709_v53, %v709_v53 }
  0xe2   : > { %v728_v19 = vrot.slane %v727_v35, 4  ;;  %v737_v42 = vrot.slane %v736_v36, 4  ;;  %v746_v43 = vrot.slane %v745_v37, 4  ;;  %v755_v23 = vrot.slane %v754_v38, 4 }
  0xe3   : > { %vm768_vm5 = vcmask 1040384   ;;  %vm770_vm6 = vcmask 1042434   ;;  %v794_v41 = vmul.f32 %v710_v7, %v710_v7  ;;  %v795_v44 = vmul.f32 %v711_v9, %v711_v9 }
  0xe4   : > { %v729_v54 = vadd.f32 %v728_v19, %v727_v35  ;;  %v738_v26 = vadd.f32 %v737_v42, %v736_v36  ;;  %v747_v55 = vadd.f32 %v746_v43, %v745_v37  ;;  %v756_v56 = vadd.f32 %v755_v23, %v754_v38 }
  0xe5   : > { %v796_v57 = vmul.f32 %v712_v17, %v712_v17  ;;  %v797_v58 = vmul.f32 %v713_v20, %v713_v20  ;;  %v798_v45 = vadd.f32 %v786_v39, %v782_v31  ;;  %v807_v63 = vadd.f32 %v787_v40, %v783_v32  ;;  %v724_v31 = vld [vmem:[%s1516_s6] sm:$0xf] }
  0xe6   : > { %v730_v59 = vrot.slane %v729_v54, 2  ;;  %v739_v51 = vrot.slane %v738_v26, 2  ;;  %v748_v60 = vrot.slane %v747_v55, 2  ;;  %v757_v61 = vrot.slane %v756_v56, 2 }
  0xe7   : > { %v816_v2 = vadd.f32 %v788_v1, %v784_v33  ;;  %v825_v49 = vadd.f32 %v789_v4, %v785_v34  ;;  %v799_v53 = vadd.f32 %v798_v45, %v790_v46  ;;  %v808_v8 = vadd.f32 %v807_v63, %v791_v47 }
  0xe8   : > { %v731_v3 = vadd.f32 %v730_v59, %v729_v54  ;;  %v740_v52 = vadd.f32 %v739_v51, %v738_v26  ;;  %v749_v5 = vadd.f32 %v748_v60, %v747_v55  ;;  %v758_v6 = vadd.f32 %v757_v61, %v756_v56  ;;  %v781_v59 = vld [vmem:[%s1517_s7] sm:$0xf] }
  0xe9   : > { %v817_v10 = vadd.f32 %v816_v2, %v792_v24  ;;  %v826_v11 = vadd.f32 %v825_v49, %v793_v50  ;;  %v800_v14 = vadd.f32 %v799_v53, %v794_v41  ;;  %v809_v15 = vadd.f32 %v808_v8, %v795_v44 }
  0xea   : > { %v732_v7 = vrot.slane %v731_v3, 1  ;;  %v741_v9 = vrot.slane %v740_v52, 1  ;;  %v750_v12 = vrot.slane %v749_v5, 1  ;;  %v759_v13 = vrot.slane %v758_v6, 1 }
  0xeb   : > { %v818_v16 = vadd.f32 %v817_v10, %v796_v57  ;;  %v827_v17 = vadd.f32 %v826_v11, %v797_v58  ;;  %v801_v21 = vrot.slane %v800_v14, 4  ;;  %v810_v22 = vrot.slane %v809_v15, 4 }
  0xec   : > { %v733_v18 = vadd.f32 %v732_v7, %v731_v3  ;;  %v742_v20 = vadd.f32 %v741_v9, %v740_v52  ;;  %v751_v62 = vadd.f32 %v750_v12, %v749_v5  ;;  %v760_v0 = vadd.f32 %v759_v13, %v758_v6 }
  0xed   : > { %v819_v25 = vrot.slane %v818_v16, 4  ;;  %v828_v27 = vrot.slane %v827_v17, 4  ;;  %vm772_vm7 = vcmask 1041408   ;;  %v802_v32 = vadd.f32 %v801_v21, %v800_v14 }
  0xee   : > { %v765_v28 = vrot.slane %v742_v20, 7  ;;  %v766_v29 = vrot.slane %v751_v62, 6  ;;  %v767_v30 = vrot.slane %v760_v0, 5  ;;  %v811_v33 = vadd.f32 %v810_v22, %v809_v15 }
  0xef   : > { %v820_v34 = vadd.f32 %v819_v25, %v818_v16  ;;  %v829_v35 = vadd.f32 %v828_v27, %v827_v17  ;;  %vm1486_vm8 = vcmp.lt.s32.totalorder %v676_v48, 512  ;;  %v803_v40 = vrot.slane %v802_v32, 2 }
  0xf0   : > { %v769_v36 = vsel %vm768_vm5, %v733_v18, %v765_v28  ;;  %v771_v37 = vsel %vm770_vm6, %v766_v29, %v767_v30  ;;  %v812_v1 = vrot.slane %v811_v33, 2 }
  0xf1   : > { %v773_v39 = vsel %vm772_vm7, %v769_v36, %v771_v37  ;;  %v821_v4 = vrot.slane %v820_v34, 2  ;;  %v830_v42 = vrot.slane %v829_v35, 2  ;;  %v804_v43 = vadd.f32 %v803_v40, %v802_v32 }
  0xf2   : > { %v775_v19 = vadd.f32 %v773_v39, %v724_v31  ;;  %v813_v23 = vadd.f32 %v812_v1, %v811_v33 }
  0xf3   : > { %v822_v46 = vadd.f32 %v821_v4, %v820_v34  ;;  %v831_v48 = vadd.f32 %v830_v42, %v829_v35  ;;  %v805_v47 = vrot.slane %v804_v43, 1 }
  0xf4   : > { %780 = vst.msk [vmem:[%s1516_s6] sm:$0xf] %vm1486_vm8, %v775_v19  ;;  %v814_v24 = vrot.slane %v813_v23, 1 }
  0xf5   : > { %v823_v50 = vrot.slane %v822_v46, 1  ;;  %v832_v54 = vrot.slane %v831_v48, 1  ;;  %v806_v26 = vadd.f32 %v805_v47, %v804_v43 }
  0xf6   : > { %v815_v55 = vadd.f32 %v814_v24, %v813_v23 }
  0xf7   : > { %v824_v56 = vadd.f32 %v823_v50, %v822_v46  ;;  %v833_v41 = vadd.f32 %v832_v54, %v831_v48 }
  0xf8   : > { %v838_v44 = vrot.slane %v815_v55, 7 }
  0xf9   : > { %v839_v57 = vrot.slane %v824_v56, 6  ;;  %v840_v58 = vrot.slane %v833_v41, 5 }
  0xfa   : > { %v841_v51 = vsel %vm768_vm5, %v806_v26, %v838_v44 }
  0xfb   : > { %v842_v60 = vsel %vm770_vm6, %v839_v57, %v840_v58 }
  0xfc   : > { %v843_v61 = vsel %vm772_vm7, %v841_v51, %v842_v60 }
  0xfd   : > { %v845_v45 = vadd.f32 %v843_v61, %v781_v59 }
  0xff   : > { %846 = vst.msk [vmem:[%s1517_s7] sm:$0xf] %vm1486_vm8, %v845_v45 }
 0x100 PF: > { %s20_s24 = sadd.s32 1, %s1226_s24  }
 0x101   : > { %p17_p8 = scmp.ge.s32.totalorder %s20_s24, 4  }
 0x103   :  { %19 = sbr.rel (!%p17_p8) target bundleno = 2 (0x2), region = 99 }
 0x108   :  { %883 = vsyncpa [#allocation3], 1 }
 0x109   :  { %885 = vsyncpa [#allocation3 + $0x1], 1 }
 0x10a   :  { %886 = vsyncpa [#allocation5], 1 }

// kernel: generator_forward.6
= control target key start
LH: loop header
LB: loop body
LE: loop exit
PB: predicated region body
PF: predicated region fallthrough
CT: control target
= control target key end

     0   :  { %13 = vsyncpa [#allocation3], 0  ;;  %s2037_s0 = inlined_call_operand.vmem [shape: f32[64,256], index: 0, kind: input, shape index: {}]   ;;  %s2038_s1 = inlined_call_operand.vmem [shape: f32[1,256], index: 1, kind: input, shape index: {}]   ;;  %s2039_s2 = inlined_call_operand.vmem [shape: f32[1,256], index: 2, kind: input, shape index: {}]   ;;  %s2040_s3 = inlined_call_operand.hbm [shape: bf16[256,512], index: 3, kind: input, shape index: {}]   ;;  %s2041_s4 = inlined_call_operand.hbm [shape: f32[1,512], index: 4, kind: input, shape index: {}]   ;;  %s2042_s5 = inlined_call_operand.vmem [shape: f32[64,512], index: 5, kind: output, shape index: {0}]   ;;  %s2043_s6 = inlined_call_operand.vmem [shape: f32[1,512], index: 6, kind: output, shape index: {1}]   ;;  %s2044_s7 = inlined_call_operand.vmem [shape: f32[1,512], index: 7, kind: output, shape index: {2}]  }
   0x1   :  { %14 = vsyncpa [#allocation5], 0  ;;  %s1722_s24 = smov 0  }
   0x2 LB: > { %s220_s27 = sshll.u32 %s2040_s3, 4  ;;  %s1731_s28 = sadd.s32 4294967295, %s1675_s24   ;;  %s1675_s24 = sphi %s1722_s24, %s20_s24   ;;  %s221_s27 = int_to_ptr.hbm [resolvable:$true] %s220_s27 }
   0x3   : > { %p1230_p0 = scmp.ge.s32.totalorder %s1675_s24, 1  ;;  %p203_p1 = scmp.lt.s32.totalorder %s1675_s24, 3 }
   0x4   : > { %p1231_p2 = scmp.ne.s32.totalorder %s1731_s28, 0  ;;  %p1584_p3 = scmp.eq.s32.totalorder %s1731_s28, 0 }
   0x5   : > { %p1737_p4 = pnand %p1230_p0, %p203_p1  ;;  %s1677_s30 = smov [#allocation2]  }
   0x6   : > { %s222_s8 = sshll.u32 %s1677_s30, 4  ;;  %s235_s11 = sshll.u32 %s2041_s4, 4  ;;  %s223_s8 = int_to_ptr.vmem [resolvable:$true] %s222_s8  ;;  %s236_s11 = int_to_ptr.hbm [resolvable:$true] %s235_s11 }
   0x7   : > { %p1577_p5 = pneg %p1737_p4  ;;  %s1678_s12 = smov [#allocation4]  }
   0x8   : > { %s237_s13 = sshll.u32 %s1678_s12, 4  ;;  %s1679_s14 = smov 256   ;;  %s238_s13 = int_to_ptr.vmem [resolvable:$true] %s237_s13 }
   0x9   : > { %p1578_p6 = pnand %p1584_p3, %p1577_p5  ;;  %s1680_s15 = smov 16  }
   0xa   : > { %260 = sbr.rel (%p1737_p4) target bundleno = 289 (0x121), region = 40 }
   0xb   : > { %1580 = dma.hbm_to_vmem [thread:$0]  (!%p1578_p6), %s221_s27, 8192, %s223_s8, [#allocation3], %s1679_s14, %s1679_s14, %s1680_s15  }
   0xc   : > { %1583 = dma.hbm_to_vmem [thread:$0]  (!%p1578_p6), %s236_s11, 64, %s238_s13, [#allocation5]  }
   0xf   : > { %1666 = dma.done.wait (%p1584_p3), [#allocation3], 8192  }
  0x10   : > { %1668 = vsyncadd (%p1584_p3), [#allocation3], 4294959104 }
  0x11   : > { %1670 = dma.done.wait (%p1584_p3), [#allocation5], 64  }
  0x12   : > { %1672 = vsyncadd (%p1584_p3), [#allocation5], 4294967232  ;;  %s1237_s16 = sshll.u32 %s1731_s28, 2  ;;  %v1357_v0 = vld [vmem:[#allocation2 + $0xe0] sm:$0xf]  ;;  %s1499_s27 = sshll.u32 %s1731_s28, 5 }
  0x13   : > { %p1761_p7 = scmp.lt.s32.totalorder %s1237_s16, 7  ;;  %v1535_v1 = vld [vmem:[#allocation2 + $0xec] sm:$0xf0]  ;;  %v1485_v2 = vld [vmem:[#allocation2 + $0x1e0] sm:$0xf] }
  0x14   : > { %v1358_v3 = vor.u32 %v1535_v1, %v1357_v0  ;;  %v1567_v4 = vld [vmem:[#allocation2 + $0x1ec] sm:$0xf0]  ;;  %v1533_v5 = vld [vmem:[#allocation2 + $0xe4] sm:$0xf]  ;;  %v1359_v6 = vld [vmem:[#allocation2 + $0xf0] sm:$0xf0] }
  0x15   : > { %v1486_v7 = vor.u32 %v1567_v4, %v1485_v2  ;;  %v1362_v8 = vor.u32 %v1533_v5, %v1359_v6  ;;  %v1565_v9 = vld [vmem:[#allocation2 + $0x1e4] sm:$0xf]  ;;  %v1487_v10 = vld [vmem:[#allocation2 + $0x1f0] sm:$0xf0]  ;;  %v1341_v11 = vld [vmem:[#allocation2 + $0xc0] sm:$0xf] }
  0x16   : > { %748 = vmatpush.bf16.msra.mxu0 %v1358_v3  ;;  %v1490_v12 = vor.u32 %v1565_v9, %v1487_v10  ;;  %v1531_v13 = vld [vmem:[#allocation2 + $0xcc] sm:$0xf0]  ;;  %v1469_v14 = vld [vmem:[#allocation2 + $0x1c0] sm:$0xf]  ;;  %v1529_v18 = vld [vmem:[#allocation2 + $0xc4] sm:$0xf] }
  0x17   : > { %v1563_v15 = vld [vmem:[#allocation2 + $0x1cc] sm:$0xf0]  ;;  %767 = vmatpush.bf16.msra.mxu1 %v1486_v7  ;;  %786 = vmatpush.bf16.msra.mxu2 %v1362_v8  ;;  %v1342_v16 = vor.u32 %v1531_v13, %v1341_v11  ;;  %v1343_v19 = vld [vmem:[#allocation2 + $0xd0] sm:$0xf0]  ;;  %v1561_v20 = vld [vmem:[#allocation2 + $0x1c4] sm:$0xf] }
  0x18   : > { %v1470_v17 = vor.u32 %v1563_v15, %v1469_v14  ;;  %805 = vmatpush.bf16.msra.mxu3 %v1490_v12  ;;  %v1346_v21 = vor.u32 %v1529_v18, %v1343_v19  ;;  %v1471_v22 = vld [vmem:[#allocation2 + $0x1d0] sm:$0xf0]  ;;  %v1325_v23 = vld [vmem:[#allocation2 + $0xa0] sm:$0xf]  ;;  %v1527_v24 = vld [vmem:[#allocation2 + $0xac] sm:$0xf0] }
  0x19   : > { %v1474_v25 = vor.u32 %v1561_v20, %v1471_v22  ;;  %v1453_v26 = vld [vmem:[#allocation2 + $0x1a0] sm:$0xf]  ;;  %v1559_v27 = vld [vmem:[#allocation2 + $0x1ac] sm:$0xf0]  ;;  %v1525_v28 = vld [vmem:[#allocation2 + $0xa4] sm:$0xf]  ;;  %v1326_v29 = vor.u32 %v1527_v24, %v1325_v23 }
  0x1a   : > { %749 = vmatpush.bf16.msra.mxu0 %v1342_v16  ;;  %v1327_v30 = vld [vmem:[#allocation2 + $0xb0] sm:$0xf0]  ;;  %v1557_v31 = vld [vmem:[#allocation2 + $0x1a4] sm:$0xf]  ;;  %v1454_v33 = vor.u32 %v1559_v27, %v1453_v26  ;;  %v1309_v35 = vld [vmem:[#allocation2 + $0x80] sm:$0xf] }
  0x1b   : > { %v1455_v32 = vld [vmem:[#allocation2 + $0x1b0] sm:$0xf0]  ;;  %768 = vmatpush.bf16.msra.mxu1 %v1470_v17  ;;  %787 = vmatpush.bf16.msra.mxu2 %v1346_v21  ;;  %v1330_v34 = vor.u32 %v1525_v28, %v1327_v30  ;;  %v1523_v36 = vld [vmem:[#allocation2 + $0x8c] sm:$0xf0]  ;;  %v1437_v37 = vld [vmem:[#allocation2 + $0x180] sm:$0xf] }
  0x1c   : > { %806 = vmatpush.bf16.msra.mxu3 %v1474_v25  ;;  %v1458_v38 = vor.u32 %v1557_v31, %v1455_v32  ;;  %v1555_v39 = vld [vmem:[#allocation2 + $0x18c] sm:$0xf0]  ;;  %v1521_v40 = vld [vmem:[#allocation2 + $0x84] sm:$0xf]  ;;  %v1311_v41 = vld [vmem:[#allocation2 + $0x90] sm:$0xf0]  ;;  %v1310_v44 = vor.u32 %v1523_v36, %v1309_v35 }
  0x1d   : > { %v1553_v42 = vld [vmem:[#allocation2 + $0x184] sm:$0xf]  ;;  %v1439_v43 = vld [vmem:[#allocation2 + $0x190] sm:$0xf0]  ;;  %s2050_s16 = smov (!%p1761_p7, %s1237_s16), 7  ;;  %v1438_v45 = vor.u32 %v1555_v39, %v1437_v37  ;;  %v1314_v46 = vor.u32 %v1521_v40, %v1311_v41 }
  0x1e   : > { %750 = vmatpush.bf16.msra.mxu0 %v1326_v29  ;;  %v1293_v47 = vld [vmem:[#allocation2 + $0x60] sm:$0xf]  ;;  %v1519_v48 = vld [vmem:[#allocation2 + $0x6c] sm:$0xf0]  ;;  %v1442_v50 = vor.u32 %v1553_v42, %v1439_v43  ;;  %v1517_v52 = vld [vmem:[#allocation2 + $0x64] sm:$0xf] }
  0x1f   : > { %769 = vmatpush.bf16.msra.mxu1 %v1454_v33  ;;  %788 = vmatpush.bf16.msra.mxu2 %v1330_v34  ;;  %v1421_v49 = vld [vmem:[#allocation2 + $0x160] sm:$0xf]  ;;  %v1551_v51 = vld [vmem:[#allocation2 + $0x16c] sm:$0xf0]  ;;  %v1295_v53 = vld [vmem:[#allocation2 + $0x70] sm:$0xf0]  ;;  %v1294_v56 = vor.u32 %v1519_v48, %v1293_v47 }
  0x20   : > { %807 = vmatpush.bf16.msra.mxu3 %v1458_v38  ;;  %v1549_v54 = vld [vmem:[#allocation2 + $0x164] sm:$0xf]  ;;  %v1423_v55 = vld [vmem:[#allocation2 + $0x170] sm:$0xf0]  ;;  %v1277_v57 = vld [vmem:[#allocation2 + $0x40] sm:$0xf]  ;;  %v1422_v58 = vor.u32 %v1551_v51, %v1421_v49  ;;  %v1298_v59 = vor.u32 %v1517_v52, %v1295_v53 }
  0x21   : > { %s1503_s18 = sshll.u32 %s2050_s16, 4  ;;  %v1515_v60 = vld [vmem:[#allocation2 + $0x4c] sm:$0xf0]  ;;  %v1405_v61 = vld [vmem:[#allocation2 + $0x140] sm:$0xf]  ;;  %v1426_v63 = vor.u32 %v1549_v54, %v1423_v55  ;;  %s1504_s29 = sshll.u32 %s2050_s16, 5 }
  0x22   : > { %751 = vmatpush.bf16.msra.mxu0 %v1310_v44  ;;  %v1547_v62 = vld [vmem:[#allocation2 + $0x14c] sm:$0xf0]  ;;  %v1513_v0 = vld [vmem:[#allocation2 + $0x44] sm:$0xf]  ;;  %v1279_v1 = vld [vmem:[#allocation2 + $0x50] sm:$0xf0]  ;;  %s1775_s21 = scalar_lea.vmem %s2037_s0, %s1503_s18  ;;  %v1278_v6 = vor.u32 %v1515_v60, %v1277_v57  ;;  %s1859_s9 = scalar_lea.vmem %s2042_s5, %s1504_s29 }
  0x23   : > { %770 = vmatpush.bf16.msra.mxu1 %v1438_v45  ;;  %789 = vmatpush.bf16.msra.mxu2 %v1314_v46  ;;  %v1545_v2 = vld [vmem:[#allocation2 + $0x144] sm:$0xf]  ;;  %v1407_v3 = vld [vmem:[#allocation2 + $0x150] sm:$0xf0]  ;;  %v1261_v4 = vld [vmem:[#allocation2 + $0x20] sm:$0xf]  ;;  %v1406_v10 = vor.u32 %v1547_v62, %v1405_v61  ;;  %v1282_v11 = vor.u32 %v1513_v0, %v1279_v1 }
  0x24   : > { %808 = vmatpush.bf16.msra.mxu3 %v1442_v50  ;;  %v1511_v5 = vld [vmem:[#allocation2 + $0x2c] sm:$0xf0]  ;;  %v1389_v7 = vld [vmem:[#allocation2 + $0x120] sm:$0xf]  ;;  %v1509_v9 = vld [vmem:[#allocation2 + $0x24] sm:$0xf]  ;;  %v1410_v15 = vor.u32 %v1545_v2, %v1407_v3 }
  0x25   : > { %v1543_v8 = vld [vmem:[#allocation2 + $0x12c] sm:$0xf0]  ;;  %v1263_v12 = vld [vmem:[#allocation2 + $0x30] sm:$0xf0]  ;;  %v1541_v13 = vld [vmem:[#allocation2 + $0x124] sm:$0xf]  ;;  %v1262_v20 = vor.u32 %v1511_v5, %v1261_v4 }
  0x26   : > { %752 = vmatpush.bf16.msra.mxu0 %v1294_v56  ;;  %v1391_v14 = vld [vmem:[#allocation2 + $0x130] sm:$0xf0]  ;;  %v1245_v16 = vld [vmem:[#allocation2] sm:$0xf]  ;;  %v1507_v17 = vld [vmem:[#allocation2 + $0xc] sm:$0xf0]  ;;  %v1390_v29 = vor.u32 %v1543_v8, %v1389_v7  ;;  %v1266_v30 = vor.u32 %v1509_v9, %v1263_v12 }
  0x27   : > { %771 = vmatpush.bf16.msra.mxu1 %v1422_v58  ;;  %790 = vmatpush.bf16.msra.mxu2 %v1298_v59  ;;  %v314_v18 = vld [vmem:[%s1775_s21] sm:$0xff]  ;;  %v316_v19 = vld [vmem:[%s1775_s21 + $0x10] sm:$0xff]  ;;  %v315_v23 = vld [vmem:[%s1775_s21 + $0x8] sm:$0xff]  ;;  %v1394_v31 = vor.u32 %v1541_v13, %v1391_v14  ;;  %v1246_v41 = vor.u32 %v1507_v17, %v1245_v16 }
  0x28   : > { %809 = vmatpush.bf16.msra.mxu3 %v1426_v63  ;;  %v322_v21 = vld [vmem:[%s2038_s1] sm:$0x3]  ;;  %v317_v26 = vld [vmem:[%s1775_s21 + $0x18] sm:$0xff]  ;;  %v1539_v33 = vld [vmem:[#allocation2 + $0x10c] sm:$0xf0] }
  0x29   : > { %v336_v22 = vld [vmem:[%s2039_s2] sm:$0x3]  ;;  %v1786_v24 = vperm.slane %v322_v21, 0  ;;  %v1791_v27 = vperm.slane %v322_v21, 1  ;;  %v1505_v34 = vld [vmem:[#allocation2 + $0x4] sm:$0xf] }
  0x2a   : > { %753 = vmatpush.bf16.msra.mxu0 %v1278_v6  ;;  %v1788_v25 = vperm.slane %v336_v22, 0  ;;  %v1793_v28 = vperm.slane %v336_v22, 1  ;;  %v1373_v32 = vld [vmem:[#allocation2 + $0x100] sm:$0xf]  ;;  %v1247_v35 = vld [vmem:[#allocation2 + $0x10] sm:$0xf0] }
  0x2b   : > { %772 = vmatpush.bf16.msra.mxu1 %v1406_v10  ;;  %791 = vmatpush.bf16.msra.mxu2 %v1282_v11  ;;  %v1537_v36 = vld [vmem:[#allocation2 + $0x104] sm:$0xf]  ;;  %v328_v37 = vmul.f32 %v1786_v24, %v314_v18  ;;  %v330_v38 = vmul.f32 %v1786_v24, %v316_v19  ;;  %v329_v39 = vmul.f32 %v1791_v27, %v315_v23  ;;  %v1375_v42 = vld [vmem:[#allocation2 + $0x110] sm:$0xf0]  ;;  %v1534_v43 = vld [vmem:[#allocation2 + $0xec] sm:$0xf] }
  0x2c   : > { %810 = vmatpush.bf16.msra.mxu3 %v1410_v15  ;;  %v331_v40 = vmul.f32 %v1791_v27, %v317_v26  ;;  %v1367_v44 = vld [vmem:[#allocation2 + $0xf8] sm:$0xf0]  ;;  %v1493_v49 = vld [vmem:[#allocation2 + $0x1e8] sm:$0xf]  ;;  %v1568_v50 = vld [vmem:[#allocation2 + $0x1f4] sm:$0xf0]  ;;  %v1374_v51 = vor.u32 %v1539_v33, %v1373_v32  ;;  %v1250_v52 = vor.u32 %v1505_v34, %v1247_v35  ;;  %v1378_v53 = vor.u32 %v1537_v36, %v1375_v42 }
  0x2d   : > { %v342_v45 = vadd.f32 %v1788_v25, %v328_v37  ;;  %v344_v46 = vadd.f32 %v1788_v25, %v330_v38  ;;  %v343_v47 = vadd.f32 %v1793_v28, %v329_v39  ;;  %v1370_v54 = vor.u32 %v1534_v43, %v1367_v44  ;;  %v1365_v55 = vld [vmem:[#allocation2 + $0xe8] sm:$0xf]  ;;  %v1536_v56 = vld [vmem:[#allocation2 + $0xf4] sm:$0xf0]  ;;  %v1566_v57 = vld [vmem:[#allocation2 + $0x1ec] sm:$0xf] }
  0x2e   : > { %754 = vmatpush.bf16.msra.mxu0 %v1262_v20  ;;  %v345_v48 = vadd.f32 %v1793_v28, %v331_v40  ;;  %v1494_v59 = vor.u32 %v1568_v50, %v1493_v49  ;;  %v1495_v60 = vld [vmem:[#allocation2 + $0x1f8] sm:$0xf0]  ;;  %v1530_v61 = vld [vmem:[#allocation2 + $0xcc] sm:$0xf]  ;;  %v1477_v0 = vld [vmem:[#allocation2 + $0x1c8] sm:$0xf]  ;;  %v1366_v2 = vor.u32 %v1536_v56, %v1365_v55 }
  0x2f   : > { %773 = vmatpush.bf16.msra.mxu1 %v1390_v29  ;;  %792 = vmatpush.bf16.msra.mxu2 %v1266_v30  ;;  %v1803_v58 = vpack.c.bf16 %v344_v46, %v342_v45  ;;  %v1351_v62 = vld [vmem:[#allocation2 + $0xd8] sm:$0xf0]  ;;  %v1564_v1 = vld [vmem:[#allocation2 + $0x1d4] sm:$0xf0]  ;;  %v1498_v3 = vor.u32 %v1566_v57, %v1495_v60  ;;  %v1349_v5 = vld [vmem:[#allocation2 + $0xc8] sm:$0xf] }
  0x30   : > { %811 = vmatpush.bf16.msra.mxu3 %v1394_v31  ;;  %v1805_v63 = vpack.c.bf16 %v345_v48, %v343_v47  ;;  %v1354_v4 = vor.u32 %v1530_v61, %v1351_v62  ;;  %v1532_v6 = vld [vmem:[#allocation2 + $0xd4] sm:$0xf0]  ;;  %v1562_v7 = vld [vmem:[#allocation2 + $0x1cc] sm:$0xf]  ;;  %v318_v8 = vld [vmem:[%s1775_s21 + $0x20] sm:$0xff]  ;;  %v1478_v9 = vor.u32 %v1564_v1, %v1477_v0 }
  0x31   : > { %v1479_v10 = vld [vmem:[#allocation2 + $0x1d8] sm:$0xf0]  ;;  %v1526_v11 = vld [vmem:[#allocation2 + $0xac] sm:$0xf]  ;;  %v1461_v13 = vld [vmem:[#allocation2 + $0x1a8] sm:$0xf]  ;;  %v1350_v16 = vor.u32 %v1532_v6, %v1349_v5  ;;  %v332_v32 = vmul.f32 %v1786_v24, %v318_v8 }
  0x32   : > { %755 = vmatpush.bf16.msra.mxu0 %v1246_v41  ;;  %v1335_v12 = vld [vmem:[#allocation2 + $0xb8] sm:$0xf0]  ;;  %v1560_v14 = vld [vmem:[#allocation2 + $0x1b4] sm:$0xf0]  ;;  %v320_v15 = vld [vmem:[%s1775_s21 + $0x30] sm:$0xff]  ;;  %v1482_v19 = vor.u32 %v1562_v7, %v1479_v10 }
  0x33   : > { %774 = vmatpush.bf16.msra.mxu1 %v1374_v51  ;;  %793 = vmatpush.bf16.msra.mxu2 %v1250_v52  ;;  %v319_v17 = vld [vmem:[%s1775_s21 + $0x28] sm:$0xff]  ;;  %v321_v18 = vld [vmem:[%s1775_s21 + $0x38] sm:$0xff]  ;;  %v1338_v20 = vor.u32 %v1526_v11, %v1335_v12  ;;  %v1462_v26 = vor.u32 %v1560_v14, %v1461_v13  ;;  %v334_v33 = vmul.f32 %v1786_v24, %v320_v15 }
  0x34   : > { %812 = vmatpush.bf16.msra.mxu3 %v1378_v53  ;;  %v1333_v21 = vld [vmem:[#allocation2 + $0xa8] sm:$0xf]  ;;  %v1528_v22 = vld [vmem:[#allocation2 + $0xb4] sm:$0xf0]  ;;  %v1558_v23 = vld [vmem:[#allocation2 + $0x1ac] sm:$0xf]  ;;  %v333_v36 = vmul.f32 %v1791_v27, %v319_v17  ;;  %v335_v37 = vmul.f32 %v1791_v27, %v321_v18  ;;  %v346_v24 = vadd.f32 %v1788_v25, %v332_v32 }
  0x35   : > { %756 = vmatmul.bf16.vlgmr.msra.gmra.mxu0 %v1803_v58  ;;  %v1463_v29 = vld [vmem:[#allocation2 + $0x1b8] sm:$0xf0]  ;;  %v1522_v30 = vld [vmem:[#allocation2 + $0x8c] sm:$0xf]  ;;  %v1445_v34 = vld [vmem:[#allocation2 + $0x188] sm:$0xf]  ;;  %v1334_v38 = vor.u32 %v1528_v22, %v1333_v21  ;;  %v348_v46 = vadd.f32 %v1788_v25, %v334_v33 }
  0x36   : > { %775 = vmatmul.bf16.vlgmr.msra.gmra.mxu1 %v1805_v63  ;;  %794 = vmatmul.bf16.vlgmr.msra.gmra.mxu2 %v1803_v58  ;;  %v1319_v31 = vld [vmem:[#allocation2 + $0x98] sm:$0xf0]  ;;  %v1556_v35 = vld [vmem:[#allocation2 + $0x194] sm:$0xf0]  ;;  %v1466_v39 = vor.u32 %v1558_v23, %v1463_v29  ;;  %v1317_v41 = vld [vmem:[#allocation2 + $0x88] sm:$0xf]  ;;  %v347_v27 = vadd.f32 %v1793_v28, %v333_v36  ;;  %v349_v49 = vadd.f32 %v1793_v28, %v335_v37 }
  0x37   : > { %862 = vmatpush.bf16.msrb.mxu2 %v1370_v54  ;;  %843 = vmatpush.bf16.msrb.mxu1 %v1494_v59  ;;  %v1322_v40 = vor.u32 %v1522_v30, %v1319_v31  ;;  %v1524_v42 = vld [vmem:[#allocation2 + $0x94] sm:$0xf0]  ;;  %v1554_v43 = vld [vmem:[#allocation2 + $0x18c] sm:$0xf]  ;;  %v1446_v44 = vor.u32 %v1556_v35, %v1445_v34  ;;  %v1447_v45 = vld [vmem:[#allocation2 + $0x198] sm:$0xf0]  ;;  %v1823_v59 = vpack.c.bf16 %v348_v46, %v346_v24 }
  0x38   : > { %813 = vmatmul.bf16.vlgmr.msra.gmra.mxu3 %v1805_v63  ;;  %824 = vmatpush.bf16.msrb.mxu0 %v1366_v2  ;;  %v1518_v47 = vld [vmem:[#allocation2 + $0x6c] sm:$0xf]  ;;  %v1303_v48 = vld [vmem:[#allocation2 + $0x78] sm:$0xf0]  ;;  %v1429_v50 = vld [vmem:[#allocation2 + $0x168] sm:$0xf]  ;;  %v1318_v52 = vor.u32 %v1524_v42, %v1317_v41  ;;  %v1450_v53 = vor.u32 %v1554_v43, %v1447_v45  ;;  %v1825_v0 = vpack.c.bf16 %v349_v49, %v347_v27  ;;  %v1846_v43 = vstv %s1499_s27 }
  0x39   : > { %881 = vmatpush.bf16.msrb.mxu3 %v1498_v3  ;;  %v1552_v51 = vld [vmem:[#allocation2 + $0x174] sm:$0xf0]  ;;  %v1306_v54 = vor.u32 %v1518_v47, %v1303_v48  ;;  %v1301_v55 = vld [vmem:[#allocation2 + $0x68] sm:$0xf]  ;;  %v1550_v57 = vld [vmem:[#allocation2 + $0x16c] sm:$0xf] }
  0x3a   : > { %v1520_v56 = vld [vmem:[#allocation2 + $0x74] sm:$0xf0]  ;;  %v1430_v25 = vor.u32 %v1552_v51, %v1429_v50  ;;  %v1431_v60 = vld [vmem:[#allocation2 + $0x178] sm:$0xf0]  ;;  %v1514_v61 = vld [vmem:[#allocation2 + $0x4c] sm:$0xf] }
  0x3b   : > { %863 = vmatpush.bf16.msrb.mxu2 %v1354_v4  ;;  %844 = vmatpush.bf16.msrb.mxu1 %v1478_v9  ;;  %v1287_v62 = vld [vmem:[#allocation2 + $0x58] sm:$0xf0]  ;;  %v1413_v28 = vld [vmem:[#allocation2 + $0x148] sm:$0xf]  ;;  %v1548_v1 = vld [vmem:[#allocation2 + $0x154] sm:$0xf0]  ;;  %v1302_v2 = vor.u32 %v1520_v56, %v1301_v55  ;;  %v1434_v3 = vor.u32 %v1550_v57, %v1431_v60 }
  0x3c   : > { %825 = vmatpush.bf16.msrb.mxu0 %v1350_v16  ;;  %v1290_v4 = vor.u32 %v1514_v61, %v1287_v62  ;;  %v1285_v5 = vld [vmem:[#allocation2 + $0x48] sm:$0xf]  ;;  %v1516_v6 = vld [vmem:[#allocation2 + $0x54] sm:$0xf0]  ;;  %v1546_v7 = vld [vmem:[#allocation2 + $0x14c] sm:$0xf]  ;;  %v1414_v8 = vor.u32 %v1548_v1, %v1413_v28 }
  0x3d   : > { %882 = vmatpush.bf16.msrb.mxu3 %v1482_v19  ;;  %v1415_v9 = vld [vmem:[#allocation2 + $0x158] sm:$0xf0]  ;;  %v1510_v10 = vld [vmem:[#allocation2 + $0x2c] sm:$0xf]  ;;  %v1397_v12 = vld [vmem:[#allocation2 + $0x128] sm:$0xf]  ;;  %v1286_v14 = vor.u32 %v1516_v6, %v1285_v5 }
  0x3e   : > { %v1271_v11 = vld [vmem:[#allocation2 + $0x38] sm:$0xf0]  ;;  %v1544_v13 = vld [vmem:[#allocation2 + $0x134] sm:$0xf0]  ;;  %v1418_v15 = vor.u32 %v1546_v7, %v1415_v9  ;;  %v1269_v17 = vld [vmem:[#allocation2 + $0x28] sm:$0xf] }
  0x3f   : > { %864 = vmatpush.bf16.msrb.mxu2 %v1338_v20  ;;  %845 = vmatpush.bf16.msrb.mxu1 %v1462_v26  ;;  %v1274_v16 = vor.u32 %v1510_v10, %v1271_v11  ;;  %v1512_v18 = vld [vmem:[#allocation2 + $0x34] sm:$0xf0]  ;;  %v1542_v19 = vld [vmem:[#allocation2 + $0x12c] sm:$0xf]  ;;  %v1398_v20 = vor.u32 %v1544_v13, %v1397_v12  ;;  %v1399_v21 = vld [vmem:[#allocation2 + $0x138] sm:$0xf0] }
  0x40   : > { %826 = vmatpush.bf16.msrb.mxu0 %v1334_v38  ;;  %v1506_v22 = vld [vmem:[#allocation2 + $0xc] sm:$0xf]  ;;  %v1255_v23 = vld [vmem:[#allocation2 + $0x18] sm:$0xf0]  ;;  %v1381_v26 = vld [vmem:[#allocation2 + $0x108] sm:$0xf]  ;;  %v1270_v30 = vor.u32 %v1512_v18, %v1269_v17  ;;  %v1402_v31 = vor.u32 %v1542_v19, %v1399_v21 }
  0x41   : > { %883 = vmatpush.bf16.msrb.mxu3 %v1466_v39  ;;  %v1540_v29 = vld [vmem:[#allocation2 + $0x114] sm:$0xf0]  ;;  %v1258_v32 = vor.u32 %v1506_v22, %v1255_v23  ;;  %v1253_v33 = vld [vmem:[#allocation2 + $0x8] sm:$0xf]  ;;  %v1538_v36 = vld [vmem:[#allocation2 + $0x10c] sm:$0xf] }
  0x42   : > { %v1508_v34 = vld [vmem:[#allocation2 + $0x14] sm:$0xf0]  ;;  %v1382_v35 = vor.u32 %v1540_v29, %v1381_v26  ;;  %v1383_v37 = vld [vmem:[#allocation2 + $0x118] sm:$0xf0]  ;;  %v1839_v41 = vld [vmem:[#allocation4] sm:$0xf] }
  0x43   : > { %865 = vmatpush.bf16.msrb.mxu2 %v1322_v40  ;;  %846 = vmatpush.bf16.msrb.mxu1 %v1446_v44  ;;  %v1254_v38 = vor.u32 %v1508_v34, %v1253_v33  ;;  %v1386_v39 = vor.u32 %v1538_v36, %v1383_v37  ;;  %v965_v40 = vlaneseq  ;;  %v1843_v42 = vperm.slane %v1839_v41, 0 }
  0x44   : > { %827 = vmatpush.bf16.msrb.mxu0 %v1318_v52  ;;  %v1854_v47 = vperm.slane %v1839_v41, 1 }
  0x45   : > { %884 = vmatpush.bf16.msrb.mxu3 %v1450_v53  ;;  %761 = vmatmul.bf16.gmra.mxu0 %v1823_v59 }
  0x46   : > { %780 = vmatmul.bf16.gmra.mxu1 %v1825_v0  ;;  %799 = vmatmul.bf16.gmra.mxu2 %v1823_v59 }
  0x47   : > { %866 = vmatpush.bf16.msrb.mxu2 %v1306_v54  ;;  %847 = vmatpush.bf16.msrb.mxu1 %v1430_v25 }
  0x48   : > { %818 = vmatmul.bf16.gmra.mxu3 %v1825_v0  ;;  %828 = vmatpush.bf16.msrb.mxu0 %v1302_v2 }
  0x49   : > { %885 = vmatpush.bf16.msrb.mxu3 %v1434_v3 }
  0x4b   : > { %867 = vmatpush.bf16.msrb.mxu2 %v1290_v4  ;;  %848 = vmatpush.bf16.msrb.mxu1 %v1414_v8 }
  0x4c   : > { %829 = vmatpush.bf16.msrb.mxu0 %v1286_v14 }
  0x4d   : > { %886 = vmatpush.bf16.msrb.mxu3 %v1418_v15 }
  0x4f   : > { %868 = vmatpush.bf16.msrb.mxu2 %v1274_v16  ;;  %849 = vmatpush.bf16.msrb.mxu1 %v1398_v20 }
  0x50   : > { %830 = vmatpush.bf16.msrb.mxu0 %v1270_v30 }
  0x51   : > { %887 = vmatpush.bf16.msrb.mxu3 %v1402_v31 }
  0x53   : > { %869 = vmatpush.bf16.msrb.mxu2 %v1258_v32  ;;  %850 = vmatpush.bf16.msrb.mxu1 %v1382_v35  ;;  %v1906_v35 = vperm.slane %v1839_v41, 2 }
  0x54   : > { %831 = vmatpush.bf16.msrb.mxu0 %v1254_v38 }
  0x55   : > { %888 = vmatpush.bf16.msrb.mxu3 %v1386_v39 }
  0x56   : > { %851 = vmatmul.bf16.vlgmr.msrb.gmra.mxu1 %v1805_v63  ;;  %870 = vmatmul.bf16.vlgmr.msrb.gmra.mxu2 %v1803_v58 }
  0x57   : > { %832 = vmatmul.bf16.vlgmr.msrb.gmra.mxu0 %v1803_v58  ;;  %v966_v58 = vshrl.u32 %v965_v40, 7 }
  0x58   : > { %889 = vmatmul.bf16.vlgmr.msrb.gmra.mxu3 %v1805_v63 }
  0x59   : > { %v1850_v24 = vadd.s32 %v1846_v43, %v966_v58  ;;  %v967_v27 = vadd.s32 8, %v966_v58  ;;  %v968_v62 = vadd.s32 16, %v966_v58  ;;  %v969_v14 = vadd.s32 24, %v966_v58 }
  0x5b   : > { %vm975_vm1 = vcmp.lt.s32.totalorder %v1850_v24, 48  ;;  %v1870_v57 = vadd.s32 %v1846_v43, %v967_v27  ;;  %v1886_v9 = vadd.s32 %v1846_v43, %v968_v62  ;;  %v1902_v29 = vadd.s32 %v1846_v43, %v969_v14 }
  0x5c   : > { %v1921_v27 = vperm.slane %v1839_v41, 3 }
  0x5d   : > { %vm976_vm4 = vcmp.lt.s32.totalorder %v1870_v57, 48  ;;  %vm977_vm7 = vcmp.lt.s32.totalorder %v1886_v9, 48  ;;  %vm978_vm10 = vcmp.lt.s32.totalorder %v1902_v29, 48 }
  0x66   : > { %856 = vmatmul.bf16.gmra.mxu1 %v1825_v0  ;;  %875 = vmatmul.bf16.gmra.mxu2 %v1823_v59 }
  0x67   : > { %837 = vmatmul.bf16.gmra.mxu0 %v1823_v59 }
  0x68   : > { %894 = vmatmul.bf16.gmra.mxu3 %v1825_v0 }
  0xb2   : > { %v757_v63 = vpop.f32.mrf.mxu0 }
  0xb3   : > { %v758_v44 = vadd.f32 %v757_v63, %v1843_v42  ;;  %v776_v45 = vpop.f32.mrf.mxu1 }
  0xb5   : > { %v777_v46 = vadd.f32 %v776_v45, %v758_v44 }
  0xb7   : > { %vm900_vm0 = vcmp.gt.f32.partialorder %v777_v46, 0.0  ;;  %v916_v48 = vmul.f32 0.2, %v777_v46 }
  0xb9   : > { %v932_v49 = vsel %vm900_vm0, %v777_v46, %v916_v48  ;;  %v795_v50 = vpop.f32.mrf.mxu2 }
  0xba   : > { %948 = vst [vmem:[%s1859_s9] sm:$0xff] %v932_v49  ;;  %v1865_v51 = vsel %vm975_vm1, %v932_v49, 0.0  ;;  %v796_v52 = vadd.f32 %v795_v50, %v1854_v47  ;;  %v759_v54 = vpop.f32.mrf.mxu0 }
  0xbb   : > { %v814_v53 = vpop.f32.mrf.mxu3  ;;  %v760_v55 = vadd.f32 %v759_v54, %v1843_v42  ;;  %v778_v56 = vpop.f32.mrf.mxu1 }
  0xbc   : > { %v815_v59 = vadd.f32 %v814_v53, %v796_v52 }
  0xbd   : > { %v779_v25 = vadd.f32 %v778_v56, %v760_v55 }
  0xbe   : > { %vm901_vm2 = vcmp.gt.f32.partialorder %v815_v59, 0.0  ;;  %v917_v60 = vmul.f32 0.2, %v815_v59 }
  0xbf   : > { %vm904_vm3 = vcmp.gt.f32.partialorder %v779_v25, 0.0  ;;  %v920_v61 = vmul.f32 0.2, %v779_v25 }
  0xc0   : > { %v933_v0 = vsel %vm901_vm2, %v815_v59, %v917_v60 }
  0xc1   : > { %949 = vst [vmem:[%s1859_s9 + $0x8] sm:$0xff] %v933_v0  ;;  %v1876_v28 = vsel %vm975_vm1, %v933_v0, 0.0  ;;  %v936_v1 = vsel %vm904_vm3, %v779_v25, %v920_v61  ;;  %v797_v2 = vpop.f32.mrf.mxu2 }
  0xc2   : > { %952 = vst [vmem:[%s1859_s9 + $0x20] sm:$0xff] %v936_v1  ;;  %v1881_v3 = vsel %vm976_vm4, %v936_v1, 0.0  ;;  %v798_v4 = vadd.f32 %v797_v2, %v1854_v47  ;;  %v762_v6 = vpop.f32.mrf.mxu0 }
  0xc3   : > { %v816_v5 = vpop.f32.mrf.mxu3  ;;  %v763_v7 = vadd.f32 %v762_v6, %v1843_v42  ;;  %v781_v8 = vpop.f32.mrf.mxu1 }
  0xc4   : > { %v817_v10 = vadd.f32 %v816_v5, %v798_v4 }
  0xc5   : > { %v782_v11 = vadd.f32 %v781_v8, %v763_v7 }
  0xc6   : > { %vm905_vm5 = vcmp.gt.f32.partialorder %v817_v10, 0.0  ;;  %v921_v12 = vmul.f32 0.2, %v817_v10 }
  0xc7   : > { %vm908_vm6 = vcmp.gt.f32.partialorder %v782_v11, 0.0  ;;  %v924_v13 = vmul.f32 0.2, %v782_v11 }
  0xc8   : > { %v937_v15 = vsel %vm905_vm5, %v817_v10, %v921_v12 }
  0xc9   : > { %953 = vst [vmem:[%s1859_s9 + $0x28] sm:$0xff] %v937_v15  ;;  %v1892_v16 = vsel %vm976_vm4, %v937_v15, 0.0  ;;  %v940_v17 = vsel %vm908_vm6, %v782_v11, %v924_v13  ;;  %v800_v18 = vpop.f32.mrf.mxu2 }
  0xca   : > { %956 = vst [vmem:[%s1859_s9 + $0x40] sm:$0xff] %v940_v17  ;;  %v1897_v19 = vsel %vm977_vm7, %v940_v17, 0.0  ;;  %v801_v20 = vadd.f32 %v800_v18, %v1854_v47  ;;  %v764_v22 = vpop.f32.mrf.mxu0 }
  0xcb   : > { %v819_v21 = vpop.f32.mrf.mxu3  ;;  %v765_v23 = vadd.f32 %v764_v22, %v1843_v42  ;;  %v783_v26 = vpop.f32.mrf.mxu1 }
  0xcc   : > { %v820_v30 = vadd.f32 %v819_v21, %v801_v20 }
  0xcd   : > { %v784_v31 = vadd.f32 %v783_v26, %v765_v23 }
  0xce   : > { %vm909_vm8 = vcmp.gt.f32.partialorder %v820_v30, 0.0  ;;  %v925_v32 = vmul.f32 0.2, %v820_v30 }
  0xcf   : > { %vm912_vm9 = vcmp.gt.f32.partialorder %v784_v31, 0.0  ;;  %v928_v33 = vmul.f32 0.2, %v784_v31 }
  0xd0   : > { %v941_v34 = vsel %vm909_vm8, %v820_v30, %v925_v32 }
  0xd1   : > { %957 = vst [vmem:[%s1859_s9 + $0x48] sm:$0xff] %v941_v34  ;;  %v1911_v36 = vsel %vm977_vm7, %v941_v34, 0.0  ;;  %v944_v37 = vsel %vm912_vm9, %v784_v31, %v928_v33  ;;  %v802_v38 = vpop.f32.mrf.mxu2 }
  0xd2   : > { %960 = vst [vmem:[%s1859_s9 + $0x60] sm:$0xff] %v944_v37  ;;  %v1916_v39 = vsel %vm978_vm10, %v944_v37, 0.0  ;;  %v803_v42 = vadd.f32 %v802_v38, %v1854_v47 }
  0xd3   : > { %v821_v58 = vpop.f32.mrf.mxu3  ;;  %v852_v63 = vpop.f32.mrf.mxu1 }
  0xd4   : > { %v833_v43 = vpop.f32.mrf.mxu0  ;;  %v822_v44 = vadd.f32 %v821_v58, %v803_v42 }
  0xd5   : > { %v834_v45 = vadd.f32 %v833_v43, %v1906_v35 }
  0xd6   : > { %vm913_vm11 = vcmp.gt.f32.partialorder %v822_v44, 0.0  ;;  %v929_v46 = vmul.f32 0.2, %v822_v44 }
  0xd7   : > { %v853_v48 = vadd.f32 %v852_v63, %v834_v45 }
  0xd8   : > { %v945_v49 = vsel %vm913_vm11, %v822_v44, %v929_v46 }
  0xd9   : > { %vm902_vm12 = vcmp.gt.f32.partialorder %v853_v48, 0.0  ;;  %v918_v50 = vmul.f32 0.2, %v853_v48  ;;  %961 = vst [vmem:[%s1859_s9 + $0x68] sm:$0xff] %v945_v49  ;;  %v1926_v47 = vsel %vm978_vm10, %v945_v49, 0.0  ;;  %v871_v53 = vpop.f32.mrf.mxu2 }
  0xda   : > { %v872_v41 = vadd.f32 %v871_v53, %v1921_v27 }
  0xdb   : > { %v934_v52 = vsel %vm902_vm12, %v853_v48, %v918_v50  ;;  %v890_v54 = vpop.f32.mrf.mxu3  ;;  %v854_v59 = vpop.f32.mrf.mxu1 }
  0xdc   : > { %950 = vst [vmem:[%s1859_s9 + $0x10] sm:$0xff] %v934_v52  ;;  %v1931_v55 = vsel %vm975_vm1, %v934_v52, 0.0  ;;  %v835_v56 = vpop.f32.mrf.mxu0  ;;  %v891_v60 = vadd.f32 %v890_v54, %v872_v41 }
  0xdd   : > { %v836_v25 = vadd.f32 %v835_v56, %v1906_v35 }
  0xde   : > { %vm903_vm13 = vcmp.gt.f32.partialorder %v891_v60, 0.0  ;;  %v919_v62 = vmul.f32 0.2, %v891_v60 }
  0xdf   : > { %v855_v61 = vadd.f32 %v854_v59, %v836_v25 }
  0xe0   : > { %v935_v1 = vsel %vm903_vm13, %v891_v60, %v919_v62 }
  0xe1   : > { %vm906_vm14 = vcmp.gt.f32.partialorder %v855_v61, 0.0  ;;  %v922_v0 = vmul.f32 0.2, %v855_v61  ;;  %951 = vst [vmem:[%s1859_s9 + $0x18] sm:$0xff] %v935_v1  ;;  %v1938_v2 = vsel %vm975_vm1, %v935_v1, 0.0  ;;  %v873_v5 = vpop.f32.mrf.mxu2 }
  0xe2   : > { %v874_v8 = vadd.f32 %v873_v5, %v1921_v27 }
  0xe3   : > { %v938_v4 = vsel %vm906_vm14, %v855_v61, %v922_v0  ;;  %v892_v6 = vpop.f32.mrf.mxu3  ;;  %v857_v11 = vpop.f32.mrf.mxu1 }
  0xe4   : > { %954 = vst [vmem:[%s1859_s9 + $0x30] sm:$0xff] %v938_v4  ;;  %v1943_v7 = vsel %vm976_vm4, %v938_v4, 0.0  ;;  %v838_v10 = vpop.f32.mrf.mxu0  ;;  %v893_v13 = vadd.f32 %v892_v6, %v874_v8 }
  0xe5   : > { %v839_v12 = vadd.f32 %v838_v10, %v1906_v35 }
  0xe6   : > { %vm907_vm15 = vcmp.gt.f32.partialorder %v893_v13, 0.0  ;;  %v923_v14 = vmul.f32 0.2, %v893_v13 }
  0xe7   : > { %v858_v24 = vadd.f32 %v857_v11, %v839_v12 }
  0xe8   : > { %v939_v17 = vsel %vm907_vm15, %v893_v13, %v923_v14 }
  0xe9   : > { %vm910_vm0 = vcmp.gt.f32.partialorder %v858_v24, 0.0  ;;  %v926_v15 = vmul.f32 0.2, %v858_v24  ;;  %955 = vst [vmem:[%s1859_s9 + $0x38] sm:$0xff] %v939_v17  ;;  %v994_v18 = vsel %vm976_vm4, %v939_v17, 0.0  ;;  %v876_v21 = vpop.f32.mrf.mxu2 }
  0xea   : > { %v877_v26 = vadd.f32 %v876_v21, %v1921_v27 }
  0xeb   : > { %v942_v20 = vsel %vm910_vm0, %v858_v24, %v926_v15  ;;  %v895_v22 = vpop.f32.mrf.mxu3  ;;  %v859_v33 = vpop.f32.mrf.mxu1 }
  0xec   : > { %958 = vst [vmem:[%s1859_s9 + $0x50] sm:$0xff] %v942_v20  ;;  %v997_v23 = vsel %vm977_vm7, %v942_v20, 0.0  ;;  %v840_v30 = vpop.f32.mrf.mxu0  ;;  %v896_v32 = vadd.f32 %v895_v22, %v877_v26 }
  0xed   : > { %v841_v31 = vadd.f32 %v840_v30, %v1906_v35 }
  0xee   : > { %vm911_vm1 = vcmp.gt.f32.partialorder %v896_v32, 0.0  ;;  %v927_v57 = vmul.f32 0.2, %v896_v32 }
  0xef   : > { %v860_v34 = vadd.f32 %v859_v33, %v841_v31 }
  0xf0   : > { %v943_v38 = vsel %vm911_vm1, %v896_v32, %v927_v57 }
  0xf1   : > { %vm914_vm2 = vcmp.gt.f32.partialorder %v860_v34, 0.0  ;;  %v930_v37 = vmul.f32 0.2, %v860_v34  ;;  %959 = vst [vmem:[%s1859_s9 + $0x58] sm:$0xff] %v943_v38  ;;  %v998_v42 = vsel %vm977_vm7, %v943_v38, 0.0  ;;  %v878_v43 = vpop.f32.mrf.mxu2 }
  0xf2   : > { %v879_v35 = vadd.f32 %v878_v43, %v1921_v27 }
  0xf3   : > { %v946_v58 = vsel %vm914_vm2, %v860_v34, %v930_v37  ;;  %v897_v44 = vpop.f32.mrf.mxu3 }
  0xf4   : > { %962 = vst [vmem:[%s1859_s9 + $0x70] sm:$0xff] %v946_v58  ;;  %v1001_v63 = vsel %vm978_vm10, %v946_v58, 0.0  ;;  %v898_v45 = vadd.f32 %v897_v44, %v879_v35 }
  0xf5   : > { %1006 = sbr.rel (%p1231_p2) target bundleno = 253 (0xfd), region = 52 }
  0xf6   : > { %vm915_vm3 = vcmp.gt.f32.partialorder %v898_v45, 0.0  ;;  %v931_v46 = vmul.f32 0.2, %v898_v45 }
  0xf8   : > { %v947_v48 = vsel %vm915_vm3, %v898_v45, %v931_v46 }
  0xf9   : > { %963 = vst [vmem:[%s1859_s9 + $0x78] sm:$0xff] %v947_v48  ;;  %v1002_v49 = vsel %vm978_vm10, %v947_v48, 0.0 }
  0xfa   : > { %vm1009_vm4 = vcmp.lt.s32.totalorder %v965_v40, 512  ;;  %v1681_v9 = vmov 0.0  }
  0xfb   : > { %1011 = vst.msk [vmem:[%s2043_s6] sm:$0xf] %vm1009_vm4, %v1681_v9 }
  0xfc   : > { %1012 = vst.msk [vmem:[%s2044_s7] sm:$0xf] %vm1009_vm4, %v1681_v9 }
  0xfd PF: > { %v1014_v27 = vadd.f32 %v1881_v3, %v1865_v51  ;;  %v1023_v29 = vadd.f32 %v1892_v16, %v1876_v28  ;;  %v1032_v50 = vadd.f32 %v1943_v7, %v1931_v55  ;;  %v1041_v52 = vadd.f32 %v994_v18, %v1938_v2 }
  0xfe   : > { %v1071_v59 = vmul.f32 %v1865_v51, %v1865_v51  ;;  %v1072_v25 = vmul.f32 %v1876_v28, %v1876_v28  ;;  %v1073_v60 = vmul.f32 %v1931_v55, %v1931_v55  ;;  %v1074_v61 = vmul.f32 %v1938_v2, %v1938_v2 }
  0xff   : > { %v1015_v53 = vadd.f32 %v1014_v27, %v1897_v19  ;;  %v1024_v54 = vadd.f32 %v1023_v29, %v1911_v36  ;;  %v1033_v41 = vadd.f32 %v1032_v50, %v997_v23  ;;  %v1042_v56 = vadd.f32 %v1041_v52, %v998_v42 }
 0x100   : > { %v1075_v5 = vmul.f32 %v1881_v3, %v1881_v3  ;;  %v1076_v51 = vmul.f32 %v1892_v16, %v1892_v16  ;;  %v1077_v28 = vmul.f32 %v1943_v7, %v1943_v7  ;;  %v1078_v6 = vmul.f32 %v994_v18, %v994_v18 }
 0x101   : > { %v1016_v62 = vadd.f32 %v1015_v53, %v1916_v39  ;;  %v1025_v0 = vadd.f32 %v1024_v54, %v1926_v47  ;;  %v1034_v1 = vadd.f32 %v1033_v41, %v1001_v63  ;;  %v1043_v4 = vadd.f32 %v1042_v56, %v1002_v49 }
 0x102   : > { %v1079_v11 = vmul.f32 %v1897_v19, %v1897_v19  ;;  %v1080_v12 = vmul.f32 %v1911_v36, %v1911_v36  ;;  %v1081_v13 = vmul.f32 %v997_v23, %v997_v23  ;;  %v1082_v24 = vmul.f32 %v998_v42, %v998_v42 }
 0x103   : > { %v1017_v55 = vrot.slane %v1016_v62, 4  ;;  %v1026_v8 = vrot.slane %v1025_v0, 4  ;;  %v1035_v10 = vrot.slane %v1034_v1, 4  ;;  %v1044_v2 = vrot.slane %v1043_v4, 4 }
 0x104   : > { %vm1057_vm5 = vcmask 1040384   ;;  %vm1059_vm6 = vcmask 1042434   ;;  %v1083_v7 = vmul.f32 %v1916_v39, %v1916_v39  ;;  %v1084_v17 = vmul.f32 %v1926_v47, %v1926_v47 }
 0x105   : > { %v1018_v3 = vadd.f32 %v1017_v55, %v1016_v62  ;;  %v1027_v14 = vadd.f32 %v1026_v8, %v1025_v0  ;;  %v1036_v15 = vadd.f32 %v1035_v10, %v1034_v1  ;;  %v1045_v16 = vadd.f32 %v1044_v2, %v1043_v4 }
 0x106   : > { %v1085_v18 = vmul.f32 %v1001_v63, %v1001_v63  ;;  %v1086_v20 = vmul.f32 %v1002_v49, %v1002_v49  ;;  %v1087_v23 = vadd.f32 %v1075_v5, %v1071_v59  ;;  %v1096_v26 = vadd.f32 %v1076_v51, %v1072_v25  ;;  %v1013_v59 = vld [vmem:[%s2043_s6] sm:$0xf] }
 0x107   : > { %v1019_v19 = vrot.slane %v1018_v3, 2  ;;  %v1028_v21 = vrot.slane %v1027_v14, 2  ;;  %v1037_v22 = vrot.slane %v1036_v15, 2  ;;  %v1046_v36 = vrot.slane %v1045_v16, 2 }
 0x108   : > { %v1105_v30 = vadd.f32 %v1077_v28, %v1073_v60  ;;  %v1114_v31 = vadd.f32 %v1078_v6, %v1074_v61  ;;  %v1088_v37 = vadd.f32 %v1087_v23, %v1079_v11  ;;  %v1097_v38 = vadd.f32 %v1096_v26, %v1080_v12 }
 0x109   : > { %v1020_v32 = vadd.f32 %v1019_v19, %v1018_v3  ;;  %v1029_v33 = vadd.f32 %v1028_v21, %v1027_v14  ;;  %v1038_v34 = vadd.f32 %v1037_v22, %v1036_v15  ;;  %v1047_v57 = vadd.f32 %v1046_v36, %v1045_v16  ;;  %v1070_v19 = vld [vmem:[%s2044_s7] sm:$0xf] }
 0x10a   : > { %v1106_v39 = vadd.f32 %v1105_v30, %v1081_v13  ;;  %v1115_v42 = vadd.f32 %v1114_v31, %v1082_v24  ;;  %v1089_v35 = vadd.f32 %v1088_v37, %v1083_v7  ;;  %v1098_v44 = vadd.f32 %v1097_v38, %v1084_v17 }
 0x10b   : > { %v1021_v58 = vrot.slane %v1020_v32, 1  ;;  %v1030_v47 = vrot.slane %v1029_v33, 1  ;;  %v1039_v43 = vrot.slane %v1038_v34, 1  ;;  %v1048_v63 = vrot.slane %v1047_v57, 1 }
 0x10c   : > { %v1107_v45 = vadd.f32 %v1106_v39, %v1085_v18  ;;  %v1116_v46 = vadd.f32 %v1115_v42, %v1086_v20  ;;  %v1090_v29 = vrot.slane %v1089_v35, 4  ;;  %v1099_v50 = vrot.slane %v1098_v44, 4 }
 0x10d   : > { %v1022_v48 = vadd.f32 %v1021_v58, %v1020_v32  ;;  %v1031_v49 = vadd.f32 %v1030_v47, %v1029_v33  ;;  %v1040_v9 = vadd.f32 %v1039_v43, %v1038_v34  ;;  %v1049_v27 = vadd.f32 %v1048_v63, %v1047_v57 }
 0x10e   : > { %v1108_v52 = vrot.slane %v1107_v45, 4  ;;  %v1117_v53 = vrot.slane %v1116_v46, 4  ;;  %vm1061_vm7 = vcmask 1041408   ;;  %v1091_v25 = vadd.f32 %v1090_v29, %v1089_v35 }
 0x10f   : > { %v1054_v54 = vrot.slane %v1031_v49, 7  ;;  %v1055_v41 = vrot.slane %v1040_v9, 6  ;;  %v1056_v56 = vrot.slane %v1049_v27, 5  ;;  %v1100_v60 = vadd.f32 %v1099_v50, %v1098_v44 }
 0x110   : > { %v1109_v61 = vadd.f32 %v1108_v52, %v1107_v45  ;;  %v1118_v62 = vadd.f32 %v1117_v53, %v1116_v46  ;;  %vm2013_vm8 = vcmp.lt.s32.totalorder %v965_v40, 512  ;;  %v1092_v51 = vrot.slane %v1091_v25, 2 }
 0x111   : > { %v1058_v0 = vsel %vm1057_vm5, %v1022_v48, %v1054_v54  ;;  %v1060_v1 = vsel %vm1059_vm6, %v1055_v41, %v1056_v56  ;;  %v1101_v28 = vrot.slane %v1100_v60, 2 }
 0x112   : > { %v1062_v5 = vsel %vm1061_vm7, %v1058_v0, %v1060_v1  ;;  %v1110_v6 = vrot.slane %v1109_v61, 2  ;;  %v1119_v8 = vrot.slane %v1118_v62, 2  ;;  %v1093_v10 = vadd.f32 %v1092_v51, %v1091_v25 }
 0x113   : > { %v1064_v55 = vadd.f32 %v1062_v5, %v1013_v59  ;;  %v1102_v2 = vadd.f32 %v1101_v28, %v1100_v60 }
 0x114   : > { %v1111_v11 = vadd.f32 %v1110_v6, %v1109_v61  ;;  %v1120_v40 = vadd.f32 %v1119_v8, %v1118_v62  ;;  %v1094_v12 = vrot.slane %v1093_v10, 1 }
 0x115   : > { %1069 = vst.msk [vmem:[%s2043_s6] sm:$0xf] %vm2013_vm8, %v1064_v55  ;;  %v1103_v13 = vrot.slane %v1102_v2, 1 }
 0x116   : > { %v1112_v24 = vrot.slane %v1111_v11, 1  ;;  %v1121_v3 = vrot.slane %v1120_v40, 1  ;;  %v1095_v14 = vadd.f32 %v1094_v12, %v1093_v10 }
 0x117   : > { %v1104_v15 = vadd.f32 %v1103_v13, %v1102_v2 }
 0x118   : > { %v1113_v16 = vadd.f32 %v1112_v24, %v1111_v11  ;;  %v1122_v7 = vadd.f32 %v1121_v3, %v1120_v40 }
 0x119   : > { %v1127_v17 = vrot.slane %v1104_v15, 7 }
 0x11a   : > { %v1128_v18 = vrot.slane %v1113_v16, 6  ;;  %v1129_v20 = vrot.slane %v1122_v7, 5 }
 0x11b   : > { %v1130_v21 = vsel %vm1057_vm5, %v1095_v14, %v1127_v17 }
 0x11c   : > { %v1131_v22 = vsel %vm1059_vm6, %v1128_v18, %v1129_v20 }
 0x11d   : > { %v1132_v36 = vsel %vm1061_vm7, %v1130_v21, %v1131_v22 }
 0x11e   : > { %v1134_v23 = vadd.f32 %v1132_v36, %v1070_v19 }
 0x120   : > { %1135 = vst.msk [vmem:[%s2044_s7] sm:$0xf] %vm2013_vm8, %v1134_v23 }
 0x121 PF: > { %s20_s24 = sadd.s32 1, %s1675_s24  }
 0x122   : > { %p17_p8 = scmp.ge.s32.totalorder %s20_s24, 4  }
 0x124   :  { %19 = sbr.rel (!%p17_p8) target bundleno = 2 (0x2), region = 99 }
 0x129   :  { %1172 = vsyncpa [#allocation3], 1 }
 0x12a   :  { %1174 = vsyncpa [#allocation3 + $0x1], 1 }
 0x12b   :  { %1175 = vsyncpa [#allocation5], 1 }

// kernel: generator_forward.5
= control target key start
LH: loop header
LB: loop body
LE: loop exit
PB: predicated region body
PF: predicated region fallthrough
CT: control target
= control target key end

     0   :  { %13 = vsyncpa [#allocation3], 0  ;;  %s1918_s0 = inlined_call_operand.vmem [shape: f32[64,512], index: 0, kind: input, shape index: {}]   ;;  %s1919_s1 = inlined_call_operand.vmem [shape: f32[1,512], index: 1, kind: input, shape index: {}]   ;;  %s1920_s2 = inlined_call_operand.vmem [shape: f32[1,512], index: 2, kind: input, shape index: {}]   ;;  %s1921_s3 = inlined_call_operand.hbm [shape: bf16[512,256], index: 3, kind: input, shape index: {}]   ;;  %s1922_s4 = inlined_call_operand.hbm [shape: f32[1,256], index: 4, kind: input, shape index: {}]   ;;  %s1923_s5 = inlined_call_operand.vmem [shape: f32[64,256], index: 5, kind: output, shape index: {0}]   ;;  %s1924_s6 = inlined_call_operand.vmem [shape: f32[1,256], index: 6, kind: output, shape index: {1}]   ;;  %s1925_s7 = inlined_call_operand.vmem [shape: f32[1,256], index: 7, kind: output, shape index: {2}]  }
   0x1   :  { %14 = vsyncpa [#allocation5], 0  ;;  %s1656_s24 = smov 0  }
   0x2 LB: > { %s220_s27 = sshll.u32 %s1921_s3, 4  ;;  %s1665_s28 = sadd.s32 4294967295, %s1609_s24   ;;  %s1609_s24 = sphi %s1656_s24, %s20_s24   ;;  %s221_s27 = int_to_ptr.hbm [resolvable:$true] %s220_s27 }
   0x3   : > { %p1164_p0 = scmp.ge.s32.totalorder %s1609_s24, 1  ;;  %p203_p1 = scmp.lt.s32.totalorder %s1609_s24, 3 }
   0x4   : > { %p1165_p2 = scmp.ne.s32.totalorder %s1665_s28, 0  ;;  %p1518_p3 = scmp.eq.s32.totalorder %s1665_s28, 0 }
   0x5   : > { %p1671_p4 = pnand %p1164_p0, %p203_p1  ;;  %s1611_s30 = smov [#allocation2]  }
   0x6   : > { %s222_s8 = sshll.u32 %s1611_s30, 4  ;;  %s235_s11 = sshll.u32 %s1922_s4, 4  ;;  %s223_s8 = int_to_ptr.vmem [resolvable:$true] %s222_s8  ;;  %s236_s11 = int_to_ptr.hbm [resolvable:$true] %s235_s11 }
   0x7   : > { %p1511_p5 = pneg %p1671_p4  ;;  %s1612_s12 = smov [#allocation4]  }
   0x8   : > { %s237_s13 = sshll.u32 %s1612_s12, 4  ;;  %s1613_s14 = smov 128   ;;  %s238_s13 = int_to_ptr.vmem [resolvable:$true] %s237_s13 }
   0x9   : > { %p1512_p6 = pnand %p1518_p3, %p1511_p5  ;;  %s1614_s15 = smov 8  }
   0xa   : > { %260 = sbr.rel (%p1671_p4) target bundleno = 281 (0x119), region = 40 }
   0xb   : > { %1514 = dma.hbm_to_vmem [thread:$0]  (!%p1512_p6), %s221_s27, 8192, %s223_s8, [#allocation3], %s1613_s14, %s1613_s14, %s1614_s15  }
   0xc   : > { %1517 = dma.hbm_to_vmem [thread:$0]  (!%p1512_p6), %s236_s11, 32, %s238_s13, [#allocation5]  }
   0xf   : > { %1600 = dma.done.wait (%p1518_p3), [#allocation3], 8192  }
  0x10   : > { %1602 = vsyncadd (%p1518_p3), [#allocation3], 4294959104 }
  0x11   : > { %1604 = dma.done.wait (%p1518_p3), [#allocation5], 32  }
  0x12   : > { %1606 = vsyncadd (%p1518_p3), [#allocation5], 4294967264  ;;  %s1171_s16 = sshll.u32 %s1665_s28, 2  ;;  %v1235_v0 = vld [vmem:[#allocation2 + $0x70] sm:$0xf]  ;;  %s1433_s26 = sshll.u32 %s1665_s28, 5 }
  0x13   : > { %p301_p7 = scmp.lt.s32.totalorder %s1171_s16, 7  ;;  %v1454_v1 = vld [vmem:[#allocation2 + $0x74] sm:$0xf0]  ;;  %v1299_v2 = vld [vmem:[#allocation2 + $0xf0] sm:$0xf] }
  0x14   : > { %v1236_v3 = vor.u32 %v1454_v1, %v1235_v0  ;;  %v1470_v4 = vld [vmem:[#allocation2 + $0xf4] sm:$0xf0]  ;;  %v1363_v5 = vld [vmem:[#allocation2 + $0x170] sm:$0xf]  ;;  %v1227_v11 = vld [vmem:[#allocation2 + $0x60] sm:$0xf] }
  0x15   : > { %s1928_s16 = smov (!%p301_p7, %s1171_s16), 7  ;;  %v1486_v6 = vld [vmem:[#allocation2 + $0x174] sm:$0xf0]  ;;  %v1300_v7 = vor.u32 %v1470_v4, %v1299_v2  ;;  %v1427_v9 = vld [vmem:[#allocation2 + $0x1f0] sm:$0xf] }
  0x16   : > { %v1364_v8 = vor.u32 %v1486_v6, %v1363_v5  ;;  %v1502_v10 = vld [vmem:[#allocation2 + $0x1f4] sm:$0xf0]  ;;  %780 = vmatpush.bf16.msra.mxu0 %v1236_v3  ;;  %v1452_v13 = vld [vmem:[#allocation2 + $0x64] sm:$0xf0]  ;;  %v1291_v14 = vld [vmem:[#allocation2 + $0xe0] sm:$0xf] }
  0x17   : > { %v1428_v12 = vor.u32 %v1502_v10, %v1427_v9  ;;  %v1468_v15 = vld [vmem:[#allocation2 + $0xe4] sm:$0xf0]  ;;  %799 = vmatpush.bf16.msra.mxu1 %v1300_v7  ;;  %v1228_v16 = vor.u32 %v1452_v13, %v1227_v11  ;;  %v1355_v18 = vld [vmem:[#allocation2 + $0x160] sm:$0xf]  ;;  %v1219_v23 = vld [vmem:[#allocation2 + $0x50] sm:$0xf] }
  0x18   : > { %818 = vmatpush.bf16.msra.mxu2 %v1364_v8  ;;  %v1292_v17 = vor.u32 %v1468_v15, %v1291_v14  ;;  %v1484_v19 = vld [vmem:[#allocation2 + $0x164] sm:$0xf0]  ;;  %v1419_v20 = vld [vmem:[#allocation2 + $0x1e0] sm:$0xf]  ;;  %v1450_v24 = vld [vmem:[#allocation2 + $0x54] sm:$0xf0] }
  0x19   : > { %837 = vmatpush.bf16.msra.mxu3 %v1428_v12  ;;  %v1356_v21 = vor.u32 %v1484_v19, %v1355_v18  ;;  %v1500_v22 = vld [vmem:[#allocation2 + $0x1e4] sm:$0xf0]  ;;  %v1283_v26 = vld [vmem:[#allocation2 + $0xd0] sm:$0xf]  ;;  %v1466_v27 = vld [vmem:[#allocation2 + $0xd4] sm:$0xf0]  ;;  %v1220_v29 = vor.u32 %v1450_v24, %v1219_v23 }
  0x1a   : > { %v1420_v25 = vor.u32 %v1500_v22, %v1419_v20  ;;  %v1347_v28 = vld [vmem:[#allocation2 + $0x150] sm:$0xf]  ;;  %781 = vmatpush.bf16.msra.mxu0 %v1228_v16  ;;  %v1482_v30 = vld [vmem:[#allocation2 + $0x154] sm:$0xf0]  ;;  %v1284_v33 = vor.u32 %v1466_v27, %v1283_v26  ;;  %v1211_v35 = vld [vmem:[#allocation2 + $0x40] sm:$0xf] }
  0x1b   : > { %v1411_v31 = vld [vmem:[#allocation2 + $0x1d0] sm:$0xf]  ;;  %v1498_v32 = vld [vmem:[#allocation2 + $0x1d4] sm:$0xf0]  ;;  %800 = vmatpush.bf16.msra.mxu1 %v1292_v17  ;;  %v1348_v34 = vor.u32 %v1482_v30, %v1347_v28  ;;  %v1448_v36 = vld [vmem:[#allocation2 + $0x44] sm:$0xf0] }
  0x1c   : > { %819 = vmatpush.bf16.msra.mxu2 %v1356_v21  ;;  %v1275_v37 = vld [vmem:[#allocation2 + $0xc0] sm:$0xf]  ;;  %v1412_v38 = vor.u32 %v1498_v32, %v1411_v31  ;;  %v1464_v39 = vld [vmem:[#allocation2 + $0xc4] sm:$0xf0]  ;;  %v1212_v44 = vor.u32 %v1448_v36, %v1211_v35  ;;  %v1203_v45 = vld [vmem:[#allocation2 + $0x30] sm:$0xf] }
  0x1d   : > { %838 = vmatpush.bf16.msra.mxu3 %v1420_v25  ;;  %v1339_v40 = vld [vmem:[#allocation2 + $0x140] sm:$0xf]  ;;  %v1480_v41 = vld [vmem:[#allocation2 + $0x144] sm:$0xf0]  ;;  %s1437_s17 = sshll.u32 %s1928_s16, 5  ;;  %v1276_v46 = vor.u32 %v1464_v39, %v1275_v37  ;;  %s1438_s27 = sshll.u32 %s1928_s16, 4 }
  0x1e   : > { %v1403_v42 = vld [vmem:[#allocation2 + $0x1c0] sm:$0xf]  ;;  %v1496_v43 = vld [vmem:[#allocation2 + $0x1c4] sm:$0xf0]  ;;  %782 = vmatpush.bf16.msra.mxu0 %v1220_v29  ;;  %v1340_v47 = vor.u32 %v1480_v41, %v1339_v40  ;;  %v1446_v48 = vld [vmem:[#allocation2 + $0x34] sm:$0xf0]  ;;  %s1713_s20 = scalar_lea.vmem %s1918_s0, %s1437_s17  ;;  %s1842_s8 = scalar_lea.vmem %s1923_s5, %s1438_s27 }
  0x1f   : > { %801 = vmatpush.bf16.msra.mxu1 %v1284_v33  ;;  %v1267_v49 = vld [vmem:[#allocation2 + $0xb0] sm:$0xf]  ;;  %v1462_v50 = vld [vmem:[#allocation2 + $0xb4] sm:$0xf0]  ;;  %v1404_v51 = vor.u32 %v1496_v43, %v1403_v42  ;;  %v1195_v56 = vld [vmem:[#allocation2 + $0x20] sm:$0xf]  ;;  %v1204_v58 = vor.u32 %v1446_v48, %v1203_v45 }
  0x20   : > { %820 = vmatpush.bf16.msra.mxu2 %v1348_v34  ;;  %v1331_v52 = vld [vmem:[#allocation2 + $0x130] sm:$0xf]  ;;  %v1478_v53 = vld [vmem:[#allocation2 + $0x134] sm:$0xf0]  ;;  %v1444_v57 = vld [vmem:[#allocation2 + $0x24] sm:$0xf0]  ;;  %v1268_v63 = vor.u32 %v1462_v50, %v1267_v49 }
  0x21   : > { %839 = vmatpush.bf16.msra.mxu3 %v1412_v38  ;;  %v1395_v54 = vld [vmem:[#allocation2 + $0x1b0] sm:$0xf]  ;;  %v1494_v55 = vld [vmem:[#allocation2 + $0x1b4] sm:$0xf0]  ;;  %v1259_v59 = vld [vmem:[#allocation2 + $0xa0] sm:$0xf]  ;;  %v1332_v0 = vor.u32 %v1478_v53, %v1331_v52  ;;  %v1196_v11 = vor.u32 %v1444_v57, %v1195_v56 }
  0x22   : > { %783 = vmatpush.bf16.msra.mxu0 %v1212_v44  ;;  %v1460_v60 = vld [vmem:[#allocation2 + $0xa4] sm:$0xf0]  ;;  %v1323_v61 = vld [vmem:[#allocation2 + $0x120] sm:$0xf]  ;;  %v1696_v3 = vld [vmem:[#allocation2 + $0x10] sm:$0xf]  ;;  %v1396_v4 = vor.u32 %v1494_v55, %v1395_v54 }
  0x23   : > { %v1476_v62 = vld [vmem:[#allocation2 + $0x124] sm:$0xf0]  ;;  %802 = vmatpush.bf16.msra.mxu1 %v1276_v46  ;;  %v1387_v1 = vld [vmem:[#allocation2 + $0x1a0] sm:$0xf]  ;;  %v1442_v5 = vld [vmem:[#allocation2 + $0x14] sm:$0xf0]  ;;  %v1260_v15 = vor.u32 %v1460_v60, %v1259_v59 }
  0x24   : > { %821 = vmatpush.bf16.msra.mxu2 %v1340_v47  ;;  %v1492_v2 = vld [vmem:[#allocation2 + $0x1a4] sm:$0xf0]  ;;  %v1698_v6 = vld [vmem:[#allocation2 + $0x90] sm:$0xf]  ;;  %v1700_v7 = vld [vmem:[#allocation2 + $0x94] sm:$0xf0]  ;;  %v1324_v16 = vor.u32 %v1476_v62, %v1323_v61  ;;  %v1188_v19 = vor.u32 %v1442_v5, %v1696_v3 }
  0x25   : > { %840 = vmatpush.bf16.msra.mxu3 %v1404_v51  ;;  %v1702_v8 = vld [vmem:[#allocation2 + $0x110] sm:$0xf]  ;;  %v1704_v9 = vld [vmem:[#allocation2 + $0x114] sm:$0xf0]  ;;  %v1717_v13 = vld [vmem:[#allocation2] sm:$0xf]  ;;  %v1388_v18 = vor.u32 %v1492_v2, %v1387_v1  ;;  %v1252_v23 = vor.u32 %v1700_v7, %v1698_v6 }
  0x26   : > { %v1706_v10 = vld [vmem:[#allocation2 + $0x190] sm:$0xf]  ;;  %784 = vmatpush.bf16.msra.mxu0 %v1204_v58  ;;  %v1715_v12 = vld [vmem:[#allocation2 + $0x194] sm:$0xf0]  ;;  %v1719_v14 = vld [vmem:[#allocation2 + $0x4] sm:$0xf0]  ;;  %v1316_v24 = vor.u32 %v1704_v9, %v1702_v8 }
  0x27   : > { %803 = vmatpush.bf16.msra.mxu1 %v1268_v63  ;;  %v1721_v17 = vld [vmem:[#allocation2 + $0x80] sm:$0xf]  ;;  %v1724_v20 = vld [vmem:[#allocation2 + $0x84] sm:$0xf0]  ;;  %v1380_v25 = vor.u32 %v1715_v12, %v1706_v10  ;;  %v1180_v26 = vor.u32 %v1719_v14, %v1717_v13  ;;  %v316_v35 = vld [vmem:[%s1713_s20 + $0x10] sm:$0xff] }
  0x28   : > { %822 = vmatpush.bf16.msra.mxu2 %v1332_v0  ;;  %v314_v21 = vld [vmem:[%s1713_s20] sm:$0xff]  ;;  %v315_v29 = vld [vmem:[%s1713_s20 + $0x8] sm:$0xff]  ;;  %v1244_v36 = vor.u32 %v1724_v20, %v1721_v17  ;;  %v320_v37 = vld [vmem:[%s1713_s20 + $0x30] sm:$0xff] }
  0x29   : > { %841 = vmatpush.bf16.msra.mxu3 %v1396_v4  ;;  %v318_v22 = vld [vmem:[%s1713_s20 + $0x20] sm:$0xff]  ;;  %v319_v32 = vld [vmem:[%s1713_s20 + $0x28] sm:$0xff]  ;;  %v317_v40 = vld [vmem:[%s1713_s20 + $0x18] sm:$0xff] }
  0x2a   : > { %v330_v27 = vld [vmem:[%s1919_s1] sm:$0xf]  ;;  %785 = vmatpush.bf16.msra.mxu0 %v1196_v11  ;;  %v321_v41 = vld [vmem:[%s1713_s20 + $0x38] sm:$0xff]  ;;  %v1472_v44 = vld [vmem:[#allocation2 + $0x104] sm:$0xf0] }
  0x2b   : > { %v356_v28 = vld [vmem:[%s1920_s2] sm:$0xf]  ;;  %v1743_v30 = vperm.slane %v330_v27, 0  ;;  %v1748_v33 = vperm.slane %v330_v27, 1  ;;  %804 = vmatpush.bf16.msra.mxu1 %v1260_v15  ;;  %v1756_v38 = vperm.slane %v330_v27, 2  ;;  %v1762_v42 = vperm.slane %v330_v27, 3 }
  0x2c   : > { %v1745_v31 = vperm.slane %v356_v28, 0  ;;  %v1750_v34 = vperm.slane %v356_v28, 1  ;;  %823 = vmatpush.bf16.msra.mxu2 %v1324_v16  ;;  %v1758_v39 = vperm.slane %v356_v28, 2  ;;  %v1307_v43 = vld [vmem:[#allocation2 + $0x100] sm:$0xf]  ;;  %v1778_v2 = vperm.slane %v356_v28, 3 }
  0x2d   : > { %842 = vmatpush.bf16.msra.mxu3 %v1388_v18  ;;  %v1371_v45 = vld [vmem:[#allocation2 + $0x180] sm:$0xf]  ;;  %v340_v46 = vmul.f32 %v1743_v30, %v314_v21  ;;  %v344_v47 = vmul.f32 %v1743_v30, %v318_v22  ;;  %v341_v48 = vmul.f32 %v1748_v33, %v315_v29  ;;  %v345_v49 = vmul.f32 %v1748_v33, %v319_v32  ;;  %v1488_v50 = vld [vmem:[#allocation2 + $0x184] sm:$0xf0]  ;;  %v1485_v55 = vld [vmem:[#allocation2 + $0x174] sm:$0xf] }
  0x2e   : > { %v342_v51 = vmul.f32 %v1756_v38, %v316_v35  ;;  %v346_v52 = vmul.f32 %v1756_v38, %v320_v37  ;;  %v343_v53 = vmul.f32 %v1762_v42, %v317_v40  ;;  %v347_v54 = vmul.f32 %v1762_v42, %v321_v41  ;;  %v1365_v56 = vld [vmem:[#allocation2 + $0x178] sm:$0xf0]  ;;  %786 = vmatpush.bf16.msra.mxu0 %v1188_v19  ;;  %v1469_v61 = vld [vmem:[#allocation2 + $0xf4] sm:$0xf]  ;;  %v1483_v13 = vld [vmem:[#allocation2 + $0x164] sm:$0xf] }
  0x2f   : > { %v366_v57 = vadd.f32 %v1745_v31, %v340_v46  ;;  %v370_v58 = vadd.f32 %v1745_v31, %v344_v47  ;;  %v367_v59 = vadd.f32 %v1750_v34, %v341_v48  ;;  %v371_v60 = vadd.f32 %v1750_v34, %v345_v49  ;;  %v1301_v62 = vld [vmem:[#allocation2 + $0xf8] sm:$0xf0]  ;;  %805 = vmatpush.bf16.msra.mxu1 %v1252_v23  ;;  %v1453_v5 = vld [vmem:[#allocation2 + $0x74] sm:$0xf]  ;;  %v1357_v14 = vld [vmem:[#allocation2 + $0x168] sm:$0xf0] }
  0x30   : > { %824 = vmatpush.bf16.msra.mxu2 %v1316_v24  ;;  %v1308_v63 = vor.u32 %v1472_v44, %v1307_v43  ;;  %v368_v0 = vadd.f32 %v1758_v39, %v342_v51  ;;  %v372_v1 = vadd.f32 %v1758_v39, %v346_v52  ;;  %v1372_v3 = vor.u32 %v1488_v50, %v1371_v45  ;;  %v1237_v6 = vld [vmem:[#allocation2 + $0x78] sm:$0xf0]  ;;  %v1501_v7 = vld [vmem:[#allocation2 + $0x1f4] sm:$0xf]  ;;  %v1467_v17 = vld [vmem:[#allocation2 + $0xe4] sm:$0xf] }
  0x31   : > { %843 = vmatpush.bf16.msra.mxu3 %v1380_v25  ;;  %v1368_v4 = vor.u32 %v1485_v55, %v1365_v56  ;;  %v1780_v8 = vpack.c.bf16 %v370_v58, %v366_v57  ;;  %v369_v9 = vadd.f32 %v1778_v2, %v343_v53  ;;  %v373_v10 = vadd.f32 %v1778_v2, %v347_v54  ;;  %v1429_v12 = vld [vmem:[#allocation2 + $0x1f8] sm:$0xf0]  ;;  %v1293_v18 = vld [vmem:[#allocation2 + $0xe8] sm:$0xf0]  ;;  %v1451_v21 = vld [vmem:[#allocation2 + $0x64] sm:$0xf] }
  0x32   : > { %v1304_v11 = vor.u32 %v1469_v61, %v1301_v62  ;;  %787 = vmatpush.bf16.msra.mxu0 %v1180_v26  ;;  %v1784_v15 = vpack.c.bf16 %v371_v60, %v367_v59  ;;  %v1786_v16 = vpack.c.bf16 %v372_v1, %v368_v0  ;;  %v1240_v20 = vor.u32 %v1453_v5, %v1237_v6  ;;  %v1229_v24 = vld [vmem:[#allocation2 + $0x68] sm:$0xf0]  ;;  %v1499_v25 = vld [vmem:[#allocation2 + $0x1e4] sm:$0xf]  ;;  %v1481_v29 = vld [vmem:[#allocation2 + $0x154] sm:$0xf] }
  0x33   : > { %806 = vmatpush.bf16.msra.mxu1 %v1244_v36  ;;  %v1788_v19 = vpack.c.bf16 %v373_v10, %v369_v9  ;;  %v1432_v22 = vor.u32 %v1501_v7, %v1429_v12  ;;  %v1360_v23 = vor.u32 %v1483_v13, %v1357_v14  ;;  %v322_v26 = vld [vmem:[%s1713_s20 + $0x40] sm:$0xff]  ;;  %v1296_v27 = vor.u32 %v1467_v17, %v1293_v18  ;;  %v1421_v28 = vld [vmem:[#allocation2 + $0x1e8] sm:$0xf0]  ;;  %v1349_v32 = vld [vmem:[#allocation2 + $0x158] sm:$0xf0] }
  0x34   : > { %825 = vmatpush.bf16.msra.mxu2 %v1308_v63  ;;  %v1449_v35 = vld [vmem:[#allocation2 + $0x54] sm:$0xf]  ;;  %v1221_v36 = vld [vmem:[#allocation2 + $0x58] sm:$0xf0]  ;;  %v1232_v41 = vor.u32 %v1451_v21, %v1229_v24  ;;  %v326_v45 = vld [vmem:[%s1713_s20 + $0x60] sm:$0xff]  ;;  %v1424_v48 = vor.u32 %v1499_v25, %v1421_v28  ;;  %v1352_v49 = vor.u32 %v1481_v29, %v1349_v32  ;;  %v348_v56 = vmul.f32 %v1743_v30, %v322_v26 }
  0x35   : > { %844 = vmatpush.bf16.msra.mxu3 %v1372_v3  ;;  %788 = vmatmul.bf16.vlgmr.msra.gmra.mxu0 %v1780_v8  ;;  %v1465_v37 = vld [vmem:[#allocation2 + $0xd4] sm:$0xf]  ;;  %v1285_v40 = vld [vmem:[#allocation2 + $0xd8] sm:$0xf0]  ;;  %v323_v46 = vld [vmem:[%s1713_s20 + $0x48] sm:$0xff]  ;;  %v352_v57 = vmul.f32 %v1743_v30, %v326_v45  ;;  %v1224_v1 = vor.u32 %v1449_v35, %v1221_v36 }
  0x36   : > { %807 = vmatmul.bf16.vlgmr.msra.gmra.mxu1 %v1784_v15  ;;  %856 = vmatpush.bf16.msrb.mxu0 %v1240_v20  ;;  %v1497_v43 = vld [vmem:[#allocation2 + $0x1d4] sm:$0xf]  ;;  %v1413_v44 = vld [vmem:[#allocation2 + $0x1d8] sm:$0xf0]  ;;  %v327_v47 = vld [vmem:[%s1713_s20 + $0x68] sm:$0xff]  ;;  %v1288_v53 = vor.u32 %v1465_v37, %v1285_v40  ;;  %v349_v61 = vmul.f32 %v1748_v33, %v323_v46 }
  0x37   : > { %875 = vmatpush.bf16.msrb.mxu1 %v1304_v11  ;;  %826 = vmatmul.bf16.vlgmr.msra.gmra.mxu2 %v1786_v16  ;;  %v324_v50 = vld [vmem:[%s1713_s20 + $0x50] sm:$0xff]  ;;  %v325_v52 = vld [vmem:[%s1713_s20 + $0x58] sm:$0xff]  ;;  %v1479_v54 = vld [vmem:[#allocation2 + $0x144] sm:$0xf]  ;;  %v353_v62 = vmul.f32 %v1748_v33, %v327_v47  ;;  %v1416_v30 = vor.u32 %v1497_v43, %v1413_v44  ;;  %v374_v11 = vadd.f32 %v1745_v31, %v348_v56 }
  0x38   : > { %894 = vmatpush.bf16.msrb.mxu2 %v1368_v4  ;;  %845 = vmatmul.bf16.vlgmr.msra.gmra.mxu3 %v1788_v19  ;;  %v328_v51 = vld [vmem:[%s1713_s20 + $0x70] sm:$0xff]  ;;  %v1341_v55 = vld [vmem:[#allocation2 + $0x148] sm:$0xf0]  ;;  %v329_v58 = vld [vmem:[%s1713_s20 + $0x78] sm:$0xff]  ;;  %v350_v63 = vmul.f32 %v1756_v38, %v324_v50  ;;  %v351_v3 = vmul.f32 %v1762_v42, %v325_v52  ;;  %v375_v14 = vadd.f32 %v1750_v34, %v349_v61 }
  0x39   : > { %913 = vmatpush.bf16.msrb.mxu3 %v1432_v22  ;;  %v1463_v59 = vld [vmem:[#allocation2 + $0xc4] sm:$0xf]  ;;  %v1277_v60 = vld [vmem:[#allocation2 + $0xc8] sm:$0xf0]  ;;  %v354_v0 = vmul.f32 %v1756_v38, %v328_v51  ;;  %v355_v4 = vmul.f32 %v1762_v42, %v329_v58  ;;  %v1344_v5 = vor.u32 %v1479_v54, %v1341_v55  ;;  %v378_v38 = vadd.f32 %v1745_v31, %v352_v57  ;;  %v1477_v12 = vld [vmem:[#allocation2 + $0x134] sm:$0xf] }
  0x3a   : > { %857 = vmatpush.bf16.msrb.mxu0 %v1232_v41  ;;  %v1447_v6 = vld [vmem:[#allocation2 + $0x44] sm:$0xf]  ;;  %v1213_v7 = vld [vmem:[#allocation2 + $0x48] sm:$0xf0]  ;;  %v1280_v10 = vor.u32 %v1463_v59, %v1277_v60  ;;  %v1333_v13 = vld [vmem:[#allocation2 + $0x138] sm:$0xf0]  ;;  %v379_v42 = vadd.f32 %v1750_v34, %v353_v62  ;;  %v376_v17 = vadd.f32 %v1758_v39, %v350_v63 }
  0x3b   : > { %876 = vmatpush.bf16.msrb.mxu1 %v1296_v27  ;;  %v1495_v9 = vld [vmem:[#allocation2 + $0x1c4] sm:$0xf]  ;;  %v1405_v33 = vld [vmem:[#allocation2 + $0x1c8] sm:$0xf0]  ;;  %v380_v18 = vadd.f32 %v1758_v39, %v354_v0  ;;  %v1461_v20 = vld [vmem:[#allocation2 + $0xb4] sm:$0xf]  ;;  %v1216_v22 = vor.u32 %v1447_v6, %v1213_v7  ;;  %v381_v24 = vadd.f32 %v1778_v2, %v355_v4  ;;  %v1336_v25 = vor.u32 %v1477_v12, %v1333_v13 }
  0x3c   : > { %895 = vmatpush.bf16.msrb.mxu2 %v1360_v23  ;;  %v1269_v21 = vld [vmem:[#allocation2 + $0xb8] sm:$0xf0]  ;;  %v377_v23 = vadd.f32 %v1778_v2, %v351_v3  ;;  %v1408_v31 = vor.u32 %v1495_v9, %v1405_v33  ;;  %v1445_v26 = vld [vmem:[#allocation2 + $0x34] sm:$0xf]  ;;  %v1818_v34 = vpack.c.bf16 %v378_v38, %v374_v11  ;;  %v1475_v32 = vld [vmem:[#allocation2 + $0x124] sm:$0xf]  ;;  %v1820_v36 = vpack.c.bf16 %v379_v42, %v375_v14 }
  0x3d   : > { %914 = vmatpush.bf16.msrb.mxu3 %v1424_v48  ;;  %v1205_v27 = vld [vmem:[#allocation2 + $0x38] sm:$0xf0]  ;;  %v1493_v28 = vld [vmem:[#allocation2 + $0x1b4] sm:$0xf]  ;;  %v1272_v29 = vor.u32 %v1461_v20, %v1269_v21  ;;  %v1325_v35 = vld [vmem:[#allocation2 + $0x128] sm:$0xf0]  ;;  %v1822_v37 = vpack.c.bf16 %v380_v18, %v376_v17  ;;  %v965_v42 = vlaneseq  ;;  %v970_v18 = vstv %s1433_s26 }
  0x3e   : > { %858 = vmatpush.bf16.msrb.mxu0 %v1224_v1  ;;  %v1397_v39 = vld [vmem:[#allocation2 + $0x1b8] sm:$0xf0]  ;;  %v1459_v40 = vld [vmem:[#allocation2 + $0xa4] sm:$0xf]  ;;  %v1261_v2 = vld [vmem:[#allocation2 + $0xa8] sm:$0xf0]  ;;  %v389_v41 = vpack.c.bf16 %v381_v24, %v377_v23  ;;  %v1208_v43 = vor.u32 %v1445_v26, %v1205_v27  ;;  %v1328_v45 = vor.u32 %v1475_v32, %v1325_v35 }
  0x3f   : > { %877 = vmatpush.bf16.msrb.mxu1 %v1288_v53  ;;  %v1400_v44 = vor.u32 %v1493_v28, %v1397_v39  ;;  %v1443_v46 = vld [vmem:[#allocation2 + $0x24] sm:$0xf]  ;;  %v1197_v47 = vld [vmem:[#allocation2 + $0x28] sm:$0xf0]  ;;  %v1473_v51 = vld [vmem:[#allocation2 + $0x114] sm:$0xf] }
  0x40   : > { %896 = vmatpush.bf16.msrb.mxu2 %v1352_v49  ;;  %v1491_v48 = vld [vmem:[#allocation2 + $0x1a4] sm:$0xf]  ;;  %v1264_v49 = vor.u32 %v1459_v40, %v1261_v2  ;;  %v1389_v50 = vld [vmem:[#allocation2 + $0x1a8] sm:$0xf0]  ;;  %v1317_v52 = vld [vmem:[#allocation2 + $0x118] sm:$0xf0]  ;;  %v1200_v55 = vor.u32 %v1443_v46, %v1197_v47 }
  0x41   : > { %915 = vmatpush.bf16.msrb.mxu3 %v1416_v30  ;;  %v1457_v53 = vld [vmem:[#allocation2 + $0x94] sm:$0xf]  ;;  %v1253_v54 = vld [vmem:[#allocation2 + $0x98] sm:$0xf0]  ;;  %v1392_v56 = vor.u32 %v1491_v48, %v1389_v50  ;;  %v1320_v57 = vor.u32 %v1473_v51, %v1317_v52  ;;  %v1471_v63 = vld [vmem:[#allocation2 + $0x104] sm:$0xf] }
  0x42   : > { %859 = vmatpush.bf16.msrb.mxu0 %v1216_v22  ;;  %v1441_v58 = vld [vmem:[#allocation2 + $0x14] sm:$0xf]  ;;  %v1189_v59 = vld [vmem:[#allocation2 + $0x18] sm:$0xf0]  ;;  %v1256_v61 = vor.u32 %v1457_v53, %v1253_v54  ;;  %v1309_v0 = vld [vmem:[#allocation2 + $0x108] sm:$0xf0] }
  0x43   : > { %878 = vmatpush.bf16.msrb.mxu1 %v1280_v10  ;;  %v1489_v60 = vld [vmem:[#allocation2 + $0x194] sm:$0xf]  ;;  %v1381_v62 = vld [vmem:[#allocation2 + $0x198] sm:$0xf0]  ;;  %v1455_v1 = vld [vmem:[#allocation2 + $0x84] sm:$0xf]  ;;  %v1192_v4 = vor.u32 %v1441_v58, %v1189_v59 }
  0x44   : > { %897 = vmatpush.bf16.msrb.mxu2 %v1344_v5  ;;  %v1245_v3 = vld [vmem:[#allocation2 + $0x88] sm:$0xf0]  ;;  %v1384_v30 = vor.u32 %v1489_v60, %v1381_v62  ;;  %v1312_v5 = vor.u32 %v1471_v63, %v1309_v0  ;;  %v1439_v6 = vld [vmem:[#allocation2 + $0x4] sm:$0xf]  ;;  %v454_v12 = vld [vmem:[#allocation4] sm:$0x3] }
  0x45   : > { %916 = vmatpush.bf16.msrb.mxu3 %v1408_v31  ;;  %793 = vmatmul.bf16.gmra.mxu0 %v1818_v34  ;;  %v1181_v7 = vld [vmem:[#allocation2 + $0x8] sm:$0xf0]  ;;  %v1248_v9 = vor.u32 %v1455_v1, %v1245_v3  ;;  %v1487_v10 = vld [vmem:[#allocation2 + $0x184] sm:$0xf]  ;;  %v456_v13 = vperm.slane %v454_v12, 0  ;;  %v457_v60 = vperm.slane %v454_v12, 1 }
  0x46   : > { %812 = vmatmul.bf16.gmra.mxu1 %v1820_v36  ;;  %860 = vmatpush.bf16.msrb.mxu0 %v1208_v43  ;;  %v1373_v33 = vld [vmem:[#allocation2 + $0x188] sm:$0xf0]  ;;  %v1184_v11 = vor.u32 %v1439_v6, %v1181_v7 }
  0x47   : > { %879 = vmatpush.bf16.msrb.mxu1 %v1272_v29  ;;  %831 = vmatmul.bf16.gmra.mxu2 %v1822_v37  ;;  %v1376_v38 = vor.u32 %v1487_v10, %v1373_v33 }
  0x48   : > { %898 = vmatpush.bf16.msrb.mxu2 %v1336_v25  ;;  %850 = vmatmul.bf16.gmra.mxu3 %v389_v41 }
  0x49   : > { %917 = vmatpush.bf16.msrb.mxu3 %v1400_v44 }
  0x4a   : > { %861 = vmatpush.bf16.msrb.mxu0 %v1200_v55 }
  0x4b   : > { %880 = vmatpush.bf16.msrb.mxu1 %v1264_v49 }
  0x4c   : > { %899 = vmatpush.bf16.msrb.mxu2 %v1328_v45 }
  0x4d   : > { %918 = vmatpush.bf16.msrb.mxu3 %v1392_v56 }
  0x4e   : > { %862 = vmatpush.bf16.msrb.mxu0 %v1192_v4 }
  0x4f   : > { %881 = vmatpush.bf16.msrb.mxu1 %v1256_v61 }
  0x50   : > { %900 = vmatpush.bf16.msrb.mxu2 %v1320_v57 }
  0x51   : > { %919 = vmatpush.bf16.msrb.mxu3 %v1384_v30 }
  0x52   : > { %863 = vmatpush.bf16.msrb.mxu0 %v1184_v11 }
  0x53   : > { %882 = vmatpush.bf16.msrb.mxu1 %v1248_v9 }
  0x54   : > { %901 = vmatpush.bf16.msrb.mxu2 %v1312_v5 }
  0x55   : > { %920 = vmatpush.bf16.msrb.mxu3 %v1376_v38  ;;  %864 = vmatmul.bf16.vlgmr.msrb.gmra.mxu0 %v1780_v8 }
  0x56   : > { %883 = vmatmul.bf16.vlgmr.msrb.gmra.mxu1 %v1784_v15 }
  0x57   : > { %902 = vmatmul.bf16.vlgmr.msrb.gmra.mxu2 %v1786_v16  ;;  %v966_v16 = vshrl.u32 %v965_v42, 7 }
  0x58   : > { %921 = vmatmul.bf16.vlgmr.msrb.gmra.mxu3 %v1788_v19 }
  0x59   : > { %v1836_v22 = vadd.s32 %v970_v18, %v966_v16  ;;  %v967_v26 = vadd.s32 8, %v966_v16  ;;  %v968_v45 = vadd.s32 16, %v966_v16  ;;  %v969_v57 = vadd.s32 24, %v966_v16 }
  0x5b   : > { %vm975_vm1 = vcmp.lt.s32.totalorder %v1836_v22, 48  ;;  %v1850_v32 = vadd.s32 %v970_v18, %v967_v26  ;;  %v1858_v51 = vadd.s32 %v970_v18, %v968_v45  ;;  %v974_v1 = vadd.s32 %v970_v18, %v969_v57 }
  0x5d   : > { %vm976_vm2 = vcmp.lt.s32.totalorder %v1850_v32, 48  ;;  %vm977_vm5 = vcmp.lt.s32.totalorder %v1858_v51, 48  ;;  %vm978_vm7 = vcmp.lt.s32.totalorder %v974_v1, 48 }
  0x65   : > { %869 = vmatmul.bf16.gmra.mxu0 %v1818_v34 }
  0x66   : > { %888 = vmatmul.bf16.gmra.mxu1 %v1820_v36 }
  0x67   : > { %907 = vmatmul.bf16.gmra.mxu2 %v1822_v37 }
  0x68   : > { %926 = vmatmul.bf16.gmra.mxu3 %v389_v41 }
  0xb2   : > { %v789_v14 = vpop.f32.mrf.mxu0 }
  0xb3   : > { %v790_v17 = vadd.f32 %v789_v14, %v456_v13  ;;  %v808_v8 = vpop.f32.mrf.mxu1 }
  0xb5   : > { %v809_v15 = vadd.f32 %v808_v8, %v790_v17 }
  0xba   : > { %v827_v19 = vpop.f32.mrf.mxu2  ;;  %v791_v23 = vpop.f32.mrf.mxu0 }
  0xbb   : > { %v828_v20 = vadd.f32 %v827_v19, %v809_v15  ;;  %v846_v21 = vpop.f32.mrf.mxu3  ;;  %v810_v24 = vpop.f32.mrf.mxu1  ;;  %v792_v25 = vadd.f32 %v791_v23, %v456_v13 }
  0xbd   : > { %v847_v31 = vadd.f32 %v846_v21, %v828_v20  ;;  %v811_v34 = vadd.f32 %v810_v24, %v792_v25 }
  0xbf   : > { %vm932_vm0 = vcmp.gt.f32.partialorder %v847_v31, 0.0  ;;  %v940_v27 = vmul.f32 0.2, %v847_v31 }
  0xc1   : > { %v948_v28 = vsel %vm932_vm0, %v847_v31, %v940_v27 }
  0xc2   : > { %956 = vst [vmem:[%s1842_s8] sm:$0xff] %v948_v28  ;;  %v1848_v29 = vsel %vm975_vm1, %v948_v28, 0.0  ;;  %v829_v39 = vpop.f32.mrf.mxu2  ;;  %v794_v37 = vpop.f32.mrf.mxu0 }
  0xc3   : > { %v830_v35 = vadd.f32 %v829_v39, %v811_v34  ;;  %v848_v36 = vpop.f32.mrf.mxu3  ;;  %v795_v40 = vadd.f32 %v794_v37, %v456_v13  ;;  %v813_v2 = vpop.f32.mrf.mxu1 }
  0xc5   : > { %v849_v41 = vadd.f32 %v848_v36, %v830_v35  ;;  %v814_v44 = vadd.f32 %v813_v2, %v795_v40 }
  0xc7   : > { %vm934_vm3 = vcmp.gt.f32.partialorder %v849_v41, 0.0  ;;  %v942_v43 = vmul.f32 0.2, %v849_v41 }
  0xc9   : > { %v950_v46 = vsel %vm934_vm3, %v849_v41, %v942_v43 }
  0xca   : > { %958 = vst [vmem:[%s1842_s8 + $0x10] sm:$0xff] %v950_v46  ;;  %v1856_v47 = vsel %vm976_vm2, %v950_v46, 0.0  ;;  %v832_v48 = vpop.f32.mrf.mxu2  ;;  %v796_v52 = vpop.f32.mrf.mxu0 }
  0xcb   : > { %v833_v49 = vadd.f32 %v832_v48, %v814_v44  ;;  %v851_v50 = vpop.f32.mrf.mxu3  ;;  %v815_v53 = vpop.f32.mrf.mxu1  ;;  %v797_v55 = vadd.f32 %v796_v52, %v456_v13 }
  0xcd   : > { %v852_v54 = vadd.f32 %v851_v50, %v833_v49  ;;  %v816_v59 = vadd.f32 %v815_v53, %v797_v55 }
  0xcf   : > { %vm936_vm4 = vcmp.gt.f32.partialorder %v852_v54, 0.0  ;;  %v944_v56 = vmul.f32 0.2, %v852_v54 }
  0xd1   : > { %v952_v58 = vsel %vm936_vm4, %v852_v54, %v944_v56 }
  0xd2   : > { %960 = vst [vmem:[%s1842_s8 + $0x20] sm:$0xff] %v952_v58  ;;  %v1864_v61 = vsel %vm977_vm5, %v952_v58, 0.0  ;;  %v834_v62 = vpop.f32.mrf.mxu2  ;;  %v865_v3 = vpop.f32.mrf.mxu0 }
  0xd3   : > { %v835_v63 = vadd.f32 %v834_v62, %v816_v59  ;;  %v853_v0 = vpop.f32.mrf.mxu3  ;;  %v884_v4 = vpop.f32.mrf.mxu1  ;;  %v866_v5 = vadd.f32 %v865_v3, %v457_v60 }
  0xd5   : > { %v854_v30 = vadd.f32 %v853_v0, %v835_v63  ;;  %v885_v7 = vadd.f32 %v884_v4, %v866_v5 }
  0xd7   : > { %vm938_vm6 = vcmp.gt.f32.partialorder %v854_v30, 0.0  ;;  %v946_v6 = vmul.f32 0.2, %v854_v30 }
  0xd9   : > { %v954_v9 = vsel %vm938_vm6, %v854_v30, %v946_v6 }
  0xda   : > { %962 = vst [vmem:[%s1842_s8 + $0x30] sm:$0xff] %v954_v9  ;;  %v1868_v10 = vsel %vm978_vm7, %v954_v9, 0.0  ;;  %v903_v33 = vpop.f32.mrf.mxu2  ;;  %v867_v12 = vpop.f32.mrf.mxu0 }
  0xdb   : > { %v922_v11 = vpop.f32.mrf.mxu3  ;;  %v904_v38 = vadd.f32 %v903_v33, %v885_v7  ;;  %v886_v13 = vpop.f32.mrf.mxu1  ;;  %v868_v17 = vadd.f32 %v867_v12, %v457_v60 }
  0xdd   : > { %v923_v14 = vadd.f32 %v922_v11, %v904_v38  ;;  %v887_v16 = vadd.f32 %v886_v13, %v868_v17 }
  0xdf   : > { %vm933_vm8 = vcmp.gt.f32.partialorder %v923_v14, 0.0  ;;  %v941_v8 = vmul.f32 0.2, %v923_v14 }
  0xe1   : > { %v949_v15 = vsel %vm933_vm8, %v923_v14, %v941_v8 }
  0xe2   : > { %957 = vst [vmem:[%s1842_s8 + $0x8] sm:$0xff] %v949_v15  ;;  %v988_v18 = vsel %vm975_vm1, %v949_v15, 0.0  ;;  %v905_v19 = vpop.f32.mrf.mxu2  ;;  %v870_v23 = vpop.f32.mrf.mxu0 }
  0xe3   : > { %v924_v20 = vpop.f32.mrf.mxu3  ;;  %v906_v21 = vadd.f32 %v905_v19, %v887_v16  ;;  %v871_v24 = vadd.f32 %v870_v23, %v457_v60  ;;  %v889_v25 = vpop.f32.mrf.mxu1 }
  0xe5   : > { %v925_v31 = vadd.f32 %v924_v20, %v906_v21  ;;  %v890_v27 = vadd.f32 %v889_v25, %v871_v24 }
  0xe7   : > { %vm935_vm9 = vcmp.gt.f32.partialorder %v925_v31, 0.0  ;;  %v943_v26 = vmul.f32 0.2, %v925_v31 }
  0xe9   : > { %v951_v28 = vsel %vm935_vm9, %v925_v31, %v943_v26 }
  0xea   : > { %959 = vst [vmem:[%s1842_s8 + $0x18] sm:$0xff] %v951_v28  ;;  %v990_v34 = vsel %vm976_vm2, %v951_v28, 0.0  ;;  %v908_v39 = vpop.f32.mrf.mxu2  ;;  %v872_v36 = vpop.f32.mrf.mxu0 }
  0xeb   : > { %v927_v35 = vpop.f32.mrf.mxu3  ;;  %v909_v22 = vadd.f32 %v908_v39, %v890_v27  ;;  %v873_v40 = vadd.f32 %v872_v36, %v457_v60  ;;  %v891_v41 = vpop.f32.mrf.mxu1 }
  0xed   : > { %v928_v37 = vadd.f32 %v927_v35, %v909_v22  ;;  %v892_v44 = vadd.f32 %v891_v41, %v873_v40 }
  0xef   : > { %vm937_vm10 = vcmp.gt.f32.partialorder %v928_v37, 0.0  ;;  %v945_v2 = vmul.f32 0.2, %v928_v37 }
  0xf1   : > { %v953_v43 = vsel %vm937_vm10, %v928_v37, %v945_v2 }
  0xf2   : > { %961 = vst [vmem:[%s1842_s8 + $0x28] sm:$0xff] %v953_v43  ;;  %v992_v45 = vsel %vm977_vm5, %v953_v43, 0.0  ;;  %v910_v46 = vpop.f32.mrf.mxu2 }
  0xf3   : > { %v911_v48 = vadd.f32 %v910_v46, %v892_v44  ;;  %v929_v32 = vpop.f32.mrf.mxu3 }
  0xf5   : > { %v930_v49 = vadd.f32 %v929_v32, %v911_v48 }
  0xf6   : > { %998 = sbr.rel (%p1165_p2) target bundleno = 254 (0xfe), region = 52 }
  0xf7   : > { %vm939_vm11 = vcmp.gt.f32.partialorder %v930_v49, 0.0  ;;  %v947_v50 = vmul.f32 0.2, %v930_v49 }
  0xf9   : > { %v955_v52 = vsel %vm939_vm11, %v930_v49, %v947_v50 }
  0xfa   : > { %963 = vst [vmem:[%s1842_s8 + $0x38] sm:$0xff] %v955_v52  ;;  %v994_v53 = vsel %vm978_vm7, %v955_v52, 0.0 }
  0xfb   : > { %vm1001_vm12 = vcmp.lt.s32.totalorder %v965_v42, 256  ;;  %v1615_v54 = vmov 0.0  }
  0xfc   : > { %1003 = vst.msk [vmem:[%s1924_s6] sm:$0x3] %vm1001_vm12, %v1615_v54 }
  0xfd   : > { %1004 = vst.msk [vmem:[%s1925_s7] sm:$0x3] %vm1001_vm12, %v1615_v54 }
  0xfe PF: > { %v1006_v51 = vadd.f32 %v1856_v47, %v1848_v29  ;;  %v1015_v55 = vadd.f32 %v990_v34, %v988_v18  ;;  %v1037_v56 = vmul.f32 %v1848_v29, %v1848_v29  ;;  %v1038_v57 = vmul.f32 %v988_v18, %v988_v18 }
  0xff   : > { %v1039_v58 = vmul.f32 %v1856_v47, %v1856_v47  ;;  %v1040_v59 = vmul.f32 %v990_v34, %v990_v34  ;;  %v1041_v63 = vmul.f32 %v1864_v61, %v1864_v61  ;;  %v1042_v0 = vmul.f32 %v992_v45, %v992_v45 }
 0x100   : > { %v1007_v60 = vadd.f32 %v1006_v51, %v1864_v61  ;;  %v1016_v62 = vadd.f32 %v1015_v55, %v992_v45  ;;  %v1043_v1 = vmul.f32 %v1868_v10, %v1868_v10  ;;  %v1044_v3 = vmul.f32 %v994_v53, %v994_v53 }
 0x101   : > { %v1045_v4 = vadd.f32 %v1039_v58, %v1037_v56  ;;  %v1054_v30 = vadd.f32 %v1040_v59, %v1038_v57  ;;  %vm1027_vm13 = vcmask 1040384   ;;  %vm1033_vm14 = vcmp.lt.s32.totalorder %v965_v42, 256 }
 0x102   : > { %v1008_v29 = vadd.f32 %v1007_v60, %v1868_v10  ;;  %v1017_v5 = vadd.f32 %v1016_v62, %v994_v53 }
 0x103   : > { %v1046_v6 = vadd.f32 %v1045_v4, %v1041_v63  ;;  %v1055_v7 = vadd.f32 %v1054_v30, %v1042_v0  ;;  %v1005_v28 = vld [vmem:[%s1924_s6] sm:$0x3] }
 0x104   : > { %v1009_v47 = vrot.slane %v1008_v29, 4  ;;  %v1018_v9 = vrot.slane %v1017_v5, 4  ;;  %v1036_v37 = vld [vmem:[%s1925_s7] sm:$0x3] }
 0x105   : > { %v1047_v33 = vadd.f32 %v1046_v6, %v1043_v1  ;;  %v1056_v11 = vadd.f32 %v1055_v7, %v1044_v3 }
 0x106   : > { %v1010_v38 = vadd.f32 %v1009_v47, %v1008_v29  ;;  %v1019_v12 = vadd.f32 %v1018_v9, %v1017_v5 }
 0x107   : > { %v1048_v13 = vrot.slane %v1047_v33, 4  ;;  %v1057_v61 = vrot.slane %v1056_v11, 4 }
 0x108   : > { %v1011_v14 = vrot.slane %v1010_v38, 2  ;;  %v1020_v17 = vrot.slane %v1019_v12, 2 }
 0x109   : > { %v1049_v8 = vadd.f32 %v1048_v13, %v1047_v33  ;;  %v1058_v15 = vadd.f32 %v1057_v61, %v1056_v11 }
 0x10a   : > { %v1012_v16 = vadd.f32 %v1011_v14, %v1010_v38  ;;  %v1021_v18 = vadd.f32 %v1020_v17, %v1019_v12 }
 0x10b   : > { %v1050_v19 = vrot.slane %v1049_v8, 2  ;;  %v1059_v20 = vrot.slane %v1058_v15, 2 }
 0x10c   : > { %v1013_v10 = vrot.slane %v1012_v16, 1  ;;  %v1022_v21 = vrot.slane %v1021_v18, 1 }
 0x10d   : > { %v1051_v23 = vadd.f32 %v1050_v19, %v1049_v8  ;;  %v1060_v24 = vadd.f32 %v1059_v20, %v1058_v15 }
 0x10e   : > { %v1014_v31 = vadd.f32 %v1013_v10, %v1012_v16  ;;  %v1023_v25 = vadd.f32 %v1022_v21, %v1021_v18 }
 0x10f   : > { %v1052_v26 = vrot.slane %v1051_v23, 1  ;;  %v1061_v27 = vrot.slane %v1060_v24, 1 }
 0x110   : > { %v1026_v34 = vrot.slane %v1023_v25, 7 }
 0x111   : > { %v1053_v39 = vadd.f32 %v1052_v26, %v1051_v23  ;;  %v1062_v35 = vadd.f32 %v1061_v27, %v1060_v24 }
 0x112   : > { %v1028_v22 = vsel %vm1027_vm13, %v1014_v31, %v1026_v34 }
 0x113   : > { %v1030_v36 = vadd.f32 %v1028_v22, %v1005_v28  ;;  %v1065_v40 = vrot.slane %v1062_v35, 7 }
 0x115   : > { %1035 = vst.msk [vmem:[%s1924_s6] sm:$0x3] %vm1033_vm14, %v1030_v36  ;;  %v1066_v2 = vsel %vm1027_vm13, %v1053_v39, %v1065_v40 }
 0x116   : > { %v1068_v41 = vadd.f32 %v1066_v2, %v1036_v37 }
 0x118   : > { %1069 = vst.msk [vmem:[%s1925_s7] sm:$0x3] %vm1033_vm14, %v1068_v41 }
 0x119 PF: > { %s20_s24 = sadd.s32 1, %s1609_s24  }
 0x11a   : > { %p17_p8 = scmp.ge.s32.totalorder %s20_s24, 4  }
 0x11c   :  { %19 = sbr.rel (!%p17_p8) target bundleno = 2 (0x2), region = 99 }
 0x121   :  { %1106 = vsyncpa [#allocation3], 1 }
 0x122   :  { %1108 = vsyncpa [#allocation3 + $0x1], 1 }
 0x123   :  { %1109 = vsyncpa [#allocation5], 1 }

// kernel: generator_forward.7
= control target key start
LH: loop header
LB: loop body
LE: loop exit
PB: predicated region body
PF: predicated region fallthrough
CT: control target
= control target key end

     0   :  { %s3999_s18 = smov 0   ;;  %s5831_s0 = inlined_call_operand.vmem [shape: f32[64,512], index: 0, kind: input, shape index: {}]   ;;  %s5832_s1 = inlined_call_operand.vmem [shape: f32[1,512], index: 1, kind: input, shape index: {}]   ;;  %s5833_s2 = inlined_call_operand.vmem [shape: f32[1,512], index: 2, kind: input, shape index: {}]   ;;  %s5834_s3 = inlined_call_operand.vmem [shape: bf16[512,1024], index: 3, kind: input, shape index: {}]   ;;  %s5835_s4 = inlined_call_operand.vmem [shape: f32[1,1024], index: 4, kind: input, shape index: {}]   ;;  %s5836_s5 = inlined_call_operand.vmem [shape: f32[64,1024], index: 5, kind: output, shape index: {}]  }
   0x1 LB: > { %s2593_s19 = sadd.s32 4294967295, %s3967_s18   ;;  %p2597_p0 = scmp.ge.s32.totalorder %s3967_s18, 1  ;;  %s3967_s18 = sphi %s3999_s18, %s15_s18  }
   0x2   : > { %p189_p1 = scmp.lt.s32.totalorder %s3967_s18, 3 }
   0x4   : > { %p190_p2 = pnand %p2597_p0, %p189_p1 }
   0x5   : > { %s2598_s25 = sshll.u32 (!%p190_p2), %s2593_s19, 2 }
   0x6   : > { %193 = sbr.rel (%p190_p2) target bundleno = 493 (0x1ed), region = 40  ;;  %p220_p3 = scmp.lt.s32.totalorder (!%p190_p2), %s2598_s25, 7 }
   0xb   : > { %v2830_v0 = vld [vmem:[%s5834_s3 + $0x1c0] sm:$0xf]  ;;  %s5838_s25 = smov (!%p220_p3, %s2598_s25), 7 }
   0xc   : > { %v3692_v1 = vld [vmem:[%s5834_s3 + $0x1dc] sm:$0xf0]  ;;  %s3630_s27 = sshll.u32 %s5838_s25, 5 }
   0xd   : > { %v3086_v2 = vld [vmem:[%s5834_s3 + $0x3c0] sm:$0xf]  ;;  %v2831_v3 = vor.u32 %v3692_v1, %v2830_v0  ;;  %s4285_s19 = scalar_lea.vmem %s5831_s0, %s3630_s27 }
   0xe   : > { %v3756_v4 = vld [vmem:[%s5834_s3 + $0x3dc] sm:$0xf0] }
   0xf   : > { %v3342_v5 = vld [vmem:[%s5834_s3 + $0x5c0] sm:$0xf]  ;;  %v3087_v7 = vor.u32 %v3756_v4, %v3086_v2  ;;  %1863 = vmatpush.bf16.msra.mxu0 %v2831_v3 }
  0x10   : > { %v3820_v6 = vld [vmem:[%s5834_s3 + $0x5dc] sm:$0xf0] }
  0x11   : > { %v3343_v8 = vor.u32 %v3820_v6, %v3342_v5  ;;  %v3598_v9 = vld [vmem:[%s5834_s3 + $0x7c0] sm:$0xf]  ;;  %1882 = vmatpush.bf16.msra.mxu1 %v3087_v7 }
  0x12   : > { %v3884_v10 = vld [vmem:[%s5834_s3 + $0x7dc] sm:$0xf0] }
  0x13   : > { %v2798_v11 = vld [vmem:[%s5834_s3 + $0x180] sm:$0xf]  ;;  %v3599_v12 = vor.u32 %v3884_v10, %v3598_v9  ;;  %1901 = vmatpush.bf16.msra.mxu2 %v3343_v8 }
  0x14   : > { %v3684_v13 = vld [vmem:[%s5834_s3 + $0x19c] sm:$0xf0] }
  0x15   : > { %v3054_v14 = vld [vmem:[%s5834_s3 + $0x380] sm:$0xf]  ;;  %v2799_v16 = vor.u32 %v3684_v13, %v2798_v11  ;;  %1920 = vmatpush.bf16.msra.mxu3 %v3599_v12 }
  0x16   : > { %v3748_v15 = vld [vmem:[%s5834_s3 + $0x39c] sm:$0xf0] }
  0x17   : > { %v3055_v17 = vor.u32 %v3748_v15, %v3054_v14  ;;  %v3310_v18 = vld [vmem:[%s5834_s3 + $0x580] sm:$0xf]  ;;  %1864 = vmatpush.bf16.msra.mxu0 %v2799_v16 }
  0x18   : > { %v3812_v19 = vld [vmem:[%s5834_s3 + $0x59c] sm:$0xf0] }
  0x19   : > { %v3566_v20 = vld [vmem:[%s5834_s3 + $0x780] sm:$0xf]  ;;  %v3311_v21 = vor.u32 %v3812_v19, %v3310_v18  ;;  %1883 = vmatpush.bf16.msra.mxu1 %v3055_v17 }
  0x1a   : > { %v3876_v22 = vld [vmem:[%s5834_s3 + $0x79c] sm:$0xf0] }
  0x1b   : > { %v2766_v23 = vld [vmem:[%s5834_s3 + $0x140] sm:$0xf]  ;;  %v3567_v25 = vor.u32 %v3876_v22, %v3566_v20  ;;  %1902 = vmatpush.bf16.msra.mxu2 %v3311_v21 }
  0x1c   : > { %v3676_v24 = vld [vmem:[%s5834_s3 + $0x15c] sm:$0xf0] }
  0x1d   : > { %v3022_v26 = vld [vmem:[%s5834_s3 + $0x340] sm:$0xf]  ;;  %v2767_v29 = vor.u32 %v3676_v24, %v2766_v23  ;;  %1921 = vmatpush.bf16.msra.mxu3 %v3567_v25 }
  0x1e   : > { %v3740_v27 = vld [vmem:[%s5834_s3 + $0x35c] sm:$0xf0] }
  0x1f   : > { %v3278_v28 = vld [vmem:[%s5834_s3 + $0x540] sm:$0xf]  ;;  %v3023_v33 = vor.u32 %v3740_v27, %v3022_v26  ;;  %1865 = vmatpush.bf16.msra.mxu0 %v2767_v29 }
  0x20   : > { %v3804_v30 = vld [vmem:[%s5834_s3 + $0x55c] sm:$0xf0] }
  0x21   : > { %v3534_v31 = vld [vmem:[%s5834_s3 + $0x740] sm:$0xf]  ;;  %v3279_v34 = vor.u32 %v3804_v30, %v3278_v28  ;;  %1884 = vmatpush.bf16.msra.mxu1 %v3023_v33  ;;  %v4232_v30 = vld [vmem:[%s5834_s3 + $0x5c4] sm:$0xf] }
  0x22   : > { %v3868_v32 = vld [vmem:[%s5834_s3 + $0x75c] sm:$0xf0] }
  0x23   : > { %v2734_v35 = vld [vmem:[%s5834_s3 + $0x100] sm:$0xf]  ;;  %v3535_v38 = vor.u32 %v3868_v32, %v3534_v31  ;;  %1903 = vmatpush.bf16.msra.mxu2 %v3279_v34  ;;  %v3344_v34 = vld [vmem:[%s5834_s3 + $0x5e0] sm:$0xf0] }
  0x24   : > { %v3668_v36 = vld [vmem:[%s5834_s3 + $0x11c] sm:$0xf0] }
  0x25   : > { %v2990_v37 = vld [vmem:[%s5834_s3 + $0x300] sm:$0xf]  ;;  %v2735_v44 = vor.u32 %v3668_v36, %v2734_v35  ;;  %1922 = vmatpush.bf16.msra.mxu3 %v3535_v38  ;;  %v4244_v35 = vld [vmem:[%s5834_s3 + $0x1c4] sm:$0xf] }
  0x26   : > { %v3732_v39 = vld [vmem:[%s5834_s3 + $0x31c] sm:$0xf0]  ;;  %v4254_v38 = vld [vmem:[%s5834_s3 + $0x3c4] sm:$0xf] }
  0x27   : > { %v3246_v40 = vld [vmem:[%s5834_s3 + $0x500] sm:$0xf]  ;;  %v2991_v45 = vor.u32 %v3732_v39, %v2990_v37  ;;  %1866 = vmatpush.bf16.msra.mxu0 %v2735_v44  ;;  %v4249_v37 = vld [vmem:[%s5834_s3 + $0x1e0] sm:$0xf0] }
  0x28   : > { %v3796_v41 = vld [vmem:[%s5834_s3 + $0x51c] sm:$0xf0]  ;;  %v4259_v39 = vld [vmem:[%s5834_s3 + $0x3e0] sm:$0xf0] }
  0x29   : > { %v3502_v42 = vld [vmem:[%s5834_s3 + $0x700] sm:$0xf]  ;;  %v3247_v46 = vor.u32 %v3796_v41, %v3246_v40  ;;  %1885 = vmatpush.bf16.msra.mxu1 %v2991_v45  ;;  %v4276_v44 = vld [vmem:[%s5834_s3 + $0x7e0] sm:$0xf0] }
  0x2a   : > { %v3860_v43 = vld [vmem:[%s5834_s3 + $0x71c] sm:$0xf0] }
  0x2b   : > { %v2702_v47 = vld [vmem:[%s5834_s3 + $0xc0] sm:$0xf]  ;;  %v3503_v50 = vor.u32 %v3860_v43, %v3502_v42  ;;  %1904 = vmatpush.bf16.msra.mxu2 %v3247_v46  ;;  %v4271_v43 = vld [vmem:[%s5834_s3 + $0x7c4] sm:$0xf] }
  0x2c   : > { %v3660_v48 = vld [vmem:[%s5834_s3 + $0xdc] sm:$0xf0] }
  0x2d   : > { %v2958_v49 = vld [vmem:[%s5834_s3 + $0x2c0] sm:$0xf]  ;;  %v2703_v56 = vor.u32 %v3660_v48, %v2702_v47  ;;  %1923 = vmatpush.bf16.msra.mxu3 %v3503_v50  ;;  %v4299_v50 = vld [vmem:[%s5834_s3 + $0x5a0] sm:$0xf0] }
  0x2e   : > { %v3724_v51 = vld [vmem:[%s5834_s3 + $0x2dc] sm:$0xf0] }
  0x2f   : > { %v3214_v52 = vld [vmem:[%s5834_s3 + $0x4c0] sm:$0xf]  ;;  %v2959_v58 = vor.u32 %v3724_v51, %v2958_v49  ;;  %1867 = vmatpush.bf16.msra.mxu0 %v2703_v56  ;;  %v4294_v49 = vld [vmem:[%s5834_s3 + $0x584] sm:$0xf]  ;;  %v2835_v56 = vor.u32 %v4244_v35, %v4249_v37 }
  0x30   : > { %v3788_v53 = vld [vmem:[%s5834_s3 + $0x4dc] sm:$0xf0]  ;;  %v3024_v37 = vld [vmem:[%s5834_s3 + $0x360] sm:$0xf0] }
  0x31   : > { %v3470_v54 = vld [vmem:[%s5834_s3 + $0x6c0] sm:$0xf]  ;;  %v3215_v59 = vor.u32 %v3788_v53, %v3214_v52  ;;  %1886 = vmatpush.bf16.msra.mxu1 %v2959_v58  ;;  %v234_v53 = vld [vmem:[%s4285_s19 + $0x8] sm:$0xff] }
  0x32   : > { %v3852_v55 = vld [vmem:[%s5834_s3 + $0x6dc] sm:$0xf0] }
  0x33   : > { %v2670_v57 = vld [vmem:[%s5834_s3 + $0x80] sm:$0xf]  ;;  %v3471_v63 = vor.u32 %v3852_v55, %v3470_v54  ;;  %1905 = vmatpush.bf16.msra.mxu2 %v3215_v59  ;;  %v3347_v55 = vor.u32 %v4232_v30, %v3344_v34  ;;  %v3280_v30 = vld [vmem:[%s5834_s3 + $0x560] sm:$0xf0] }
  0x34   : > { %v3652_v60 = vld [vmem:[%s5834_s3 + $0x9c] sm:$0xf0] }
  0x35   : > { %v2926_v61 = vld [vmem:[%s5834_s3 + $0x280] sm:$0xf]  ;;  %v2671_v6 = vor.u32 %v3652_v60, %v2670_v57  ;;  %1924 = vmatpush.bf16.msra.mxu3 %v3471_v63  ;;  %v3091_v57 = vor.u32 %v4254_v38, %v4259_v39  ;;  %v238_v60 = vld [vmem:[%s4285_s19 + $0x28] sm:$0xff]  ;;  %v239_v63 = vld [vmem:[%s4285_s19 + $0x30] sm:$0xff] }
  0x36   : > { %v3716_v62 = vld [vmem:[%s5834_s3 + $0x29c] sm:$0xf0]  ;;  %v3864_v38 = vld [vmem:[%s5834_s3 + $0x744] sm:$0xf] }
  0x37   : > { %v3182_v0 = vld [vmem:[%s5834_s3 + $0x480] sm:$0xf]  ;;  %v2927_v10 = vor.u32 %v3716_v62, %v2926_v61  ;;  %1868 = vmatpush.bf16.msra.mxu0 %v2671_v6  ;;  %v235_v62 = vld [vmem:[%s4285_s19 + $0x10] sm:$0xff]  ;;  %v3315_v6 = vor.u32 %v4294_v49, %v4299_v50  ;;  %v2736_v49 = vld [vmem:[%s5834_s3 + $0x120] sm:$0xf0] }
  0x38   : > { %v3780_v1 = vld [vmem:[%s5834_s3 + $0x49c] sm:$0xf0]  ;;  %v3728_v50 = vld [vmem:[%s5834_s3 + $0x304] sm:$0xf] }
  0x39   : > { %v3438_v2 = vld [vmem:[%s5834_s3 + $0x680] sm:$0xf]  ;;  %v3183_v11 = vor.u32 %v3780_v1, %v3182_v0  ;;  %1887 = vmatpush.bf16.msra.mxu1 %v2927_v10  ;;  %v3603_v0 = vor.u32 %v4271_v43, %v4276_v44  ;;  %v3248_v43 = vld [vmem:[%s5834_s3 + $0x520] sm:$0xf0] }
  0x3a   : > { %v3844_v3 = vld [vmem:[%s5834_s3 + $0x69c] sm:$0xf0] }
  0x3b   : > { %v2638_v4 = vld [vmem:[%s5834_s3 + $0x40] sm:$0xf]  ;;  %v3439_v15 = vor.u32 %v3844_v3, %v3438_v2  ;;  %1906 = vmatpush.bf16.msra.mxu2 %v3183_v11  ;;  %v3680_v11 = vld [vmem:[%s5834_s3 + $0x184] sm:$0xf] }
  0x3c   : > { %v3644_v5 = vld [vmem:[%s5834_s3 + $0x5c] sm:$0xf0] }
  0x3d   : > { %v2894_v7 = vld [vmem:[%s5834_s3 + $0x240] sm:$0xf]  ;;  %v2639_v26 = vor.u32 %v3644_v5, %v2638_v4  ;;  %1925 = vmatpush.bf16.msra.mxu3 %v3439_v15  ;;  %v236_v4 = vld [vmem:[%s4285_s19 + $0x18] sm:$0xff] }
  0x3e   : > { %v3708_v8 = vld [vmem:[%s5834_s3 + $0x25c] sm:$0xf0]  ;;  %v240_v5 = vld [vmem:[%s4285_s19 + $0x38] sm:$0xff] }
  0x3f   : > { %v3150_v9 = vld [vmem:[%s5834_s3 + $0x440] sm:$0xf]  ;;  %v2895_v31 = vor.u32 %v3708_v8, %v2894_v7  ;;  %1869 = vmatpush.bf16.msra.mxu0 %v2639_v26 }
  0x40   : > { %v3772_v12 = vld [vmem:[%s5834_s3 + $0x45c] sm:$0xf0] }
  0x41   : > { %v3406_v13 = vld [vmem:[%s5834_s3 + $0x640] sm:$0xf]  ;;  %v3151_v32 = vor.u32 %v3772_v12, %v3150_v9  ;;  %1888 = vmatpush.bf16.msra.mxu1 %v2895_v31  ;;  %v2800_v12 = vld [vmem:[%s5834_s3 + $0x1a0] sm:$0xf0] }
  0x42   : > { %v3836_v14 = vld [vmem:[%s5834_s3 + $0x65c] sm:$0xf0]  ;;  %v2803_v26 = vor.u32 %v3680_v11, %v2800_v12  ;;  %v3672_v31 = vld [vmem:[%s5834_s3 + $0x144] sm:$0xf] }
  0x43   : > { %v4178_v16 = vld [vmem:[%s5834_s3] sm:$0xf]  ;;  %v3407_v36 = vor.u32 %v3836_v14, %v3406_v13  ;;  %1907 = vmatpush.bf16.msra.mxu2 %v3151_v32  ;;  %v2768_v32 = vld [vmem:[%s5834_s3 + $0x160] sm:$0xf0] }
  0x44   : > { %v4183_v17 = vld [vmem:[%s5834_s3 + $0x1c] sm:$0xf0]  ;;  %v3784_v11 = vld [vmem:[%s5834_s3 + $0x4c4] sm:$0xf] }
  0x45   : > { %v4188_v18 = vld [vmem:[%s5834_s3 + $0x200] sm:$0xf]  ;;  %v2607_v40 = vor.u32 %v4183_v17, %v4178_v16  ;;  %1926 = vmatpush.bf16.msra.mxu3 %v3407_v36  ;;  %v3744_v16 = vld [vmem:[%s5834_s3 + $0x384] sm:$0xf] }
  0x46   : > { %v4193_v19 = vld [vmem:[%s5834_s3 + $0x21c] sm:$0xf0]  ;;  %v3056_v17 = vld [vmem:[%s5834_s3 + $0x3a0] sm:$0xf0] }
  0x47   : > { %v249_v20 = vld [vmem:[%s5832_s1] sm:$0xf]  ;;  %v2863_v41 = vor.u32 %v4193_v19, %v4188_v18  ;;  %1870 = vmatpush.bf16.msra.mxu0 %v2607_v40  ;;  %v3059_v35 = vor.u32 %v3744_v16, %v3056_v17  ;;  %v3736_v36 = vld [vmem:[%s5834_s3 + $0x344] sm:$0xf] }
  0x48   : > { %v4203_v21 = vld [vmem:[%s5834_s3 + $0x400] sm:$0xf]  ;;  %v4223_v27 = vperm.slane %v249_v20, 0  ;;  %v4225_v28 = vperm.slane %v249_v20, 1  ;;  %v4227_v29 = vperm.slane %v249_v20, 2  ;;  %v4289_v48 = vperm.slane %v249_v20, 3 }
  0x49   : > { %v4208_v22 = vld [vmem:[%s5834_s3 + $0x41c] sm:$0xf0]  ;;  %1889 = vmatpush.bf16.msra.mxu1 %v2863_v41  ;;  %v3536_v40 = vld [vmem:[%s5834_s3 + $0x760] sm:$0xf0] }
  0x4a   : > { %v4213_v23 = vld [vmem:[%s5834_s3 + $0x600] sm:$0xf]  ;;  %v3119_v45 = vor.u32 %v4208_v22, %v4203_v21  ;;  %v260_v61 = vmul.f32 %v4225_v28, %v234_v53  ;;  %v264_v1 = vmul.f32 %v4225_v28, %v238_v60  ;;  %v261_v2 = vmul.f32 %v4227_v29, %v235_v62  ;;  %v3872_v21 = vld [vmem:[%s5834_s3 + $0x784] sm:$0xf] }
  0x4b   : > { %v4218_v24 = vld [vmem:[%s5834_s3 + $0x61c] sm:$0xf0]  ;;  %v265_v3 = vmul.f32 %v4227_v29, %v239_v63  ;;  %v262_v10 = vmul.f32 %v4289_v48, %v236_v4  ;;  %v266_v19 = vmul.f32 %v4289_v48, %v240_v5  ;;  %v3568_v22 = vld [vmem:[%s5834_s3 + $0x7a0] sm:$0xf0]  ;;  %1939 = vmatpush.bf16.msrb.mxu0 %v2835_v56  ;;  %v3027_v56 = vor.u32 %v3736_v36, %v3024_v37 }
  0x4c   : > { %v275_v25 = vld [vmem:[%s5833_s2] sm:$0xf]  ;;  %v3375_v46 = vor.u32 %v4218_v24, %v4213_v23  ;;  %1908 = vmatpush.bf16.msra.mxu2 %v3119_v45  ;;  %v3800_v23 = vld [vmem:[%s5834_s3 + $0x544] sm:$0xf]  ;;  %v3571_v39 = vor.u32 %v3872_v21, %v3568_v22  ;;  %v3539_v60 = vor.u32 %v3864_v38, %v3536_v40 }
  0x4d   : > { %v4236_v33 = vperm.slane %v275_v25, 0  ;;  %v4266_v42 = vperm.slane %v275_v25, 1  ;;  %v4287_v47 = vperm.slane %v275_v25, 2  ;;  %v233_v51 = vld [vmem:[%s4285_s19] sm:$0xff]  ;;  %v4304_v54 = vperm.slane %v275_v25, 3  ;;  %1958 = vmatpush.bf16.msrb.mxu1 %v3091_v57 }
  0x4e   : > { %v237_v52 = vld [vmem:[%s4285_s19 + $0x20] sm:$0xff]  ;;  %v259_v58 = vmul.f32 %v4223_v27, %v233_v51  ;;  %1927 = vmatpush.bf16.msra.mxu3 %v3375_v46  ;;  %v3283_v45 = vor.u32 %v3800_v23, %v3280_v30 }
  0x4f   : > { %v263_v59 = vmul.f32 %v4223_v27, %v237_v52  ;;  %v286_v9 = vadd.f32 %v4266_v42, %v260_v61  ;;  %v290_v13 = vadd.f32 %v4266_v42, %v264_v1  ;;  %v287_v14 = vadd.f32 %v4287_v47, %v261_v2  ;;  %v3792_v41 = vld [vmem:[%s5834_s3 + $0x504] sm:$0xf]  ;;  %1940 = vmatpush.bf16.msrb.mxu0 %v2803_v26  ;;  %v247_v1 = vld [vmem:[%s4285_s19 + $0x70] sm:$0xff] }
  0x50   : > { %v285_v7 = vadd.f32 %v4236_v33, %v259_v58  ;;  %v291_v15 = vadd.f32 %v4287_v47, %v265_v3  ;;  %v288_v20 = vadd.f32 %v4304_v54, %v262_v10  ;;  %1977 = vmatpush.bf16.msrb.mxu2 %v3347_v55  ;;  %v292_v34 = vadd.f32 %v4304_v54, %v266_v19  ;;  %v3664_v46 = vld [vmem:[%s5834_s3 + $0x104] sm:$0xf]  ;;  %v242_v58 = vld [vmem:[%s4285_s19 + $0x48] sm:$0xff] }
  0x51   : > { %v289_v8 = vadd.f32 %v4236_v33, %v263_v59  ;;  %v4358_v24 = vpack.c.bf16 %v290_v13, %v286_v9  ;;  %v2992_v51 = vld [vmem:[%s5834_s3 + $0x320] sm:$0xf0]  ;;  %1959 = vmatpush.bf16.msrb.mxu1 %v3059_v35  ;;  %v2771_v55 = vor.u32 %v3672_v31, %v2768_v32  ;;  %v246_v59 = vld [vmem:[%s4285_s19 + $0x68] sm:$0xff]  ;;  %v268_v2 = vmul.f32 %v4225_v28, %v242_v58 }
  0x52   : > { %v4360_v25 = vpack.c.bf16 %v291_v15, %v287_v14  ;;  %1996 = vmatpush.bf16.msrb.mxu3 %v3603_v0  ;;  %v4393_v44 = vpack.c.bf16 %v292_v34, %v288_v20  ;;  %v3856_v52 = vld [vmem:[%s5834_s3 + $0x704] sm:$0xf]  ;;  %v243_v0 = vld [vmem:[%s4285_s19 + $0x50] sm:$0xff]  ;;  %v272_v3 = vmul.f32 %v4225_v28, %v246_v59  ;;  %v273_v5 = vmul.f32 %v4227_v29, %v247_v1 }
  0x53   : > { %v4345_v18 = vpack.c.bf16 %v289_v8, %v285_v7  ;;  %1890 = vmatmul.bf16.vlgmr.msra.gmra.mxu1 %v4358_v24  ;;  %v241_v53 = vld [vmem:[%s4285_s19 + $0x40] sm:$0xff]  ;;  %v269_v4 = vmul.f32 %v4227_v29, %v243_v0  ;;  %v248_v7 = vld [vmem:[%s4285_s19 + $0x78] sm:$0xff]  ;;  %v3251_v8 = vor.u32 %v3792_v41, %v3248_v43  ;;  %1941 = vmatpush.bf16.msrb.mxu0 %v2771_v55 }
  0x54   : > { %1909 = vmatmul.bf16.vlgmr.msra.gmra.mxu2 %v4360_v25  ;;  %v245_v57 = vld [vmem:[%s4285_s19 + $0x60] sm:$0xff]  ;;  %1928 = vmatmul.bf16.vlgmr.msra.gmra.mxu3 %v4393_v44  ;;  %v267_v62 = vmul.f32 %v4223_v27, %v241_v53  ;;  %v2739_v9 = vor.u32 %v3664_v46, %v2736_v49  ;;  %v2995_v10 = vor.u32 %v3728_v50, %v2992_v51 }
  0x55   : > { %1871 = vmatmul.bf16.vlgmr.msra.gmra.mxu0 %v4345_v18  ;;  %1978 = vmatpush.bf16.msrb.mxu2 %v3315_v6  ;;  %v3504_v61 = vld [vmem:[%s5834_s3 + $0x720] sm:$0xf0]  ;;  %v271_v63 = vmul.f32 %v4223_v27, %v245_v57  ;;  %v244_v6 = vld [vmem:[%s4285_s19 + $0x58] sm:$0xff]  ;;  %v274_v15 = vmul.f32 %v4289_v48, %v248_v7  ;;  %v294_v20 = vadd.f32 %v4266_v42, %v268_v2  ;;  %v3350_v7 = vld [vmem:[%s5834_s3 + $0x5c8] sm:$0xf]  ;;  %s3631_s19 = sshll.u32 %s5838_s25, 6 }
  0x56   : > { %1997 = vmatpush.bf16.msrb.mxu3 %v3571_v39  ;;  %1960 = vmatpush.bf16.msrb.mxu1 %v3027_v56  ;;  %v3507_v27 = vor.u32 %v3856_v52, %v3504_v61  ;;  %v3216_v28 = vld [vmem:[%s5834_s3 + $0x4e0] sm:$0xf0]  ;;  %v293_v12 = vadd.f32 %v4236_v33, %v267_v62  ;;  %v270_v14 = vmul.f32 %v4289_v48, %v244_v6  ;;  %s5359_s22 = scalar_lea.vmem %s5836_s5, %s3631_s19 }
  0x57   : > { %v3656_v29 = vld [vmem:[%s5834_s3 + $0xc4] sm:$0xf]  ;;  %v297_v13 = vadd.f32 %v4236_v33, %v271_v63  ;;  %v298_v33 = vadd.f32 %v4266_v42, %v272_v3  ;;  %v295_v21 = vadd.f32 %v4287_v47, %v269_v4  ;;  %v299_v48 = vadd.f32 %v4287_v47, %v273_v5  ;;  %1942 = vmatpush.bf16.msrb.mxu0 %v2739_v9  ;;  %v2838_v9 = vld [vmem:[%s5834_s3 + $0x1c8] sm:$0xf] }
  0x58   : > { %v2704_v16 = vld [vmem:[%s5834_s3 + $0xe0] sm:$0xf0]  ;;  %v3219_v22 = vor.u32 %v3784_v11, %v3216_v28  ;;  %v296_v35 = vadd.f32 %v4304_v54, %v270_v14  ;;  %v300_v36 = vadd.f32 %v4304_v54, %v274_v15  ;;  %v3094_v28 = vld [vmem:[%s5834_s3 + $0x3c8] sm:$0xf] }
  0x59   : > { %1979 = vmatpush.bf16.msrb.mxu2 %v3283_v45  ;;  %v3720_v17 = vld [vmem:[%s5834_s3 + $0x2c4] sm:$0xf]  ;;  %v2707_v30 = vor.u32 %v3656_v29, %v2704_v16  ;;  %v4469_v34 = vpack.c.bf16 %v297_v13, %v293_v12  ;;  %v4482_v40 = vpack.c.bf16 %v298_v33, %v294_v20  ;;  %v4484_v41 = vpack.c.bf16 %v299_v48, %v295_v21  ;;  %v3757_v29 = vld [vmem:[%s5834_s3 + $0x3e4] sm:$0xf0] }
  0x5a   : > { %v2960_v19 = vld [vmem:[%s5834_s3 + $0x2e0] sm:$0xf0]  ;;  %1998 = vmatpush.bf16.msrb.mxu3 %v3539_v60  ;;  %1961 = vmatpush.bf16.msrb.mxu1 %v2995_v10  ;;  %v4502_v55 = vpack.c.bf16 %v300_v36, %v296_v35  ;;  %v3693_v10 = vld [vmem:[%s5834_s3 + $0x1e4] sm:$0xf0]  ;;  %v3095_v33 = vor.u32 %v3757_v29, %v3094_v28 }
  0x5b   : > { %v3848_v23 = vld [vmem:[%s5834_s3 + $0x6c4] sm:$0xf]  ;;  %v2963_v31 = vor.u32 %v3720_v17, %v2960_v19  ;;  %1943 = vmatpush.bf16.msrb.mxu0 %v2707_v30  ;;  %v2839_v17 = vor.u32 %v3693_v10, %v2838_v9  ;;  %v3606_v19 = vld [vmem:[%s5834_s3 + $0x7c8] sm:$0xf] }
  0x5c   : > { %v3472_v26 = vld [vmem:[%s5834_s3 + $0x6e0] sm:$0xf0]  ;;  %v3885_v20 = vld [vmem:[%s5834_s3 + $0x7e4] sm:$0xf0] }
  0x5d   : > { %1980 = vmatpush.bf16.msrb.mxu2 %v3251_v8  ;;  %v3776_v42 = vld [vmem:[%s5834_s3 + $0x484] sm:$0xf]  ;;  %v3475_v43 = vor.u32 %v3848_v23, %v3472_v26  ;;  %v3821_v8 = vld [vmem:[%s5834_s3 + $0x5e4] sm:$0xf0]  ;;  %v3607_v26 = vor.u32 %v3885_v20, %v3606_v19 }
  0x5e   : > { %v3184_v47 = vld [vmem:[%s5834_s3 + $0x4a0] sm:$0xf0]  ;;  %1999 = vmatpush.bf16.msrb.mxu3 %v3507_v27  ;;  %1962 = vmatpush.bf16.msrb.mxu1 %v2963_v31  ;;  %v3351_v16 = vor.u32 %v3821_v8, %v3350_v7  ;;  %v3318_v21 = vld [vmem:[%s5834_s3 + $0x588] sm:$0xf] }
  0x5f   : > { %v3648_v32 = vld [vmem:[%s5834_s3 + $0x84] sm:$0xf]  ;;  %v3187_v54 = vor.u32 %v3776_v42, %v3184_v47  ;;  %v3813_v48 = vld [vmem:[%s5834_s3 + $0x5a4] sm:$0xf0] }
  0x60   : > { %v2672_v37 = vld [vmem:[%s5834_s3 + $0xa0] sm:$0xf0]  ;;  %v2806_v23 = vld [vmem:[%s5834_s3 + $0x188] sm:$0xf]  ;;  %v3319_v47 = vor.u32 %v3813_v48, %v3318_v21 }
  0x61   : > { %v3712_v38 = vld [vmem:[%s5834_s3 + $0x284] sm:$0xf]  ;;  %1981 = vmatpush.bf16.msrb.mxu2 %v3219_v22  ;;  %v2675_v49 = vor.u32 %v3648_v32, %v2672_v37  ;;  %v3685_v30 = vld [vmem:[%s5834_s3 + $0x1a4] sm:$0xf0] }
  0x62   : > { %v2928_v39 = vld [vmem:[%s5834_s3 + $0x2a0] sm:$0xf0]  ;;  %2000 = vmatpush.bf16.msrb.mxu3 %v3475_v43  ;;  %v3062_v31 = vld [vmem:[%s5834_s3 + $0x388] sm:$0xf] }
  0x63   : > { %v3840_v45 = vld [vmem:[%s5834_s3 + $0x684] sm:$0xf]  ;;  %v2931_v50 = vor.u32 %v3712_v38, %v2928_v39  ;;  %1895 = vmatmul.bf16.gmra.mxu1 %v4482_v40  ;;  %1944 = vmatpush.bf16.msrb.mxu0 %v2675_v49  ;;  %v3749_v42 = vld [vmem:[%s5834_s3 + $0x3a4] sm:$0xf0]  ;;  %v2807_v38 = vor.u32 %v3685_v30, %v2806_v23 }
  0x64   : > { %v3440_v46 = vld [vmem:[%s5834_s3 + $0x6a0] sm:$0xf0]  ;;  %1914 = vmatmul.bf16.gmra.mxu2 %v4484_v41  ;;  %1933 = vmatmul.bf16.gmra.mxu3 %v4502_v55  ;;  %v3574_v32 = vld [vmem:[%s5834_s3 + $0x788] sm:$0xf]  ;;  %v3063_v39 = vor.u32 %v3749_v42, %v3062_v31 }
  0x65   : > { %v3768_v51 = vld [vmem:[%s5834_s3 + $0x444] sm:$0xf]  ;;  %1876 = vmatmul.bf16.gmra.mxu0 %v4469_v34  ;;  %1982 = vmatpush.bf16.msrb.mxu2 %v3187_v54  ;;  %v3443_v59 = vor.u32 %v3840_v45, %v3440_v46  ;;  %v3877_v35 = vld [vmem:[%s5834_s3 + $0x7a4] sm:$0xf0] }
  0x66   : > { %v3152_v52 = vld [vmem:[%s5834_s3 + $0x460] sm:$0xf0]  ;;  %1963 = vmatpush.bf16.msrb.mxu1 %v2931_v50  ;;  %v3286_v36 = vld [vmem:[%s5834_s3 + $0x548] sm:$0xf]  ;;  %v3575_v54 = vor.u32 %v3877_v35, %v3574_v32 }
  0x67   : > { %v3640_v53 = vld [vmem:[%s5834_s3 + $0x44] sm:$0xf]  ;;  %v3155_v60 = vor.u32 %v3768_v51, %v3152_v52  ;;  %2001 = vmatpush.bf16.msrb.mxu3 %v3443_v59  ;;  %v3805_v37 = vld [vmem:[%s5834_s3 + $0x564] sm:$0xf0] }
  0x68   : > { %v2640_v56 = vld [vmem:[%s5834_s3 + $0x60] sm:$0xf0]  ;;  %v2774_v43 = vld [vmem:[%s5834_s3 + $0x148] sm:$0xf]  ;;  %v3287_v50 = vor.u32 %v3805_v37, %v3286_v36 }
  0x69   : > { %v3704_v57 = vld [vmem:[%s5834_s3 + $0x244] sm:$0xf]  ;;  %v2643_v0 = vor.u32 %v3640_v53, %v2640_v56  ;;  %1983 = vmatpush.bf16.msrb.mxu2 %v3155_v60  ;;  %v3677_v45 = vld [vmem:[%s5834_s3 + $0x164] sm:$0xf0] }
  0x6a   : > { %v2896_v58 = vld [vmem:[%s5834_s3 + $0x260] sm:$0xf0]  ;;  %v3030_v46 = vld [vmem:[%s5834_s3 + $0x348] sm:$0xf] }
  0x6b   : > { %v3832_v61 = vld [vmem:[%s5834_s3 + $0x644] sm:$0xf]  ;;  %v2899_v1 = vor.u32 %v3704_v57, %v2896_v58  ;;  %1945 = vmatpush.bf16.msrb.mxu0 %v2643_v0  ;;  %v3741_v49 = vld [vmem:[%s5834_s3 + $0x364] sm:$0xf0]  ;;  %v2775_v57 = vor.u32 %v3677_v45, %v2774_v43 }
  0x6c   : > { %v3408_v62 = vld [vmem:[%s5834_s3 + $0x660] sm:$0xf0]  ;;  %v3542_v51 = vld [vmem:[%s5834_s3 + $0x748] sm:$0xf]  ;;  %v3031_v58 = vor.u32 %v3741_v49, %v3030_v46 }
  0x6d   : > { %v3760_v63 = vld [vmem:[%s5834_s3 + $0x404] sm:$0xf]  ;;  %v3411_v27 = vor.u32 %v3832_v61, %v3408_v62  ;;  %1964 = vmatpush.bf16.msrb.mxu1 %v2899_v1  ;;  %v3869_v52 = vld [vmem:[%s5834_s3 + $0x764] sm:$0xf0] }
  0x6e   : > { %v3120_v2 = vld [vmem:[%s5834_s3 + $0x420] sm:$0xf0]  ;;  %v3254_v53 = vld [vmem:[%s5834_s3 + $0x508] sm:$0xf]  ;;  %v3543_v60 = vor.u32 %v3869_v52, %v3542_v51  ;;  %v3817_v52 = vld [vmem:[%s5834_s3 + $0x5cc] sm:$0xf] }
  0x6f   : > { %v3632_v3 = vld [vmem:[%s5834_s3 + $0x4] sm:$0xf]  ;;  %v3123_v11 = vor.u32 %v3760_v63, %v3120_v2  ;;  %2002 = vmatpush.bf16.msrb.mxu3 %v3411_v27  ;;  %v3797_v56 = vld [vmem:[%s5834_s3 + $0x524] sm:$0xf0] }
  0x70   : > { %v2608_v4 = vld [vmem:[%s5834_s3 + $0x20] sm:$0xf0]  ;;  %v2742_v59 = vld [vmem:[%s5834_s3 + $0x108] sm:$0xf]  ;;  %v3255_v0 = vor.u32 %v3797_v56, %v3254_v53  ;;  %v3352_v53 = vld [vmem:[%s5834_s3 + $0x5e8] sm:$0xf0] }
  0x71   : > { %v3696_v5 = vld [vmem:[%s5834_s3 + $0x204] sm:$0xf]  ;;  %v2611_v12 = vor.u32 %v3632_v3, %v2608_v4  ;;  %1984 = vmatpush.bf16.msrb.mxu2 %v3123_v11  ;;  %v3669_v61 = vld [vmem:[%s5834_s3 + $0x124] sm:$0xf0] }
  0x72   : > { %v2864_v6 = vld [vmem:[%s5834_s3 + $0x220] sm:$0xf0]  ;;  %v2998_v62 = vld [vmem:[%s5834_s3 + $0x308] sm:$0xf] }
  0x73   : > { %v2867_v13 = vor.u32 %v3696_v5, %v2864_v6  ;;  %v3824_v14 = vld [vmem:[%s5834_s3 + $0x604] sm:$0xf]  ;;  %1946 = vmatpush.bf16.msrb.mxu0 %v2611_v12  ;;  %v3733_v63 = vld [vmem:[%s5834_s3 + $0x324] sm:$0xf0]  ;;  %v2743_v5 = vor.u32 %v3669_v61, %v2742_v59  ;;  %v3689_v61 = vld [vmem:[%s5834_s3 + $0x1cc] sm:$0xf] }
  0x74   : > { %v3376_v15 = vld [vmem:[%s5834_s3 + $0x620] sm:$0xf0]  ;;  %1985 = vmatmul.bf16.vlgmr.msrb.gmra.mxu2 %v4360_v25  ;;  %v3510_v1 = vld [vmem:[%s5834_s3 + $0x708] sm:$0xf]  ;;  %v2999_v6 = vor.u32 %v3733_v63, %v2998_v62  ;;  %v2840_v62 = vld [vmem:[%s5834_s3 + $0x1e8] sm:$0xf0] }
  0x75   : > { %v3379_v22 = vor.u32 %v3824_v14, %v3376_v15  ;;  %1965 = vmatpush.bf16.msrb.mxu1 %v2867_v13  ;;  %2053 = vmatpush.bf16.msra.mxu2 %v3351_v16  ;;  %v3861_v2 = vld [vmem:[%s5834_s3 + $0x724] sm:$0xf0]  ;;  %v3753_v63 = vld [vmem:[%s5834_s3 + $0x3cc] sm:$0xf] }
  0x76   : > { %1947 = vmatmul.bf16.vlgmr.msrb.gmra.mxu0 %v4345_v18  ;;  %v3222_v3 = vld [vmem:[%s5834_s3 + $0x4c8] sm:$0xf]  ;;  %v3511_v8 = vor.u32 %v3861_v2, %v3510_v1  ;;  %v3096_v1 = vld [vmem:[%s5834_s3 + $0x3e8] sm:$0xf0] }
  0x77   : > { %2015 = vmatpush.bf16.msra.mxu0 %v2839_v17  ;;  %2003 = vmatpush.bf16.msrb.mxu3 %v3379_v22  ;;  %v3789_v4 = vld [vmem:[%s5834_s3 + $0x4e4] sm:$0xf0]  ;;  %v3881_v2 = vld [vmem:[%s5834_s3 + $0x7cc] sm:$0xf] }
  0x78   : > { %1966 = vmatmul.bf16.vlgmr.msrb.gmra.mxu1 %v4358_v24  ;;  %v2710_v7 = vld [vmem:[%s5834_s3 + $0xc8] sm:$0xf]  ;;  %v3223_v11 = vor.u32 %v3789_v4, %v3222_v3  ;;  %v3608_v3 = vld [vmem:[%s5834_s3 + $0x7e8] sm:$0xf0] }
  0x79   : > { %2034 = vmatpush.bf16.msra.mxu1 %v3095_v33  ;;  %2054 = vmatpush.bf16.msra.mxu2 %v3319_v47  ;;  %v3661_v9 = vld [vmem:[%s5834_s3 + $0xe4] sm:$0xf0] }
  0x7a   : > { %2004 = vmatmul.bf16.vlgmr.msrb.gmra.mxu3 %v4393_v44  ;;  %v2966_v10 = vld [vmem:[%s5834_s3 + $0x2c8] sm:$0xf]  ;;  %v2711_v14 = vor.u32 %v3661_v9, %v2710_v7  ;;  %v3320_v7 = vld [vmem:[%s5834_s3 + $0x5a8] sm:$0xf0]  ;;  %v2843_v9 = vor.u32 %v3689_v61, %v2840_v62 }
  0x7b   : > { %2072 = vmatpush.bf16.msra.mxu3 %v3607_v26  ;;  %2016 = vmatpush.bf16.msra.mxu0 %v2807_v38  ;;  %v3725_v27 = vld [vmem:[%s5834_s3 + $0x2e4] sm:$0xf0]  ;;  %v3849_v61 = vld [vmem:[%s5834_s3 + $0x6cc] sm:$0xf] }
  0x7c   : > { %v3478_v28 = vld [vmem:[%s5834_s3 + $0x6c8] sm:$0xf]  ;;  %v2967_v15 = vor.u32 %v3725_v27, %v2966_v10  ;;  %v3099_v10 = vor.u32 %v3753_v63, %v3096_v1  ;;  %v3611_v27 = vor.u32 %v3881_v2, %v3608_v3  ;;  %v3480_v63 = vld [vmem:[%s5834_s3 + $0x6e8] sm:$0xf0] }
  0x7d   : > { %2035 = vmatpush.bf16.msra.mxu1 %v3063_v39  ;;  %2055 = vmatpush.bf16.msra.mxu2 %v3287_v50  ;;  %v3853_v29 = vld [vmem:[%s5834_s3 + $0x6e4] sm:$0xf0]  ;;  %v3192_v1 = vld [vmem:[%s5834_s3 + $0x4a8] sm:$0xf0] }
  0x7e   : > { %v3190_v12 = vld [vmem:[%s5834_s3 + $0x488] sm:$0xf]  ;;  %v3479_v17 = vor.u32 %v3853_v29, %v3478_v28  ;;  %v2808_v28 = vld [vmem:[%s5834_s3 + $0x1a8] sm:$0xf0] }
  0x7f   : > { %2073 = vmatpush.bf16.msra.mxu3 %v3575_v54  ;;  %2017 = vmatpush.bf16.msra.mxu0 %v2775_v57  ;;  %v3781_v13 = vld [vmem:[%s5834_s3 + $0x4a4] sm:$0xf0]  ;;  %v3649_v3 = vld [vmem:[%s5834_s3 + $0x8c] sm:$0xf] }
  0x80   : > { %v2678_v16 = vld [vmem:[%s5834_s3 + $0x88] sm:$0xf]  ;;  %v3191_v21 = vor.u32 %v3781_v13, %v3190_v12  ;;  %v3745_v12 = vld [vmem:[%s5834_s3 + $0x38c] sm:$0xf] }
  0x81   : > { %2036 = vmatpush.bf16.msra.mxu1 %v3031_v58  ;;  %2056 = vmatpush.bf16.msra.mxu2 %v3255_v0  ;;  %v3653_v19 = vld [vmem:[%s5834_s3 + $0xa4] sm:$0xf0]  ;;  %v3355_v0 = vor.u32 %v3817_v52, %v3352_v53  ;;  %v3064_v13 = vld [vmem:[%s5834_s3 + $0x3a8] sm:$0xf0] }
  0x82   : > { %v2934_v20 = vld [vmem:[%s5834_s3 + $0x288] sm:$0xf]  ;;  %v2679_v30 = vor.u32 %v3653_v19, %v2678_v16  ;;  %v3576_v16 = vld [vmem:[%s5834_s3 + $0x7a8] sm:$0xf0] }
  0x83   : > { %2074 = vmatpush.bf16.msra.mxu3 %v3543_v60  ;;  %2018 = vmatpush.bf16.msra.mxu0 %v2743_v5  ;;  %v3717_v33 = vld [vmem:[%s5834_s3 + $0x2a4] sm:$0xf0]  ;;  %v3288_v19 = vld [vmem:[%s5834_s3 + $0x568] sm:$0xf0] }
  0x84   : > { %v3446_v48 = vld [vmem:[%s5834_s3 + $0x688] sm:$0xf]  ;;  %v2935_v31 = vor.u32 %v3717_v33, %v2934_v20  ;;  %1990 = vmatmul.bf16.gmra.mxu2 %v4484_v41  ;;  %v3067_v20 = vor.u32 %v3745_v12, %v3064_v13  ;;  %v3673_v33 = vld [vmem:[%s5834_s3 + $0x14c] sm:$0xf] }
  0x85   : > { %2037 = vmatpush.bf16.msra.mxu1 %v2999_v6  ;;  %2057 = vmatpush.bf16.msra.mxu2 %v3223_v11  ;;  %v3845_v22 = vld [vmem:[%s5834_s3 + $0x6a4] sm:$0xf0]  ;;  %v3809_v6 = vld [vmem:[%s5834_s3 + $0x58c] sm:$0xf] }
  0x86   : > { %v3158_v23 = vld [vmem:[%s5834_s3 + $0x448] sm:$0xf]  ;;  %v3447_v47 = vor.u32 %v3845_v22, %v3446_v48  ;;  %1952 = vmatmul.bf16.gmra.mxu0 %v4469_v34  ;;  %v3681_v11 = vld [vmem:[%s5834_s3 + $0x18c] sm:$0xf]  ;;  %v3323_v29 = vor.u32 %v3809_v6, %v3320_v7  ;;  %v3483_v7 = vor.u32 %v3849_v61, %v3480_v63  ;;  %v3070_v61 = vld [vmem:[%s5834_s3 + $0x390] sm:$0xf] }
  0x87   : > { %2075 = vmatpush.bf16.msra.mxu3 %v3511_v8  ;;  %v3773_v26 = vld [vmem:[%s5834_s3 + $0x464] sm:$0xf0]  ;;  %2019 = vmatpush.bf16.msra.mxu0 %v2711_v14  ;;  %v3873_v14 = vld [vmem:[%s5834_s3 + $0x78c] sm:$0xf] }
  0x88   : > { %v2646_v42 = vld [vmem:[%s5834_s3 + $0x48] sm:$0xf]  ;;  %v3159_v37 = vor.u32 %v3773_v26, %v3158_v23  ;;  %1971 = vmatmul.bf16.gmra.mxu1 %v4482_v40  ;;  %v3737_v48 = vld [vmem:[%s5834_s3 + $0x34c] sm:$0xf]  ;;  %v3579_v23 = vor.u32 %v3873_v14, %v3576_v16 }
  0x89   : > { %2038 = vmatpush.bf16.msra.mxu1 %v2967_v15  ;;  %v3645_v32 = vld [vmem:[%s5834_s3 + $0x64] sm:$0xf0]  ;;  %2058 = vmatpush.bf16.msra.mxu2 %v3191_v21  ;;  %v2811_v15 = vor.u32 %v3681_v11, %v2808_v28  ;;  %v2776_v21 = vld [vmem:[%s5834_s3 + $0x168] sm:$0xf0] }
  0x8a   : > { %v2902_v35 = vld [vmem:[%s5834_s3 + $0x248] sm:$0xf]  ;;  %v2647_v49 = vor.u32 %v3645_v32, %v2646_v42  ;;  %2009 = vmatmul.bf16.gmra.mxu3 %v4502_v55  ;;  %v3032_v22 = vld [vmem:[%s5834_s3 + $0x368] sm:$0xf0] }
  0x8b   : > { %2076 = vmatpush.bf16.msra.mxu3 %v3479_v17  ;;  %v3709_v36 = vld [vmem:[%s5834_s3 + $0x264] sm:$0xf0]  ;;  %2020 = vmatpush.bf16.msra.mxu0 %v2679_v30  ;;  %v3801_v17 = vld [vmem:[%s5834_s3 + $0x54c] sm:$0xf] }
  0x8c   : > { %v3414_v38 = vld [vmem:[%s5834_s3 + $0x648] sm:$0xf]  ;;  %v2903_v50 = vor.u32 %v3709_v36, %v2902_v35  ;;  %v3291_v26 = vor.u32 %v3801_v17, %v3288_v19  ;;  %v3865_v30 = vld [vmem:[%s5834_s3 + $0x74c] sm:$0xf]  ;;  %v3035_v35 = vor.u32 %v3737_v48, %v3032_v22 }
  0x8d   : > { %v3837_v39 = vld [vmem:[%s5834_s3 + $0x664] sm:$0xf0]  ;;  %2039 = vmatpush.bf16.msra.mxu1 %v2935_v31  ;;  %2059 = vmatpush.bf16.msra.mxu2 %v3159_v37  ;;  %v2779_v31 = vor.u32 %v3673_v33, %v2776_v21  ;;  %v3544_v42 = vld [vmem:[%s5834_s3 + $0x768] sm:$0xf0] }
  0x8e   : > { %v3126_v43 = vld [vmem:[%s5834_s3 + $0x408] sm:$0xf]  ;;  %v3415_v56 = vor.u32 %v3837_v39, %v3414_v38  ;;  %v3256_v32 = vld [vmem:[%s5834_s3 + $0x528] sm:$0xf0] }
  0x8f   : > { %v3765_v54 = vld [vmem:[%s5834_s3 + $0x424] sm:$0xf0]  ;;  %2077 = vmatpush.bf16.msra.mxu3 %v3447_v47  ;;  %2021 = vmatpush.bf16.msra.mxu0 %v2647_v49  ;;  %v3793_v47 = vld [vmem:[%s5834_s3 + $0x50c] sm:$0xf] }
  0x90   : > { %v2614_v45 = vld [vmem:[%s5834_s3 + $0x8] sm:$0xf]  ;;  %v3127_v60 = vor.u32 %v3765_v54, %v3126_v43  ;;  %v3665_v36 = vld [vmem:[%s5834_s3 + $0x10c] sm:$0xf]  ;;  %v3547_v43 = vor.u32 %v3865_v30, %v3544_v42  ;;  %v3259_v54 = vor.u32 %v3793_v47, %v3256_v32  ;;  %v3822_v42 = vld [vmem:[%s5834_s3 + $0x5ec] sm:$0xf0] }
  0x91   : > { %v3637_v46 = vld [vmem:[%s5834_s3 + $0x24] sm:$0xf0]  ;;  %2040 = vmatpush.bf16.msra.mxu1 %v2903_v50  ;;  %v2744_v37 = vld [vmem:[%s5834_s3 + $0x128] sm:$0xf0]  ;;  %v2846_v32 = vld [vmem:[%s5834_s3 + $0x1d0] sm:$0xf] }
  0x92   : > { %v2870_v51 = vld [vmem:[%s5834_s3 + $0x208] sm:$0xf]  ;;  %v2615_v4 = vor.u32 %v3637_v46, %v2614_v45  ;;  %2060 = vmatpush.bf16.msra.mxu2 %v3127_v60  ;;  %v3729_v38 = vld [vmem:[%s5834_s3 + $0x30c] sm:$0xf]  ;;  %v2747_v46 = vor.u32 %v3665_v36, %v2744_v37 }
  0x93   : > { %v3701_v57 = vld [vmem:[%s5834_s3 + $0x224] sm:$0xf0]  ;;  %2078 = vmatpush.bf16.msra.mxu3 %v3415_v56  ;;  %v3000_v39 = vld [vmem:[%s5834_s3 + $0x328] sm:$0xf0] }
  0x94   : > { %v3382_v58 = vld [vmem:[%s5834_s3 + $0x608] sm:$0xf]  ;;  %v2871_v5 = vor.u32 %v3701_v57, %v2870_v51  ;;  %2022 = vmatpush.bf16.msra.mxu0 %v2615_v4  ;;  %v3857_v45 = vld [vmem:[%s5834_s3 + $0x70c] sm:$0xf]  ;;  %v3003_v52 = vor.u32 %v3729_v38, %v3000_v39  ;;  %v3102_v38 = vld [vmem:[%s5834_s3 + $0x3d0] sm:$0xf] }
  0x95   : > { %v3829_v59 = vld [vmem:[%s5834_s3 + $0x624] sm:$0xf0]  ;;  %2061 = vmatmul.bf16.vlgmr.msra.gmra.mxu2 %v4360_v25  ;;  %v3512_v49 = vld [vmem:[%s5834_s3 + $0x728] sm:$0xf0]  ;;  %v3758_v39 = vld [vmem:[%s5834_s3 + $0x3ec] sm:$0xf0] }
  0x96   : > { %v3383_v8 = vor.u32 %v3829_v59, %v3382_v58  ;;  %2129 = vmatpush.bf16.msrb.mxu2 %v3355_v0  ;;  %2041 = vmatpush.bf16.msra.mxu1 %v2871_v5  ;;  %v3785_v50 = vld [vmem:[%s5834_s3 + $0x4cc] sm:$0xf]  ;;  %v3515_v59 = vor.u32 %v3857_v45, %v3512_v49  ;;  %v3614_v49 = vld [vmem:[%s5834_s3 + $0x7d0] sm:$0xf] }
  0x97   : > { %2023 = vmatmul.bf16.vlgmr.msra.gmra.mxu0 %v4345_v18  ;;  %v3224_v51 = vld [vmem:[%s5834_s3 + $0x4e8] sm:$0xf0] }
  0x98   : > { %2079 = vmatpush.bf16.msra.mxu3 %v3383_v8  ;;  %2091 = vmatpush.bf16.msrb.mxu0 %v2843_v9  ;;  %v3657_v53 = vld [vmem:[%s5834_s3 + $0xcc] sm:$0xf]  ;;  %v3227_v60 = vor.u32 %v3785_v50, %v3224_v51 }
  0x99   : > { %2042 = vmatmul.bf16.vlgmr.msra.gmra.mxu1 %v4358_v24  ;;  %v2712_v56 = vld [vmem:[%s5834_s3 + $0xe8] sm:$0xf0] }
  0x9a   : > { %2110 = vmatpush.bf16.msrb.mxu1 %v3099_v10  ;;  %2130 = vmatpush.bf16.msrb.mxu2 %v3323_v29  ;;  %v3721_v57 = vld [vmem:[%s5834_s3 + $0x2cc] sm:$0xf]  ;;  %v2715_v62 = vor.u32 %v3657_v53, %v2712_v56  ;;  %v3326_v53 = vld [vmem:[%s5834_s3 + $0x590] sm:$0xf] }
  0x9b   : > { %2080 = vmatmul.bf16.vlgmr.msra.gmra.mxu3 %v4393_v44  ;;  %v2968_v58 = vld [vmem:[%s5834_s3 + $0x2e8] sm:$0xf0]  ;;  %v3814_v56 = vld [vmem:[%s5834_s3 + $0x5ac] sm:$0xf0] }
  0x9c   : > { %2148 = vmatpush.bf16.msrb.mxu3 %v3611_v27  ;;  %2092 = vmatpush.bf16.msrb.mxu0 %v2811_v15  ;;  %v3777_v0 = vld [vmem:[%s5834_s3 + $0x48c] sm:$0xf]  ;;  %v2971_v2 = vor.u32 %v3721_v57, %v2968_v58  ;;  %v3103_v57 = vor.u32 %v3758_v39, %v3102_v38  ;;  %v2814_v58 = vld [vmem:[%s5834_s3 + $0x190] sm:$0xf] }
  0x9d   : > { %v2680_v4 = vld [vmem:[%s5834_s3 + $0xa8] sm:$0xf0]  ;;  %v3195_v8 = vor.u32 %v3777_v0, %v3192_v1  ;;  %v3327_v0 = vor.u32 %v3814_v56, %v3326_v53  ;;  %v3582_v1 = vld [vmem:[%s5834_s3 + $0x790] sm:$0xf] }
  0x9e   : > { %2111 = vmatpush.bf16.msrb.mxu1 %v3067_v20  ;;  %2131 = vmatpush.bf16.msrb.mxu2 %v3291_v26  ;;  %v3713_v5 = vld [vmem:[%s5834_s3 + $0x28c] sm:$0xf]  ;;  %v2683_v10 = vor.u32 %v3649_v3, %v2680_v4  ;;  %v3878_v3 = vld [vmem:[%s5834_s3 + $0x7ac] sm:$0xf0] }
  0x9f   : > { %v2936_v6 = vld [vmem:[%s5834_s3 + $0x2a8] sm:$0xf0]  ;;  %v3294_v4 = vld [vmem:[%s5834_s3 + $0x550] sm:$0xf] }
  0xa0   : > { %2149 = vmatpush.bf16.msrb.mxu3 %v3579_v23  ;;  %2093 = vmatpush.bf16.msrb.mxu0 %v2779_v31  ;;  %v3841_v9 = vld [vmem:[%s5834_s3 + $0x68c] sm:$0xf]  ;;  %v2939_v29 = vor.u32 %v3713_v5, %v2936_v6  ;;  %v3358_v31 = vld [vmem:[%s5834_s3 + $0x5d0] sm:$0xf] }
  0xa1   : > { %v3448_v27 = vld [vmem:[%s5834_s3 + $0x6a8] sm:$0xf0]  ;;  %v3806_v5 = vld [vmem:[%s5834_s3 + $0x56c] sm:$0xf0] }
  0xa2   : > { %2112 = vmatpush.bf16.msrb.mxu1 %v3035_v35  ;;  %2132 = vmatpush.bf16.msrb.mxu2 %v3259_v54  ;;  %v3769_v11 = vld [vmem:[%s5834_s3 + $0x44c] sm:$0xf]  ;;  %v3451_v16 = vor.u32 %v3841_v9, %v3448_v27  ;;  %v3694_v35 = vld [vmem:[%s5834_s3 + $0x1ec] sm:$0xf0]  ;;  %v3583_v9 = vor.u32 %v3878_v3, %v3582_v1 }
  0xa3   : > { %v3160_v28 = vld [vmem:[%s5834_s3 + $0x468] sm:$0xf0]  ;;  %v2847_v51 = vor.u32 %v3694_v35, %v2846_v32  ;;  %v3038_v27 = vld [vmem:[%s5834_s3 + $0x350] sm:$0xf] }
  0xa4   : > { %2150 = vmatpush.bf16.msrb.mxu3 %v3547_v43  ;;  %2094 = vmatpush.bf16.msrb.mxu0 %v2747_v46  ;;  %v3641_v12 = vld [vmem:[%s5834_s3 + $0x4c] sm:$0xf]  ;;  %v3163_v17 = vor.u32 %v3769_v11, %v3160_v28  ;;  %v3359_v46 = vor.u32 %v3822_v42, %v3358_v31  ;;  %v3742_v11 = vld [vmem:[%s5834_s3 + $0x36c] sm:$0xf0] }
  0xa5   : > { %v2648_v13 = vld [vmem:[%s5834_s3 + $0x68] sm:$0xf0]  ;;  %2066 = vmatmul.bf16.gmra.mxu2 %v4484_v41  ;;  %v3550_v28 = vld [vmem:[%s5834_s3 + $0x750] sm:$0xf] }
  0xa6   : > { %2113 = vmatpush.bf16.msrb.mxu1 %v3003_v52  ;;  %2133 = vmatpush.bf16.msrb.mxu2 %v3227_v60  ;;  %v3705_v14 = vld [vmem:[%s5834_s3 + $0x24c] sm:$0xf]  ;;  %v2651_v21 = vor.u32 %v3641_v12, %v2648_v13  ;;  %v3886_v52 = vld [vmem:[%s5834_s3 + $0x7ec] sm:$0xf0] }
  0xa7   : > { %v2904_v15 = vld [vmem:[%s5834_s3 + $0x268] sm:$0xf0]  ;;  %2028 = vmatmul.bf16.gmra.mxu0 %v4469_v34  ;;  %v3615_v63 = vor.u32 %v3886_v52, %v3614_v49  ;;  %v3262_v12 = vld [vmem:[%s5834_s3 + $0x510] sm:$0xf] }
  0xa8   : > { %2151 = vmatpush.bf16.msrb.mxu3 %v3515_v59  ;;  %2095 = vmatpush.bf16.msrb.mxu0 %v2715_v62  ;;  %v3833_v19 = vld [vmem:[%s5834_s3 + $0x64c] sm:$0xf]  ;;  %v2907_v26 = vor.u32 %v3705_v14, %v2904_v15  ;;  %v3686_v59 = vld [vmem:[%s5834_s3 + $0x1ac] sm:$0xf0]  ;;  %v3039_v15 = vor.u32 %v3742_v11, %v3038_v27 }
  0xa9   : > { %v3416_v20 = vld [vmem:[%s5834_s3 + $0x668] sm:$0xf0]  ;;  %2047 = vmatmul.bf16.gmra.mxu1 %v4482_v40  ;;  %v3750_v62 = vld [vmem:[%s5834_s3 + $0x3ac] sm:$0xf0] }
  0xaa   : > { %2114 = vmatpush.bf16.msrb.mxu1 %v2971_v2  ;;  %2134 = vmatpush.bf16.msrb.mxu2 %v3195_v8  ;;  %v3761_v33 = vld [vmem:[%s5834_s3 + $0x40c] sm:$0xf]  ;;  %v3419_v36 = vor.u32 %v3833_v19, %v3416_v20  ;;  %v2815_v2 = vor.u32 %v3686_v59, %v2814_v58  ;;  %v3071_v6 = vor.u32 %v3750_v62, %v3070_v61  ;;  %v3678_v8 = vld [vmem:[%s5834_s3 + $0x16c] sm:$0xf0] }
  0xab   : > { %v3128_v48 = vld [vmem:[%s5834_s3 + $0x428] sm:$0xf0]  ;;  %2085 = vmatmul.bf16.gmra.mxu3 %v4502_v55  ;;  %v3798_v13 = vld [vmem:[%s5834_s3 + $0x52c] sm:$0xf0] }
  0xac   : > { %2152 = vmatpush.bf16.msrb.mxu3 %v3483_v7  ;;  %2096 = vmatpush.bf16.msrb.mxu0 %v2683_v10  ;;  %v3633_v22 = vld [vmem:[%s5834_s3 + $0xc] sm:$0xf]  ;;  %v3131_v37 = vor.u32 %v3761_v33, %v3128_v48  ;;  %v2782_v7 = vld [vmem:[%s5834_s3 + $0x150] sm:$0xf]  ;;  %v3295_v10 = vor.u32 %v3806_v5, %v3294_v4  ;;  %v3263_v20 = vor.u32 %v3798_v13, %v3262_v12 }
  0xad   : > { %v2616_v23 = vld [vmem:[%s5834_s3 + $0x28] sm:$0xf0]  ;;  %v2783_v14 = vor.u32 %v3678_v8, %v2782_v7  ;;  %v3006_v33 = vld [vmem:[%s5834_s3 + $0x310] sm:$0xf] }
  0xae   : > { %2115 = vmatpush.bf16.msrb.mxu1 %v2939_v29  ;;  %v3697_v30 = vld [vmem:[%s5834_s3 + $0x20c] sm:$0xf]  ;;  %2135 = vmatpush.bf16.msrb.mxu2 %v3163_v17  ;;  %v2619_v43 = vor.u32 %v3633_v22, %v2616_v23  ;;  %v3870_v29 = vld [vmem:[%s5834_s3 + $0x76c] sm:$0xf0] }
  0xaf   : > { %v2872_v47 = vld [vmem:[%s5834_s3 + $0x228] sm:$0xf0]  ;;  %v3670_v17 = vld [vmem:[%s5834_s3 + $0x12c] sm:$0xf0]  ;;  %v3551_v19 = vor.u32 %v3870_v29, %v3550_v28 }
  0xb0   : > { %2153 = vmatpush.bf16.msrb.mxu3 %v3451_v16  ;;  %2097 = vmatpush.bf16.msrb.mxu0 %v2651_v21  ;;  %v3825_v54 = vld [vmem:[%s5834_s3 + $0x60c] sm:$0xf]  ;;  %v2875_v50 = vor.u32 %v3697_v30, %v2872_v47  ;;  %v2750_v16 = vld [vmem:[%s5834_s3 + $0x110] sm:$0xf] }
  0xb1   : > { %v3384_v45 = vld [vmem:[%s5834_s3 + $0x628] sm:$0xf0]  ;;  %v3734_v21 = vld [vmem:[%s5834_s3 + $0x32c] sm:$0xf0]  ;;  %v2751_v30 = vor.u32 %v3670_v17, %v2750_v16 }
  0xb2   : > { %2116 = vmatpush.bf16.msrb.mxu1 %v2907_v26  ;;  %2136 = vmatpush.bf16.msrb.mxu2 %v3131_v37  ;;  %v3387_v60 = vor.u32 %v3825_v54, %v3384_v45  ;;  %v3518_v48 = vld [vmem:[%s5834_s3 + $0x710] sm:$0xf]  ;;  %v3007_v31 = vor.u32 %v3734_v21, %v3006_v33  ;;  %v2848_v33 = vld [vmem:[%s5834_s3 + $0x1f0] sm:$0xf0] }
  0xb3   : > { %v3862_v22 = vld [vmem:[%s5834_s3 + $0x72c] sm:$0xf0]  ;;  %v3754_v21 = vld [vmem:[%s5834_s3 + $0x3d4] sm:$0xf] }
  0xb4   : > { %2154 = vmatpush.bf16.msrb.mxu3 %v3419_v36  ;;  %2098 = vmatpush.bf16.msrb.mxu0 %v2619_v43  ;;  %v3230_v23 = vld [vmem:[%s5834_s3 + $0x4d0] sm:$0xf]  ;;  %v3519_v32 = vor.u32 %v3862_v22, %v3518_v48  ;;  %v3104_v48 = vld [vmem:[%s5834_s3 + $0x3f0] sm:$0xf0] }
  0xb5   : > { %v3790_v26 = vld [vmem:[%s5834_s3 + $0x4ec] sm:$0xf0]  ;;  %2137 = vmatmul.bf16.vlgmr.msrb.gmra.mxu2 %v4360_v25  ;;  %v3882_v22 = vld [vmem:[%s5834_s3 + $0x7d4] sm:$0xf] }
  0xb6   : > { %2205 = vmatpush.bf16.msra.mxu2 %v3359_v46  ;;  %2117 = vmatpush.bf16.msrb.mxu1 %v2875_v50  ;;  %v2718_v42 = vld [vmem:[%s5834_s3 + $0xd0] sm:$0xf]  ;;  %v3231_v35 = vor.u32 %v3790_v26, %v3230_v23  ;;  %v3616_v23 = vld [vmem:[%s5834_s3 + $0x7f0] sm:$0xf0] }
  0xb7   : > { %2099 = vmatmul.bf16.vlgmr.msrb.gmra.mxu0 %v4345_v18  ;;  %v3662_v47 = vld [vmem:[%s5834_s3 + $0xec] sm:$0xf0] }
  0xb8   : > { %2167 = vmatpush.bf16.msra.mxu0 %v2847_v51  ;;  %2155 = vmatpush.bf16.msrb.mxu3 %v3387_v60  ;;  %v2974_v36 = vld [vmem:[%s5834_s3 + $0x2d0] sm:$0xf]  ;;  %v2719_v45 = vor.u32 %v3662_v47, %v2718_v42  ;;  %v3328_v42 = vld [vmem:[%s5834_s3 + $0x5b0] sm:$0xf0] }
  0xb9   : > { %2118 = vmatmul.bf16.vlgmr.msrb.gmra.mxu1 %v4358_v24  ;;  %v3726_v37 = vld [vmem:[%s5834_s3 + $0x2ec] sm:$0xf0] }
  0xba   : > { %2186 = vmatpush.bf16.msra.mxu1 %v3103_v57  ;;  %2206 = vmatpush.bf16.msra.mxu2 %v3327_v0  ;;  %v3486_v38 = vld [vmem:[%s5834_s3 + $0x6d0] sm:$0xf]  ;;  %v2975_v46 = vor.u32 %v3726_v37, %v2974_v36  ;;  %v3619_v36 = vor.u32 %v3882_v22, %v3616_v23  ;;  %v3682_v37 = vld [vmem:[%s5834_s3 + $0x194] sm:$0xf] }
  0xbb   : > { %2156 = vmatmul.bf16.vlgmr.msrb.gmra.mxu3 %v4393_v44  ;;  %v3854_v39 = vld [vmem:[%s5834_s3 + $0x6ec] sm:$0xf0]  ;;  %v3850_v23 = vld [vmem:[%s5834_s3 + $0x6d4] sm:$0xf] }
  0xbc   : > { %2224 = vmatpush.bf16.msra.mxu3 %v3615_v63  ;;  %2168 = vmatpush.bf16.msra.mxu0 %v2815_v2  ;;  %v3198_v43 = vld [vmem:[%s5834_s3 + $0x490] sm:$0xf]  ;;  %v3487_v51 = vor.u32 %v3854_v39, %v3486_v38  ;;  %v2816_v38 = vld [vmem:[%s5834_s3 + $0x1b0] sm:$0xf0] }
  0xbd   : > { %v3782_v54 = vld [vmem:[%s5834_s3 + $0x4ac] sm:$0xf0]  ;;  %v3746_v39 = vld [vmem:[%s5834_s3 + $0x394] sm:$0xf] }
  0xbe   : > { %2187 = vmatpush.bf16.msra.mxu1 %v3071_v6  ;;  %2207 = vmatpush.bf16.msra.mxu2 %v3295_v10  ;;  %v2686_v49 = vld [vmem:[%s5834_s3 + $0x90] sm:$0xf]  ;;  %v3199_v52 = vor.u32 %v3782_v54, %v3198_v43  ;;  %v3360_v10 = vld [vmem:[%s5834_s3 + $0x5f0] sm:$0xf0] }
  0xbf   : > { %v3654_v50 = vld [vmem:[%s5834_s3 + $0xac] sm:$0xf0]  ;;  %v3072_v54 = vld [vmem:[%s5834_s3 + $0x3b0] sm:$0xf0] }
  0xc0   : > { %2225 = vmatpush.bf16.msra.mxu3 %v3583_v9  ;;  %2169 = vmatpush.bf16.msra.mxu0 %v2783_v14  ;;  %v2942_v53 = vld [vmem:[%s5834_s3 + $0x290] sm:$0xf]  ;;  %v2687_v61 = vor.u32 %v3654_v50, %v2686_v49  ;;  %v3818_v9 = vld [vmem:[%s5834_s3 + $0x5d4] sm:$0xf] }
  0xc1   : > { %v3718_v56 = vld [vmem:[%s5834_s3 + $0x2ac] sm:$0xf0]  ;;  %v3802_v49 = vld [vmem:[%s5834_s3 + $0x554] sm:$0xf] }
  0xc2   : > { %2188 = vmatpush.bf16.msra.mxu1 %v3039_v15  ;;  %2208 = vmatpush.bf16.msra.mxu2 %v3263_v20  ;;  %v3454_v57 = vld [vmem:[%s5834_s3 + $0x690] sm:$0xf]  ;;  %v2943_v62 = vor.u32 %v3718_v56, %v2942_v53  ;;  %v3690_v20 = vld [vmem:[%s5834_s3 + $0x1d4] sm:$0xf]  ;;  %v3075_v53 = vor.u32 %v3746_v39, %v3072_v54 }
  0xc3   : > { %v3846_v58 = vld [vmem:[%s5834_s3 + $0x6ac] sm:$0xf0]  ;;  %v3296_v50 = vld [vmem:[%s5834_s3 + $0x570] sm:$0xf0] }
  0xc4   : > { %2226 = vmatpush.bf16.msra.mxu3 %v3551_v19  ;;  %2170 = vmatpush.bf16.msra.mxu0 %v2751_v30  ;;  %v3166_v59 = vld [vmem:[%s5834_s3 + $0x450] sm:$0xf]  ;;  %v3455_v1 = vor.u32 %v3846_v58, %v3454_v57  ;;  %v3363_v19 = vor.u32 %v3818_v9, %v3360_v10  ;;  %v3674_v57 = vld [vmem:[%s5834_s3 + $0x154] sm:$0xf] }
  0xc5   : > { %v3774_v60 = vld [vmem:[%s5834_s3 + $0x46c] sm:$0xf0]  ;;  %2142 = vmatmul.bf16.gmra.mxu2 %v4484_v41  ;;  %v2784_v58 = vld [vmem:[%s5834_s3 + $0x170] sm:$0xf0] }
  0xc6   : > { %2189 = vmatpush.bf16.msra.mxu1 %v3007_v31  ;;  %2209 = vmatpush.bf16.msra.mxu2 %v3231_v35  ;;  %v2654_v63 = vld [vmem:[%s5834_s3 + $0x50] sm:$0xf]  ;;  %v3167_v2 = vor.u32 %v3774_v60, %v3166_v59  ;;  %v3810_v31 = vld [vmem:[%s5834_s3 + $0x594] sm:$0xf]  ;;  %v3107_v35 = vor.u32 %v3754_v21, %v3104_v48  ;;  %v3299_v59 = vor.u32 %v3802_v49, %v3296_v50 }
  0xc7   : > { %v3646_v0 = vld [vmem:[%s5834_s3 + $0x6c] sm:$0xf0]  ;;  %2104 = vmatmul.bf16.gmra.mxu0 %v4469_v34  ;;  %v3331_v43 = vor.u32 %v3810_v31, %v3328_v42  ;;  %v3738_v60 = vld [vmem:[%s5834_s3 + $0x354] sm:$0xf] }
  0xc8   : > { %2227 = vmatpush.bf16.msra.mxu3 %v3519_v32  ;;  %2171 = vmatpush.bf16.msra.mxu0 %v2719_v45  ;;  %v2910_v3 = vld [vmem:[%s5834_s3 + $0x250] sm:$0xf]  ;;  %v2655_v27 = vor.u32 %v3646_v0, %v2654_v63  ;;  %v2851_v32 = vor.u32 %v3690_v20, %v2848_v33  ;;  %v3874_v45 = vld [vmem:[%s5834_s3 + $0x794] sm:$0xf]  ;;  %v2787_v0 = vor.u32 %v3674_v57, %v2784_v58 }
  0xc9   : > { %v3710_v4 = vld [vmem:[%s5834_s3 + $0x26c] sm:$0xf0]  ;;  %2123 = vmatmul.bf16.gmra.mxu1 %v4482_v40  ;;  %v3866_v63 = vld [vmem:[%s5834_s3 + $0x754] sm:$0xf] }
  0xca   : > { %2190 = vmatpush.bf16.msra.mxu1 %v2975_v46  ;;  %2210 = vmatpush.bf16.msra.mxu2 %v3199_v52  ;;  %v3422_v5 = vld [vmem:[%s5834_s3 + $0x650] sm:$0xf]  ;;  %v2911_v11 = vor.u32 %v3710_v4, %v2910_v3  ;;  %v3584_v46 = vld [vmem:[%s5834_s3 + $0x7b0] sm:$0xf0]  ;;  %v2819_v52 = vor.u32 %v3682_v37, %v2816_v38 }
  0xcb   : > { %v3838_v6 = vld [vmem:[%s5834_s3 + $0x66c] sm:$0xf0]  ;;  %2161 = vmatmul.bf16.gmra.mxu3 %v4502_v55  ;;  %v3587_v56 = vor.u32 %v3874_v45, %v3584_v46  ;;  %v3264_v3 = vld [vmem:[%s5834_s3 + $0x530] sm:$0xf0] }
  0xcc   : > { %2228 = vmatpush.bf16.msra.mxu3 %v3487_v51  ;;  %v3134_v7 = vld [vmem:[%s5834_s3 + $0x410] sm:$0xf]  ;;  %2172 = vmatpush.bf16.msra.mxu0 %v2687_v61  ;;  %v3423_v13 = vor.u32 %v3838_v6, %v3422_v5  ;;  %v5203_v51 = vld [vmem:[%s5835_s4] sm:$0xff]  ;;  %v3040_v61 = vld [vmem:[%s5834_s3 + $0x370] sm:$0xf0] }
  0xcd   : > { %v3766_v8 = vld [vmem:[%s5834_s3 + $0x42c] sm:$0xf0]  ;;  %v3043_v4 = vor.u32 %v3738_v60, %v3040_v61  ;;  %v3666_v5 = vld [vmem:[%s5834_s3 + $0x114] sm:$0xf] }
  0xce   : > { %2191 = vmatpush.bf16.msra.mxu1 %v2943_v62  ;;  %v2622_v28 = vld [vmem:[%s5834_s3 + $0x10] sm:$0xf]  ;;  %2211 = vmatpush.bf16.msra.mxu2 %v3167_v2  ;;  %v3135_v14 = vor.u32 %v3766_v8, %v3134_v7  ;;  %v5218_v62 = vperm.slane %v5203_v51, 0  ;;  %v3794_v2 = vld [vmem:[%s5834_s3 + $0x514] sm:$0xf] }
  0xcf   : > { %v3638_v29 = vld [vmem:[%s5834_s3 + $0x2c] sm:$0xf0]  ;;  %v2752_v6 = vld [vmem:[%s5834_s3 + $0x130] sm:$0xf0] }
  0xd0   : > { %v2878_v12 = vld [vmem:[%s5834_s3 + $0x210] sm:$0xf]  ;;  %2229 = vmatpush.bf16.msra.mxu3 %v3455_v1  ;;  %2173 = vmatpush.bf16.msra.mxu0 %v2655_v27  ;;  %v2623_v26 = vor.u32 %v3638_v29, %v2622_v28  ;;  %v3552_v1 = vld [vmem:[%s5834_s3 + $0x770] sm:$0xf0]  ;;  %v1891_v27 = vpop.f32.mrf.mxu1  ;;  %v3267_v28 = vor.u32 %v3794_v2, %v3264_v3 }
  0xd1   : > { %v3702_v15 = vld [vmem:[%s5834_s3 + $0x22c] sm:$0xf0]  ;;  %v3730_v8 = vld [vmem:[%s5834_s3 + $0x314] sm:$0xf] }
  0xd2   : > { %v3390_v16 = vld [vmem:[%s5834_s3 + $0x610] sm:$0xf]  ;;  %2192 = vmatpush.bf16.msra.mxu1 %v2911_v11  ;;  %v2879_v30 = vor.u32 %v3702_v15, %v2878_v12  ;;  %2212 = vmatpush.bf16.msra.mxu2 %v3135_v14  ;;  %v1872_v7 = vpop.f32.mrf.mxu0  ;;  %v3008_v9 = vld [vmem:[%s5834_s3 + $0x330] sm:$0xf0]  ;;  %v3555_v11 = vor.u32 %v3866_v63, %v3552_v1  ;;  %v2755_v12 = vor.u32 %v3666_v5, %v2752_v6 }
  0xd3   : > { %v3830_v17 = vld [vmem:[%s5834_s3 + $0x62c] sm:$0xf0]  ;;  %v1873_v10 = vadd.f32 %v1872_v7, %v5218_v62  ;;  %v3858_v29 = vld [vmem:[%s5834_s3 + $0x714] sm:$0xf] }
  0xd4   : > { %2230 = vmatpush.bf16.msra.mxu3 %v3423_v13  ;;  %v3391_v47 = vor.u32 %v3830_v17, %v3390_v16  ;;  %2174 = vmatpush.bf16.msra.mxu0 %v2623_v26  ;;  %v3520_v13 = vld [vmem:[%s5834_s3 + $0x730] sm:$0xf0]  ;;  %v3011_v16 = vor.u32 %v3730_v8, %v3008_v9 }
  0xd5   : > { %v3786_v14 = vld [vmem:[%s5834_s3 + $0x4d4] sm:$0xf]  ;;  %v1892_v20 = vadd.f32 %v1891_v27, %v1873_v10  ;;  %2213 = vmatmul.bf16.vlgmr.msra.gmra.mxu2 %v4360_v25  ;;  %v3523_v48 = vor.u32 %v3858_v29, %v3520_v13  ;;  %v3366_v29 = vld [vmem:[%s5834_s3 + $0x5d8] sm:$0xf] }
  0xd6   : > { %2281 = vmatpush.bf16.msrb.mxu2 %v3363_v19  ;;  %2193 = vmatpush.bf16.msra.mxu1 %v2879_v30  ;;  %v3232_v15 = vld [vmem:[%s5834_s3 + $0x4f0] sm:$0xf0] }
  0xd7   : > { %2175 = vmatmul.bf16.vlgmr.msra.gmra.mxu0 %v4345_v18  ;;  %v3658_v17 = vld [vmem:[%s5834_s3 + $0xd4] sm:$0xf]  ;;  %v3235_v22 = vor.u32 %v3786_v14, %v3232_v15  ;;  %v1929_v50 = vpop.f32.mrf.mxu3 }
  0xd8   : > { %2231 = vmatpush.bf16.msra.mxu3 %v3391_v47  ;;  %2243 = vmatpush.bf16.msrb.mxu0 %v2851_v32  ;;  %v2720_v19 = vld [vmem:[%s5834_s3 + $0xf0] sm:$0xf0]  ;;  %v1910_v47 = vpop.f32.mrf.mxu2  ;;  %v1893_v54 = vpop.f32.mrf.mxu1 }
  0xd9   : > { %2194 = vmatmul.bf16.vlgmr.msra.gmra.mxu1 %v4358_v24  ;;  %v3722_v33 = vld [vmem:[%s5834_s3 + $0x2d4] sm:$0xf]  ;;  %v2723_v26 = vor.u32 %v3658_v17, %v2720_v19  ;;  %v1911_v37 = vadd.f32 %v1910_v47, %v1892_v20  ;;  %v2854_v17 = vld [vmem:[%s5834_s3 + $0x1d8] sm:$0xf] }
  0xda   : > { %2262 = vmatpush.bf16.msrb.mxu1 %v3107_v35  ;;  %2282 = vmatpush.bf16.msrb.mxu2 %v3331_v43  ;;  %v2976_v21 = vld [vmem:[%s5834_s3 + $0x2f0] sm:$0xf0]  ;;  %v1874_v38 = vpop.f32.mrf.mxu0 }
  0xdb   : > { %v3488_v30 = vld [vmem:[%s5834_s3 + $0x6f0] sm:$0xf0]  ;;  %2232 = vmatmul.bf16.vlgmr.msra.gmra.mxu3 %v4393_v44  ;;  %v2979_v32 = vor.u32 %v3722_v33, %v2976_v21 }
  0xdc   : > { %2300 = vmatpush.bf16.msrb.mxu3 %v3619_v36  ;;  %2244 = vmatpush.bf16.msrb.mxu0 %v2819_v52  ;;  %v3778_v31 = vld [vmem:[%s5834_s3 + $0x494] sm:$0xf]  ;;  %v3491_v45 = vor.u32 %v3850_v23, %v3488_v30  ;;  %v1875_v52 = vadd.f32 %v1874_v38, %v5218_v62  ;;  %v3759_v23 = vld [vmem:[%s5834_s3 + $0x3f4] sm:$0xf0] }
  0xdd   : > { %v3200_v42 = vld [vmem:[%s5834_s3 + $0x4b0] sm:$0xf0]  ;;  %v3887_v38 = vld [vmem:[%s5834_s3 + $0x7f4] sm:$0xf0] }
  0xde   : > { %2263 = vmatpush.bf16.msrb.mxu1 %v3075_v53  ;;  %2283 = vmatpush.bf16.msrb.mxu2 %v3299_v59  ;;  %v3650_v35 = vld [vmem:[%s5834_s3 + $0x94] sm:$0xf]  ;;  %v3203_v46 = vor.u32 %v3778_v31, %v3200_v42  ;;  %v1930_v59 = vadd.f32 %v1929_v50, %v1911_v37  ;;  %v1894_v6 = vadd.f32 %v1893_v54, %v1875_v52  ;;  %v3687_v52 = vld [vmem:[%s5834_s3 + $0x1b4] sm:$0xf0] }
  0xdf   : > { %v2688_v36 = vld [vmem:[%s5834_s3 + $0xb0] sm:$0xf0] }
  0xe0   : > { %2301 = vmatpush.bf16.msrb.mxu3 %v3587_v56  ;;  %2245 = vmatpush.bf16.msrb.mxu0 %v2787_v0  ;;  %v3714_v39 = vld [vmem:[%s5834_s3 + $0x294] sm:$0xf]  ;;  %v2691_v53 = vor.u32 %v3650_v35, %v2688_v36  ;;  %3896 = vtanh.f32 %v1930_v59  ;;  %v1912_v27 = vpop.f32.mrf.mxu2  ;;  %v1896_v20 = vpop.f32.mrf.mxu1  ;;  %v3590_v59 = vld [vmem:[%s5834_s3 + $0x798] sm:$0xf] }
  0xe1   : > { %v2944_v43 = vld [vmem:[%s5834_s3 + $0x2b0] sm:$0xf0]  ;;  %v1913_v13 = vadd.f32 %v1912_v27, %v1894_v6 }
  0xe2   : > { %2264 = vmatpush.bf16.msrb.mxu1 %v3043_v4  ;;  %2284 = vmatpush.bf16.msrb.mxu2 %v3267_v28  ;;  %v3842_v49 = vld [vmem:[%s5834_s3 + $0x694] sm:$0xf]  ;;  %v2947_v60 = vor.u32 %v3714_v39, %v2944_v43  ;;  %v1877_v14 = vpop.f32.mrf.mxu0  ;;  %v3334_v39 = vld [vmem:[%s5834_s3 + $0x598] sm:$0xf] }
  0xe3   : > { %v3456_v56 = vld [vmem:[%s5834_s3 + $0x6b0] sm:$0xf0]  ;;  %v1878_v19 = vadd.f32 %v1877_v14, %v5218_v62  ;;  %v3815_v43 = vld [vmem:[%s5834_s3 + $0x5b4] sm:$0xf0] }
  0xe4   : > { %2302 = vmatpush.bf16.msrb.mxu3 %v3555_v11  ;;  %2246 = vmatpush.bf16.msrb.mxu0 %v2755_v12  ;;  %v3770_v57 = vld [vmem:[%s5834_s3 + $0x454] sm:$0xf]  ;;  %v3459_v2 = vor.u32 %v3842_v49, %v3456_v56  ;;  %v3823_v12 = vld [vmem:[%s5834_s3 + $0x5f4] sm:$0xf0] }
  0xe5   : > { %v3168_v58 = vld [vmem:[%s5834_s3 + $0x470] sm:$0xf0]  ;;  %v3367_v47 = vor.u32 %v3823_v12, %v3366_v29  ;;  %v1897_v54 = vadd.f32 %v1896_v20, %v1878_v19  ;;  %2218 = vmatmul.bf16.gmra.mxu2 %v4484_v41  ;;  %v2822_v49 = vld [vmem:[%s5834_s3 + $0x198] sm:$0xf]  ;;  %v5445_v19 = vperm.slane %v5203_v51, 1 }
  0xe6   : > { %2265 = vmatpush.bf16.msrb.mxu1 %v3011_v16  ;;  %2285 = vmatpush.bf16.msrb.mxu2 %v3235_v22  ;;  %v3642_v61 = vld [vmem:[%s5834_s3 + $0x54] sm:$0xf]  ;;  %v3171_v3 = vor.u32 %v3770_v57, %v3168_v58  ;;  %v3110_v22 = vld [vmem:[%s5834_s3 + $0x3d8] sm:$0xf]  ;;  %v3897_v35 = vpop.eup %3896  ;;  %v3335_v58 = vor.u32 %v3815_v43, %v3334_v39 }
  0xe7   : > { %v2656_v63 = vld [vmem:[%s5834_s3 + $0x70] sm:$0xf0]  ;;  %2180 = vmatmul.bf16.gmra.mxu0 %v4469_v34  ;;  %2503 = vst [vmem:[%s5359_s22] sm:$0xff] %v3897_v35  ;;  %v3751_v56 = vld [vmem:[%s5834_s3 + $0x3b4] sm:$0xf0] }
  0xe8   : > { %2303 = vmatpush.bf16.msrb.mxu3 %v3523_v48  ;;  %2247 = vmatpush.bf16.msrb.mxu0 %v2723_v26  ;;  %v3706_v0 = vld [vmem:[%s5834_s3 + $0x254] sm:$0xf]  ;;  %v2659_v7 = vor.u32 %v3642_v61, %v2656_v63  ;;  %v3695_v48 = vld [vmem:[%s5834_s3 + $0x1f4] sm:$0xf0]  ;;  %v1931_v26 = vpop.f32.mrf.mxu3  ;;  %v1898_v6 = vpop.f32.mrf.mxu1 }
  0xe9   : > { %v2912_v1 = vld [vmem:[%s5834_s3 + $0x270] sm:$0xf0]  ;;  %v1932_v36 = vadd.f32 %v1931_v26, %v1913_v13  ;;  %2199 = vmatmul.bf16.gmra.mxu1 %v4482_v40  ;;  %v3879_v61 = vld [vmem:[%s5834_s3 + $0x7b4] sm:$0xf0] }
  0xea   : > { %2266 = vmatpush.bf16.msrb.mxu1 %v2979_v32  ;;  %2286 = vmatpush.bf16.msrb.mxu2 %v3203_v46  ;;  %v3834_v4 = vld [vmem:[%s5834_s3 + $0x654] sm:$0xf]  ;;  %v2915_v11 = vor.u32 %v3706_v0, %v2912_v1  ;;  %v3622_v32 = vld [vmem:[%s5834_s3 + $0x7d8] sm:$0xf]  ;;  %v3111_v46 = vor.u32 %v3759_v23, %v3110_v22 }
  0xeb   : > { %v3424_v5 = vld [vmem:[%s5834_s3 + $0x670] sm:$0xf0]  ;;  %3898 = vtanh.f32 %v1932_v36  ;;  %v3623_v57 = vor.u32 %v3887_v38, %v3622_v32  ;;  %2237 = vmatmul.bf16.gmra.mxu3 %v4502_v55  ;;  %v3302_v63 = vld [vmem:[%s5834_s3 + $0x558] sm:$0xf] }
  0xec   : > { %2304 = vmatpush.bf16.msrb.mxu3 %v3491_v45  ;;  %2248 = vmatpush.bf16.msrb.mxu0 %v2691_v53  ;;  %v3762_v8 = vld [vmem:[%s5834_s3 + $0x414] sm:$0xf]  ;;  %v3427_v33 = vor.u32 %v3834_v4, %v3424_v5  ;;  %v2855_v45 = vor.u32 %v3695_v48, %v2854_v17  ;;  %v3078_v53 = vld [vmem:[%s5834_s3 + $0x398] sm:$0xf] }
  0xed   : > { %v3136_v9 = vld [vmem:[%s5834_s3 + $0x430] sm:$0xf0]  ;;  %v3807_v0 = vld [vmem:[%s5834_s3 + $0x574] sm:$0xf0]  ;;  %v3079_v4 = vor.u32 %v3751_v56, %v3078_v53 }
  0xee   : > { %v3634_v10 = vld [vmem:[%s5834_s3 + $0x14] sm:$0xf]  ;;  %2267 = vmatpush.bf16.msrb.mxu1 %v2947_v60  ;;  %2287 = vmatpush.bf16.msrb.mxu2 %v3171_v3  ;;  %v3139_v21 = vor.u32 %v3762_v8, %v3136_v9  ;;  %v1915_v60 = vpop.f32.mrf.mxu2  ;;  %v2823_v3 = vor.u32 %v3687_v52, %v2822_v49  ;;  %v2790_v5 = vld [vmem:[%s5834_s3 + $0x158] sm:$0xf] }
  0xef   : > { %v2624_v28 = vld [vmem:[%s5834_s3 + $0x30] sm:$0xf0]  ;;  %v1916_v1 = vadd.f32 %v1915_v60, %v1897_v54  ;;  %v3046_v8 = vld [vmem:[%s5834_s3 + $0x358] sm:$0xf] }
  0xf0   : > { %v3698_v15 = vld [vmem:[%s5834_s3 + $0x214] sm:$0xf]  ;;  %2305 = vmatpush.bf16.msrb.mxu3 %v3459_v2  ;;  %2249 = vmatpush.bf16.msrb.mxu0 %v2659_v7  ;;  %v2627_v30 = vor.u32 %v3634_v10, %v2624_v28  ;;  %v1879_v2 = vpop.f32.mrf.mxu0  ;;  %v3679_v7 = vld [vmem:[%s5834_s3 + $0x174] sm:$0xf0]  ;;  %v1934_v10 = vpop.f32.mrf.mxu3  ;;  %v3303_v28 = vor.u32 %v3807_v0, %v3302_v63 }
  0xf1   : > { %v2880_v16 = vld [vmem:[%s5834_s3 + $0x230] sm:$0xf0]  ;;  %v3743_v9 = vld [vmem:[%s5834_s3 + $0x374] sm:$0xf0]  ;;  %v1880_v27 = vadd.f32 %v1879_v2, %v5218_v62  ;;  %v3899_v12 = vpop.eup %3898  ;;  %v1935_v13 = vadd.f32 %v1934_v10, %v1916_v1 }
  0xf2   : > { %v3826_v31 = vld [vmem:[%s5834_s3 + $0x614] sm:$0xf]  ;;  %2268 = vmatpush.bf16.msrb.mxu1 %v2915_v11  ;;  %v2883_v37 = vor.u32 %v3698_v15, %v2880_v16  ;;  %2288 = vmatpush.bf16.msrb.mxu2 %v3139_v21  ;;  %v3591_v11 = vor.u32 %v3879_v61, %v3590_v59  ;;  %v3558_v29 = vld [vmem:[%s5834_s3 + $0x758] sm:$0xf]  ;;  %2511 = vst [vmem:[%s5359_s22 + $0x40] sm:$0xff] %v3899_v12 }
  0xf3   : > { %v3392_v42 = vld [vmem:[%s5834_s3 + $0x630] sm:$0xf0]  ;;  %v3871_v14 = vld [vmem:[%s5834_s3 + $0x774] sm:$0xf0]  ;;  %v2791_v16 = vor.u32 %v3679_v7, %v2790_v5  ;;  %v3047_v17 = vor.u32 %v3743_v9, %v3046_v8  ;;  %3900 = vtanh.f32 %v1935_v13  ;;  %v1899_v21 = vadd.f32 %v1898_v6, %v1880_v27 }
  0xf4   : > { %2306 = vmatpush.bf16.msrb.mxu3 %v3427_v33  ;;  %v3395_v50 = vor.u32 %v3826_v31, %v3392_v42  ;;  %2250 = vmatpush.bf16.msrb.mxu0 %v2627_v30  ;;  %v3270_v15 = vld [vmem:[%s5834_s3 + $0x518] sm:$0xf]  ;;  %v3559_v48 = vor.u32 %v3871_v14, %v3558_v29 }
  0xf5   : > { %v3799_v62 = vld [vmem:[%s5834_s3 + $0x534] sm:$0xf0]  ;;  %v1967_v38 = vpop.f32.mrf.mxu1  ;;  %2289 = vmatmul.bf16.vlgmr.msrb.gmra.mxu2 %v4360_v25 }
  0xf6   : > { %2357 = vmatpush.bf16.msra.mxu2 %v3367_v47  ;;  %2269 = vmatpush.bf16.msrb.mxu1 %v2883_v37  ;;  %v2758_v20 = vld [vmem:[%s5834_s3 + $0x118] sm:$0xf]  ;;  %v3271_v22 = vor.u32 %v3799_v62, %v3270_v15  ;;  %v1917_v31 = vpop.f32.mrf.mxu2 }
  0xf7   : > { %v3671_v33 = vld [vmem:[%s5834_s3 + $0x134] sm:$0xf0]  ;;  %v1918_v35 = vadd.f32 %v1917_v31, %v1899_v21  ;;  %2251 = vmatmul.bf16.vlgmr.msrb.gmra.mxu0 %v4345_v18 }
  0xf8   : > { %2319 = vmatpush.bf16.msra.mxu0 %v2855_v45  ;;  %2307 = vmatpush.bf16.msrb.mxu3 %v3395_v50  ;;  %v3014_v23 = vld [vmem:[%s5834_s3 + $0x318] sm:$0xf]  ;;  %v1948_v36 = vpop.f32.mrf.mxu0  ;;  %v2759_v39 = vor.u32 %v3671_v33, %v2758_v20 }
  0xf9   : > { %v3735_v26 = vld [vmem:[%s5834_s3 + $0x334] sm:$0xf0]  ;;  %v1949_v37 = vadd.f32 %v1948_v36, %v5445_v19  ;;  %2270 = vmatmul.bf16.vlgmr.msrb.gmra.mxu1 %v4358_v24 }
  0xfa   : > { %2338 = vmatpush.bf16.msra.mxu1 %v3111_v46  ;;  %2358 = vmatpush.bf16.msra.mxu2 %v3335_v58  ;;  %v3526_v30 = vld [vmem:[%s5834_s3 + $0x718] sm:$0xf]  ;;  %v3015_v43 = vor.u32 %v3735_v26, %v3014_v23  ;;  %v1936_v46 = vpop.f32.mrf.mxu3 }
  0xfb   : > { %v3863_v42 = vld [vmem:[%s5834_s3 + $0x734] sm:$0xf0]  ;;  %v1937_v58 = vadd.f32 %v1936_v46, %v1918_v35  ;;  %v1968_v63 = vadd.f32 %v1967_v38, %v1949_v37  ;;  %2308 = vmatmul.bf16.vlgmr.msrb.gmra.mxu3 %v4393_v44 }
  0xfc   : > { %2376 = vmatpush.bf16.msra.mxu3 %v3623_v57  ;;  %2320 = vmatpush.bf16.msra.mxu0 %v2823_v3  ;;  %v3238_v47 = vld [vmem:[%s5834_s3 + $0x4d8] sm:$0xf]  ;;  %v3527_v49 = vor.u32 %v3863_v42, %v3526_v30  ;;  %v3901_v57 = vpop.eup %3900 }
  0xfd   : > { %v3791_v32 = vld [vmem:[%s5834_s3 + $0x4f4] sm:$0xf0]  ;;  %2519 = vst [vmem:[%s5359_s22 + $0x80] sm:$0xff] %v3901_v57  ;;  %3902 = vtanh.f32 %v1937_v58  ;;  %v1969_v12 = vpop.f32.mrf.mxu1  ;;  %v2856_v57 = vld [vmem:[%s5834_s3 + $0x1f8] sm:$0xf0] }
  0xfe   : > { %2339 = vmatpush.bf16.msra.mxu1 %v3079_v4  ;;  %2359 = vmatpush.bf16.msra.mxu2 %v3303_v28  ;;  %v2726_v54 = vld [vmem:[%s5834_s3 + $0xd8] sm:$0xf]  ;;  %v3239_v50 = vor.u32 %v3791_v32, %v3238_v47  ;;  %v1986_v9 = vpop.f32.mrf.mxu2  ;;  %v3819_v47 = vld [vmem:[%s5834_s3 + $0x5dc] sm:$0xf] }
  0xff   : > { %v3663_v45 = vld [vmem:[%s5834_s3 + $0xf4] sm:$0xf0]  ;;  %v1987_v28 = vadd.f32 %v1986_v9, %v1968_v63  ;;  %v3368_v32 = vld [vmem:[%s5834_s3 + $0x5f8] sm:$0xf0] }
 0x100   : > { %2377 = vmatpush.bf16.msra.mxu3 %v3591_v11  ;;  %2321 = vmatpush.bf16.msra.mxu0 %v2791_v16  ;;  %v2982_v52 = vld [vmem:[%s5834_s3 + $0x2d8] sm:$0xf]  ;;  %v2727_v0 = vor.u32 %v3663_v45, %v2726_v54  ;;  %v1950_v29 = vpop.f32.mrf.mxu0  ;;  %v3883_v63 = vld [vmem:[%s5834_s3 + $0x7dc] sm:$0xf] }
 0x101   : > { %v3727_v53 = vld [vmem:[%s5834_s3 + $0x2f4] sm:$0xf0] }
 0x102   : > { %2340 = vmatpush.bf16.msra.mxu1 %v3047_v17  ;;  %2360 = vmatpush.bf16.msra.mxu2 %v3271_v22  ;;  %v3494_v56 = vld [vmem:[%s5834_s3 + $0x6d8] sm:$0xf]  ;;  %v2983_v1 = vor.u32 %v3727_v53, %v2982_v52  ;;  %v2005_v16 = vpop.f32.mrf.mxu3  ;;  %v1951_v17 = vadd.f32 %v1950_v29, %v5445_v19  ;;  %v3371_v53 = vor.u32 %v3819_v47, %v3368_v32  ;;  %v2824_v29 = vld [vmem:[%s5834_s3 + $0x1b8] sm:$0xf0] }
 0x103   : > { %v3855_v59 = vld [vmem:[%s5834_s3 + $0x6f4] sm:$0xf0]  ;;  %v3903_v23 = vpop.eup %3902  ;;  %v2006_v26 = vadd.f32 %v2005_v16, %v1987_v28  ;;  %v3683_v28 = vld [vmem:[%s5834_s3 + $0x19c] sm:$0xf] }
 0x104   : > { %2378 = vmatpush.bf16.msra.mxu3 %v3559_v48  ;;  %v3206_v60 = vld [vmem:[%s5834_s3 + $0x498] sm:$0xf]  ;;  %2322 = vmatpush.bf16.msra.mxu0 %v2759_v39  ;;  %v3495_v4 = vor.u32 %v3855_v59, %v3494_v56  ;;  %2527 = vst [vmem:[%s5359_s22 + $0xc0] sm:$0xff] %v3903_v23  ;;  %v1970_v39 = vadd.f32 %v1969_v12, %v1951_v17  ;;  %v3691_v56 = vld [vmem:[%s5834_s3 + $0x1dc] sm:$0xf] }
 0x105   : > { %v3783_v61 = vld [vmem:[%s5834_s3 + $0x4b4] sm:$0xf0]  ;;  %3904 = vtanh.f32 %v2006_v26  ;;  %v2859_v9 = vor.u32 %v3691_v56, %v2856_v57  ;;  %v3747_v12 = vld [vmem:[%s5834_s3 + $0x39c] sm:$0xf]  ;;  %2294 = vmatmul.bf16.gmra.mxu2 %v4484_v41 }
 0x106   : > { %2341 = vmatpush.bf16.msra.mxu1 %v3015_v43  ;;  %v2694_v2 = vld [vmem:[%s5834_s3 + $0x98] sm:$0xf]  ;;  %2361 = vmatpush.bf16.msra.mxu2 %v3239_v50  ;;  %v3207_v5 = vor.u32 %v3783_v61, %v3206_v60  ;;  %v1988_v50 = vpop.f32.mrf.mxu2  ;;  %v3755_v60 = vld [vmem:[%s5834_s3 + $0x3dc] sm:$0xf] }
 0x107   : > { %v3655_v3 = vld [vmem:[%s5834_s3 + $0xb4] sm:$0xf0]  ;;  %v1989_v58 = vadd.f32 %v1988_v50, %v1970_v39  ;;  %v3112_v61 = vld [vmem:[%s5834_s3 + $0x3f8] sm:$0xf0]  ;;  %2256 = vmatmul.bf16.gmra.mxu0 %v4469_v34 }
 0x108   : > { %2379 = vmatpush.bf16.msra.mxu3 %v3527_v49  ;;  %v2950_v6 = vld [vmem:[%s5834_s3 + $0x298] sm:$0xf]  ;;  %2323 = vmatpush.bf16.msra.mxu0 %v2727_v0  ;;  %v2695_v13 = vor.u32 %v3655_v3, %v2694_v2  ;;  %v1953_v59 = vpop.f32.mrf.mxu0  ;;  %v3875_v16 = vld [vmem:[%s5834_s3 + $0x79c] sm:$0xf] }
 0x109   : > { %v3719_v7 = vld [vmem:[%s5834_s3 + $0x2b4] sm:$0xf0]  ;;  %v1954_v0 = vadd.f32 %v1953_v59, %v5445_v19  ;;  %2275 = vmatmul.bf16.gmra.mxu1 %v4482_v40  ;;  %v3592_v17 = vld [vmem:[%s5834_s3 + $0x7b8] sm:$0xf0] }
 0x10a   : > { %v3462_v8 = vld [vmem:[%s5834_s3 + $0x698] sm:$0xf]  ;;  %2342 = vmatpush.bf16.msra.mxu1 %v2983_v1  ;;  %v2951_v14 = vor.u32 %v3719_v7, %v2950_v6  ;;  %2362 = vmatpush.bf16.msra.mxu2 %v3207_v5  ;;  %v1972_v1 = vpop.f32.mrf.mxu1  ;;  %v3811_v5 = vld [vmem:[%s5834_s3 + $0x59c] sm:$0xf]  ;;  %v2007_v7 = vpop.f32.mrf.mxu3 }
 0x10b   : > { %v3847_v10 = vld [vmem:[%s5834_s3 + $0x6b4] sm:$0xf0]  ;;  %v3336_v6 = vld [vmem:[%s5834_s3 + $0x5b8] sm:$0xf0]  ;;  %2313 = vmatmul.bf16.gmra.mxu3 %v4502_v55 }
 0x10c   : > { %v3174_v27 = vld [vmem:[%s5834_s3 + $0x458] sm:$0xf]  ;;  %2380 = vmatpush.bf16.msra.mxu3 %v3495_v4  ;;  %v3463_v20 = vor.u32 %v3847_v10, %v3462_v8  ;;  %2324 = vmatpush.bf16.msra.mxu0 %v2695_v13  ;;  %v3624_v4 = vld [vmem:[%s5834_s3 + $0x7f8] sm:$0xf0]  ;;  %v3905_v10 = vpop.eup %3904  ;;  %v1973_v13 = vadd.f32 %v1972_v1, %v1954_v0 }
 0x10d   : > { %v3775_v11 = vld [vmem:[%s5834_s3 + $0x474] sm:$0xf0]  ;;  %2504 = vst [vmem:[%s5359_s22 + $0x8] sm:$0xff] %v3905_v10  ;;  %v3675_v23 = vld [vmem:[%s5834_s3 + $0x15c] sm:$0xf] }
 0x10e   : > { %v2662_v15 = vld [vmem:[%s5834_s3 + $0x58] sm:$0xf]  ;;  %v3175_v33 = vor.u32 %v3775_v11, %v3174_v27  ;;  %2343 = vmatpush.bf16.msra.mxu1 %v2951_v14  ;;  %v2008_v27 = vadd.f32 %v2007_v7, %v1989_v58  ;;  %v3115_v11 = vor.u32 %v3755_v60, %v3112_v61  ;;  %v3627_v14 = vor.u32 %v3883_v63, %v3624_v4  ;;  %v2792_v26 = vld [vmem:[%s5834_s3 + $0x178] sm:$0xf0] }
 0x10f   : > { %v3647_v62 = vld [vmem:[%s5834_s3 + $0x74] sm:$0xf0]  ;;  %v3739_v32 = vld [vmem:[%s5834_s3 + $0x35c] sm:$0xf]  ;;  %v5668_v60 = vperm.slane %v5203_v51, 2 }
 0x110   : > { %v2918_v21 = vld [vmem:[%s5834_s3 + $0x258] sm:$0xf]  ;;  %v2663_v35 = vor.u32 %v3647_v62, %v2662_v15  ;;  %2381 = vmatpush.bf16.msra.mxu3 %v3463_v20  ;;  %2363 = vmatpush.bf16.msra.mxu2 %v3175_v33  ;;  %v3339_v15 = vor.u32 %v3811_v5, %v3336_v6  ;;  %v3080_v62 = vld [vmem:[%s5834_s3 + $0x3b8] sm:$0xf0]  ;;  %3906 = vtanh.f32 %v2008_v27 }
 0x111   : > { %v3711_v48 = vld [vmem:[%s5834_s3 + $0x274] sm:$0xf0]  ;;  %v3803_v20 = vld [vmem:[%s5834_s3 + $0x55c] sm:$0xf] }
 0x112   : > { %v3430_v22 = vld [vmem:[%s5834_s3 + $0x658] sm:$0xf]  ;;  %v2919_v36 = vor.u32 %v3711_v48, %v2918_v21  ;;  %2325 = vmatpush.bf16.msra.mxu0 %v2663_v35  ;;  %v3304_v33 = vld [vmem:[%s5834_s3 + $0x578] sm:$0xf0]  ;;  %v2827_v21 = vor.u32 %v3683_v28, %v2824_v29  ;;  %v1991_v48 = vpop.f32.mrf.mxu2 }
 0x113   : > { %v3839_v30 = vld [vmem:[%s5834_s3 + $0x674] sm:$0xf0]  ;;  %v3307_v47 = vor.u32 %v3803_v20, %v3304_v33  ;;  %v3048_v35 = vld [vmem:[%s5834_s3 + $0x378] sm:$0xf0] }
 0x114   : > { %v3142_v31 = vld [vmem:[%s5834_s3 + $0x418] sm:$0xf]  ;;  %v3431_v43 = vor.u32 %v3839_v30, %v3430_v22  ;;  %2344 = vmatpush.bf16.msra.mxu1 %v2919_v36  ;;  %v3083_v22 = vor.u32 %v3747_v12, %v3080_v62  ;;  %v1992_v30 = vadd.f32 %v1991_v48, %v1973_v13  ;;  %v3867_v36 = vld [vmem:[%s5834_s3 + $0x75c] sm:$0xf] }
 0x115   : > { %v3767_v42 = vld [vmem:[%s5834_s3 + $0x434] sm:$0xf0]  ;;  %v3795_v39 = vld [vmem:[%s5834_s3 + $0x51c] sm:$0xf] }
 0x116   : > { %v2630_v37 = vld [vmem:[%s5834_s3 + $0x18] sm:$0xf]  ;;  %v3143_v54 = vor.u32 %v3767_v42, %v3142_v31  ;;  %2382 = vmatpush.bf16.msra.mxu3 %v3431_v43  ;;  %v1955_v31 = vpop.f32.mrf.mxu0  ;;  %v3595_v42 = vor.u32 %v3875_v16, %v3592_v17  ;;  %v3272_v43 = vld [vmem:[%s5834_s3 + $0x538] sm:$0xf0] }
 0x117   : > { %v3639_v38 = vld [vmem:[%s5834_s3 + $0x34] sm:$0xf0]  ;;  %v2760_v56 = vld [vmem:[%s5834_s3 + $0x138] sm:$0xf0]  ;;  %v3275_v58 = vor.u32 %v3795_v39, %v3272_v43 }
 0x118   : > { %v2886_v45 = vld [vmem:[%s5834_s3 + $0x218] sm:$0xf]  ;;  %v2631_v2 = vor.u32 %v3639_v38, %v2630_v37  ;;  %2364 = vmatpush.bf16.msra.mxu2 %v3143_v54  ;;  %v1974_v37 = vpop.f32.mrf.mxu1  ;;  %v3560_v38 = vld [vmem:[%s5834_s3 + $0x778] sm:$0xf0]  ;;  %v2010_v54 = vpop.f32.mrf.mxu3 }
 0x119   : > { %v3703_v46 = vld [vmem:[%s5834_s3 + $0x234] sm:$0xf0]  ;;  %v2011_v50 = vadd.f32 %v2010_v54, %v1992_v30  ;;  %v3563_v57 = vor.u32 %v3867_v36, %v3560_v38  ;;  %v3016_v59 = vld [vmem:[%s5834_s3 + $0x338] sm:$0xf0] }
 0x11a   : > { %v3398_v49 = vld [vmem:[%s5834_s3 + $0x618] sm:$0xf]  ;;  %v2887_v3 = vor.u32 %v3703_v46, %v2886_v45  ;;  %2326 = vmatpush.bf16.msra.mxu0 %v2631_v2  ;;  %v1956_v45 = vadd.f32 %v1955_v31, %v5445_v19  ;;  %v2795_v46 = vor.u32 %v3675_v23, %v2792_v26  ;;  %v3731_v19 = vld [vmem:[%s5834_s3 + $0x31c] sm:$0xf] }
 0x11b   : > { %v3831_v52 = vld [vmem:[%s5834_s3 + $0x634] sm:$0xf0]  ;;  %3908 = vtanh.f32 %v2011_v50  ;;  %v3859_v61 = vld [vmem:[%s5834_s3 + $0x71c] sm:$0xf]  ;;  %v3019_v4 = vor.u32 %v3731_v19, %v3016_v59  ;;  %2365 = vmatmul.bf16.vlgmr.msra.gmra.mxu2 %v4360_v25 }
 0x11c   : > { %v3399_v8 = vor.u32 %v3831_v52, %v3398_v49  ;;  %2433 = vmatpush.bf16.msrb.mxu2 %v3371_v53  ;;  %2345 = vmatpush.bf16.msra.mxu1 %v2887_v3  ;;  %v3907_v49 = vpop.eup %3906  ;;  %v3051_v52 = vor.u32 %v3739_v32, %v3048_v35  ;;  %v3667_v53 = vld [vmem:[%s5834_s3 + $0x11c] sm:$0xf]  ;;  %v1975_v63 = vadd.f32 %v1974_v37, %v1956_v45  ;;  %v1993_v3 = vpop.f32.mrf.mxu2 }
 0x11d   : > { %2512 = vst [vmem:[%s5359_s22 + $0x48] sm:$0xff] %v3907_v49  ;;  %v2763_v0 = vor.u32 %v3667_v53, %v2760_v56  ;;  %v3528_v1 = vld [vmem:[%s5834_s3 + $0x738] sm:$0xf0]  ;;  %2327 = vmatmul.bf16.vlgmr.msra.gmra.mxu0 %v4345_v18 }
 0x11e   : > { %2383 = vmatpush.bf16.msra.mxu3 %v3399_v8  ;;  %2395 = vmatpush.bf16.msrb.mxu0 %v2859_v9  ;;  %v3787_v2 = vld [vmem:[%s5834_s3 + $0x4dc] sm:$0xf]  ;;  %v1994_v7 = vadd.f32 %v1993_v3, %v1975_v63  ;;  %v2024_v8 = vpop.f32.mrf.mxu0  ;;  %v3531_v28 = vor.u32 %v3859_v61, %v3528_v1 }
 0x11f   : > { %v3240_v51 = vld [vmem:[%s5834_s3 + $0x4f8] sm:$0xf0]  ;;  %v2025_v27 = vadd.f32 %v2024_v8, %v5668_v60  ;;  %2346 = vmatmul.bf16.vlgmr.msra.gmra.mxu1 %v4358_v24 }
 0x120   : > { %2414 = vmatpush.bf16.msrb.mxu1 %v3115_v11  ;;  %2434 = vmatpush.bf16.msrb.mxu2 %v3339_v15  ;;  %v3659_v5 = vld [vmem:[%s5834_s3 + $0xdc] sm:$0xf]  ;;  %v2043_v11 = vpop.f32.mrf.mxu1  ;;  %v3243_v29 = vor.u32 %v3787_v2, %v3240_v51  ;;  %v2012_v13 = vpop.f32.mrf.mxu3 }
 0x121   : > { %v2728_v6 = vld [vmem:[%s5834_s3 + $0xf8] sm:$0xf0]  ;;  %v3909_v17 = vpop.eup %3908  ;;  %v2013_v20 = vadd.f32 %v2012_v13, %v1994_v7  ;;  %2384 = vmatmul.bf16.vlgmr.msra.gmra.mxu3 %v4393_v44 }
 0x122   : > { %2452 = vmatpush.bf16.msrb.mxu3 %v3627_v14  ;;  %2396 = vmatpush.bf16.msrb.mxu0 %v2827_v21  ;;  %v3723_v9 = vld [vmem:[%s5834_s3 + $0x2dc] sm:$0xf]  ;;  %v2731_v14 = vor.u32 %v3659_v5, %v2728_v6  ;;  %2520 = vst [vmem:[%s5359_s22 + $0x88] sm:$0xff] %v3909_v17 }
 0x123   : > { %v2984_v10 = vld [vmem:[%s5834_s3 + $0x2f8] sm:$0xf0]  ;;  %3910 = vtanh.f32 %v2013_v20 }
 0x124   : > { %2415 = vmatpush.bf16.msrb.mxu1 %v3083_v22  ;;  %2435 = vmatpush.bf16.msrb.mxu2 %v3307_v47  ;;  %v3851_v12 = vld [vmem:[%s5834_s3 + $0x6dc] sm:$0xf]  ;;  %v2987_v33 = vor.u32 %v3723_v9, %v2984_v10  ;;  %v2044_v22 = vadd.f32 %v2043_v11, %v2025_v27  ;;  %v2062_v37 = vpop.f32.mrf.mxu2 }
 0x125   : > { %v3496_v15 = vld [vmem:[%s5834_s3 + $0x6f8] sm:$0xf0] }
 0x126   : > { %2453 = vmatpush.bf16.msrb.mxu3 %v3595_v42  ;;  %2397 = vmatpush.bf16.msrb.mxu0 %v2795_v46  ;;  %v3779_v62 = vld [vmem:[%s5834_s3 + $0x49c] sm:$0xf]  ;;  %v3499_v30 = vor.u32 %v3851_v12, %v3496_v15  ;;  %v2063_v54 = vadd.f32 %v2062_v37, %v2044_v22  ;;  %v2026_v45 = vpop.f32.mrf.mxu0 }
 0x127   : > { %v3208_v16 = vld [vmem:[%s5834_s3 + $0x4b8] sm:$0xf0] }
 0x128   : > { %2416 = vmatpush.bf16.msrb.mxu1 %v3051_v52  ;;  %2436 = vmatpush.bf16.msrb.mxu2 %v3275_v58  ;;  %v3651_v21 = vld [vmem:[%s5834_s3 + $0x9c] sm:$0xf]  ;;  %v3211_v31 = vor.u32 %v3779_v62, %v3208_v16  ;;  %v2045_v50 = vpop.f32.mrf.mxu1  ;;  %v2027_v58 = vadd.f32 %v2026_v45, %v5668_v60 }
 0x129   : > { %v2696_v48 = vld [vmem:[%s5834_s3 + $0xb8] sm:$0xf0] }
 0x12a   : > { %2454 = vmatpush.bf16.msrb.mxu3 %v3563_v57  ;;  %2398 = vmatpush.bf16.msrb.mxu0 %v2763_v0  ;;  %v3715_v23 = vld [vmem:[%s5834_s3 + $0x29c] sm:$0xf]  ;;  %v2699_v47 = vor.u32 %v3651_v21, %v2696_v48  ;;  %v2081_v57 = vpop.f32.mrf.mxu3  ;;  %v3911_v0 = vpop.eup %3910  ;;  %v2046_v8 = vadd.f32 %v2045_v50, %v2027_v58 }
 0x12b   : > { %v2952_v26 = vld [vmem:[%s5834_s3 + $0x2b8] sm:$0xf0]  ;;  %v2082_v1 = vadd.f32 %v2081_v57, %v2063_v54  ;;  %2528 = vst [vmem:[%s5359_s22 + $0xc8] sm:$0xff] %v3911_v0  ;;  %2370 = vmatmul.bf16.gmra.mxu2 %v4484_v41 }
 0x12c   : > { %2417 = vmatpush.bf16.msrb.mxu1 %v3019_v4  ;;  %2437 = vmatpush.bf16.msrb.mxu2 %v3243_v29  ;;  %v3843_v42 = vld [vmem:[%s5834_s3 + $0x69c] sm:$0xf]  ;;  %v2955_v38 = vor.u32 %v3715_v23, %v2952_v26  ;;  %v2064_v11 = vpop.f32.mrf.mxu2 }
 0x12d   : > { %v3464_v32 = vld [vmem:[%s5834_s3 + $0x6b8] sm:$0xf0]  ;;  %3912 = vtanh.f32 %v2082_v1  ;;  %v2065_v29 = vadd.f32 %v2064_v11, %v2046_v8  ;;  %2332 = vmatmul.bf16.gmra.mxu0 %v4469_v34 }
 0x12e   : > { %2455 = vmatpush.bf16.msrb.mxu3 %v3531_v28  ;;  %2399 = vmatpush.bf16.msrb.mxu0 %v2731_v14  ;;  %v3771_v35 = vld [vmem:[%s5834_s3 + $0x45c] sm:$0xf]  ;;  %v3467_v52 = vor.u32 %v3843_v42, %v3464_v32  ;;  %v2029_v12 = vpop.f32.mrf.mxu0  ;;  %v5791_v42 = vld [vmem:[%s5835_s4] sm:$0xff] }
 0x12f   : > { %v3176_v36 = vld [vmem:[%s5834_s3 + $0x478] sm:$0xf0]  ;;  %v2030_v13 = vadd.f32 %v2029_v12, %v5668_v60  ;;  %2351 = vmatmul.bf16.gmra.mxu1 %v4482_v40 }
 0x130   : > { %2418 = vmatpush.bf16.msrb.mxu1 %v2987_v33  ;;  %v3643_v39 = vld [vmem:[%s5834_s3 + $0x5c] sm:$0xf]  ;;  %2438 = vmatpush.bf16.msrb.mxu2 %v3211_v31  ;;  %v3179_v53 = vor.u32 %v3771_v35, %v3176_v36  ;;  %v2048_v14 = vpop.f32.mrf.mxu1 }
 0x131   : > { %v2664_v43 = vld [vmem:[%s5834_s3 + $0x78] sm:$0xf0]  ;;  %v2049_v20 = vadd.f32 %v2048_v14, %v2030_v13  ;;  %2389 = vmatmul.bf16.gmra.mxu3 %v4502_v55 }
 0x132   : > { %v3707_v46 = vld [vmem:[%s5834_s3 + $0x25c] sm:$0xf]  ;;  %2456 = vmatpush.bf16.msrb.mxu3 %v3499_v30  ;;  %2400 = vmatpush.bf16.msrb.mxu0 %v2699_v47  ;;  %v2667_v19 = vor.u32 %v3643_v39, %v2664_v43  ;;  %v2083_v62 = vpop.f32.mrf.mxu3  ;;  %v570_v47 = vperm.slane %v5791_v42, 3 }
 0x133   : > { %v2920_v49 = vld [vmem:[%s5834_s3 + $0x278] sm:$0xf0]  ;;  %v3913_v16 = vpop.eup %3912  ;;  %v2084_v17 = vadd.f32 %v2083_v62, %v2065_v29 }
 0x134   : > { %v3835_v56 = vld [vmem:[%s5834_s3 + $0x65c] sm:$0xf]  ;;  %2419 = vmatpush.bf16.msrb.mxu1 %v2955_v38  ;;  %v2923_v2 = vor.u32 %v3707_v46, %v2920_v49  ;;  %2439 = vmatpush.bf16.msrb.mxu2 %v3179_v53  ;;  %2505 = vst [vmem:[%s5359_s22 + $0x10] sm:$0xff] %v3913_v16  ;;  %v2067_v33 = vpop.f32.mrf.mxu2 }
 0x135   : > { %v3432_v59 = vld [vmem:[%s5834_s3 + $0x678] sm:$0xf0]  ;;  %3914 = vtanh.f32 %v2084_v17  ;;  %v2068_v21 = vadd.f32 %v2067_v33, %v2049_v20 }
 0x136   : > { %v3763_v61 = vld [vmem:[%s5834_s3 + $0x41c] sm:$0xf]  ;;  %2457 = vmatpush.bf16.msrb.mxu3 %v3467_v52  ;;  %v3435_v6 = vor.u32 %v3835_v56, %v3432_v59  ;;  %2401 = vmatpush.bf16.msrb.mxu0 %v2667_v19  ;;  %v2031_v48 = vpop.f32.mrf.mxu0 }
 0x137   : > { %v3144_v63 = vld [vmem:[%s5834_s3 + $0x438] sm:$0xf0]  ;;  %v2032_v26 = vadd.f32 %v2031_v48, %v5668_v60 }
 0x138   : > { %v3635_v51 = vld [vmem:[%s5834_s3 + $0x1c] sm:$0xf]  ;;  %v3147_v7 = vor.u32 %v3763_v61, %v3144_v63  ;;  %2420 = vmatpush.bf16.msrb.mxu1 %v2923_v2  ;;  %v2050_v22 = vpop.f32.mrf.mxu1 }
 0x139   : > { %v2632_v3 = vld [vmem:[%s5834_s3 + $0x38] sm:$0xf0]  ;;  %v2051_v32 = vadd.f32 %v2050_v22, %v2032_v26 }
 0x13a   : > { %v3699_v4 = vld [vmem:[%s5834_s3 + $0x21c] sm:$0xf]  ;;  %v2635_v9 = vor.u32 %v3635_v51, %v2632_v3  ;;  %2458 = vmatpush.bf16.msrb.mxu3 %v3435_v6  ;;  %2440 = vmatpush.bf16.msrb.mxu2 %v3147_v7  ;;  %v2086_v23 = vpop.f32.mrf.mxu3 }
 0x13b   : > { %v2888_v5 = vld [vmem:[%s5834_s3 + $0x238] sm:$0xf0]  ;;  %v3915_v30 = vpop.eup %3914  ;;  %v2087_v31 = vadd.f32 %v2086_v23, %v2068_v21 }
 0x13c   : > { %v3827_v10 = vld [vmem:[%s5834_s3 + $0x61c] sm:$0xf]  ;;  %v2891_v28 = vor.u32 %v3699_v4, %v2888_v5  ;;  %2402 = vmatpush.bf16.msrb.mxu0 %v2635_v9  ;;  %2513 = vst [vmem:[%s5359_s22 + $0x50] sm:$0xff] %v3915_v30  ;;  %v2069_v35 = vpop.f32.mrf.mxu2 }
 0x13d   : > { %v3400_v27 = vld [vmem:[%s5834_s3 + $0x638] sm:$0xf0]  ;;  %3916 = vtanh.f32 %v2087_v31  ;;  %v2070_v36 = vadd.f32 %v2069_v35, %v2051_v32  ;;  %2441 = vmatmul.bf16.vlgmr.msrb.gmra.mxu2 %v4360_v25 }
 0x13e   : > { %v3403_v15 = vor.u32 %v3827_v10, %v3400_v27  ;;  %2421 = vmatpush.bf16.msrb.mxu1 %v2891_v28  ;;  %v2100_v37 = vpop.f32.mrf.mxu0 }
 0x13f   : > { %v2101_v38 = vadd.f32 %v2100_v37, %v570_v47  ;;  %2403 = vmatmul.bf16.vlgmr.msrb.gmra.mxu0 %v4345_v18 }
 0x140   : > { %2459 = vmatpush.bf16.msrb.mxu3 %v3403_v15  ;;  %v2119_v39 = vpop.f32.mrf.mxu1 }
 0x141   : > { %v2120_v45 = vadd.f32 %v2119_v39, %v2101_v38  ;;  %2422 = vmatmul.bf16.vlgmr.msrb.gmra.mxu1 %v4358_v24 }
 0x142   : > { %v2088_v43 = vpop.f32.mrf.mxu3 }
 0x143   : > { %v3917_v60 = vpop.eup %3916  ;;  %v2089_v54 = vadd.f32 %v2088_v43, %v2070_v36  ;;  %2460 = vmatmul.bf16.vlgmr.msrb.gmra.mxu3 %v4393_v44 }
 0x144   : > { %2521 = vst [vmem:[%s5359_s22 + $0x90] sm:$0xff] %v3917_v60  ;;  %v2138_v46 = vpop.f32.mrf.mxu2 }
 0x145   : > { %3918 = vtanh.f32 %v2089_v54  ;;  %v2139_v49 = vadd.f32 %v2138_v46, %v2120_v45  ;;  %v572_v46 = vperm.slane %v5791_v42, 5 }
 0x146   : > { %v2102_v50 = vpop.f32.mrf.mxu0 }
 0x147   : > { %v2103_v56 = vadd.f32 %v2102_v50, %v570_v47 }
 0x148   : > { %v2121_v52 = vpop.f32.mrf.mxu1 }
 0x149   : > { %v2122_v18 = vadd.f32 %v2121_v52, %v2103_v56 }
 0x14a   : > { %v2157_v53 = vpop.f32.mrf.mxu3 }
 0x14b   : > { %v3919_v57 = vpop.eup %3918  ;;  %v2158_v58 = vadd.f32 %v2157_v53, %v2139_v49 }
 0x14c   : > { %2529 = vst [vmem:[%s5359_s22 + $0xd0] sm:$0xff] %v3919_v57  ;;  %v2140_v19 = vpop.f32.mrf.mxu2 }
 0x14d   : > { %3920 = vtanh.f32 %v2158_v58  ;;  %v2141_v59 = vadd.f32 %v2140_v19, %v2122_v18  ;;  %2446 = vmatmul.bf16.gmra.mxu2 %v4484_v41 }
 0x14e   : > { %v2105_v24 = vpop.f32.mrf.mxu0 }
 0x14f   : > { %v2106_v61 = vadd.f32 %v2105_v24, %v570_v47  ;;  %2408 = vmatmul.bf16.gmra.mxu0 %v4469_v34  ;;  %v571_v34 = vperm.slane %v5791_v42, 4 }
 0x150   : > { %v2124_v25 = vpop.f32.mrf.mxu1 }
 0x151   : > { %v2125_v1 = vadd.f32 %v2124_v25, %v2106_v61  ;;  %2427 = vmatmul.bf16.gmra.mxu1 %v4482_v40 }
 0x152   : > { %v2159_v63 = vpop.f32.mrf.mxu3 }
 0x153   : > { %v3921_v0 = vpop.eup %3920  ;;  %v2160_v44 = vadd.f32 %v2159_v63, %v2141_v59  ;;  %2465 = vmatmul.bf16.gmra.mxu3 %v4502_v55 }
 0x154   : > { %2506 = vst [vmem:[%s5359_s22 + $0x18] sm:$0xff] %v3921_v0  ;;  %v2143_v2 = vpop.f32.mrf.mxu2 }
 0x155   : > { %3922 = vtanh.f32 %v2160_v44  ;;  %v2144_v51 = vadd.f32 %v2143_v2, %v2125_v1 }
 0x156   : > { %v2107_v3 = vpop.f32.mrf.mxu0 }
 0x157   : > { %v2108_v6 = vadd.f32 %v2107_v3, %v570_v47 }
 0x158   : > { %v2126_v4 = vpop.f32.mrf.mxu1 }
 0x159   : > { %v2127_v9 = vadd.f32 %v2126_v4, %v2108_v6 }
 0x15a   : > { %v2162_v5 = vpop.f32.mrf.mxu3 }
 0x15b   : > { %v3923_v7 = vpop.eup %3922  ;;  %v2163_v8 = vadd.f32 %v2162_v5, %v2144_v51 }
 0x15c   : > { %2514 = vst [vmem:[%s5359_s22 + $0x58] sm:$0xff] %v3923_v7  ;;  %v2145_v40 = vpop.f32.mrf.mxu2 }
 0x15d   : > { %3924 = vtanh.f32 %v2163_v8  ;;  %v2146_v10 = vadd.f32 %v2145_v40, %v2127_v9 }
 0x15e   : > { %v2176_v41 = vpop.f32.mrf.mxu0 }
 0x15f   : > { %v2177_v27 = vadd.f32 %v2176_v41, %v571_v34 }
 0x160   : > { %v2195_v55 = vpop.f32.mrf.mxu1 }
 0x161   : > { %v2196_v12 = vadd.f32 %v2195_v55, %v2177_v27 }
 0x162   : > { %v2164_v11 = vpop.f32.mrf.mxu3 }
 0x163   : > { %v3925_v28 = vpop.eup %3924  ;;  %v2165_v29 = vadd.f32 %v2164_v11, %v2146_v10 }
 0x164   : > { %2522 = vst [vmem:[%s5359_s22 + $0x98] sm:$0xff] %v3925_v28  ;;  %v2214_v13 = vpop.f32.mrf.mxu2 }
 0x165   : > { %3926 = vtanh.f32 %v2165_v29  ;;  %v2215_v14 = vadd.f32 %v2214_v13, %v2196_v12  ;;  %v573_v13 = vperm.slane %v5791_v42, 6 }
 0x166   : > { %v2178_v15 = vpop.f32.mrf.mxu0 }
 0x167   : > { %v2179_v17 = vadd.f32 %v2178_v15, %v571_v34 }
 0x168   : > { %v2197_v62 = vpop.f32.mrf.mxu1 }
 0x169   : > { %v2198_v21 = vadd.f32 %v2197_v62, %v2179_v17 }
 0x16a   : > { %v2233_v16 = vpop.f32.mrf.mxu3 }
 0x16b   : > { %v3927_v20 = vpop.eup %3926  ;;  %v2234_v33 = vadd.f32 %v2233_v16, %v2215_v14 }
 0x16c   : > { %2530 = vst [vmem:[%s5359_s22 + $0xd8] sm:$0xff] %v3927_v20  ;;  %v2216_v48 = vpop.f32.mrf.mxu2 }
 0x16d   : > { %3928 = vtanh.f32 %v2234_v33  ;;  %v2217_v22 = vadd.f32 %v2216_v48, %v2198_v21 }
 0x16e   : > { %v2181_v23 = vpop.f32.mrf.mxu0 }
 0x16f   : > { %v2182_v26 = vadd.f32 %v2181_v23, %v571_v34 }
 0x170   : > { %v2200_v30 = vpop.f32.mrf.mxu1 }
 0x171   : > { %v2201_v35 = vadd.f32 %v2200_v30, %v2182_v26 }
 0x172   : > { %v2235_v31 = vpop.f32.mrf.mxu3 }
 0x173   : > { %v3929_v47 = vpop.eup %3928  ;;  %v2236_v32 = vadd.f32 %v2235_v31, %v2217_v22 }
 0x174   : > { %2507 = vst [vmem:[%s5359_s22 + $0x20] sm:$0xff] %v3929_v47  ;;  %v2219_v36 = vpop.f32.mrf.mxu2 }
 0x175   : > { %3930 = vtanh.f32 %v2236_v32  ;;  %v2220_v37 = vadd.f32 %v2219_v36, %v2201_v35 }
 0x176   : > { %v2183_v38 = vpop.f32.mrf.mxu0 }
 0x177   : > { %v2184_v60 = vadd.f32 %v2183_v38, %v571_v34 }
 0x178   : > { %v2202_v39 = vpop.f32.mrf.mxu1 }
 0x179   : > { %v2203_v49 = vadd.f32 %v2202_v39, %v2184_v60 }
 0x17a   : > { %v2238_v43 = vpop.f32.mrf.mxu3 }
 0x17b   : > { %v3931_v54 = vpop.eup %3930  ;;  %v2239_v45 = vadd.f32 %v2238_v43, %v2220_v37 }
 0x17c   : > { %2515 = vst [vmem:[%s5359_s22 + $0x60] sm:$0xff] %v3931_v54  ;;  %v2221_v50 = vpop.f32.mrf.mxu2 }
 0x17d   : > { %3932 = vtanh.f32 %v2239_v45  ;;  %v2222_v52 = vadd.f32 %v2221_v50, %v2203_v49 }
 0x17e   : > { %v2252_v53 = vpop.f32.mrf.mxu0 }
 0x17f   : > { %v2253_v56 = vadd.f32 %v2252_v53, %v572_v46 }
 0x180   : > { %v2271_v57 = vpop.f32.mrf.mxu1 }
 0x181   : > { %v2272_v59 = vadd.f32 %v2271_v57, %v2253_v56 }
 0x182   : > { %v2240_v58 = vpop.f32.mrf.mxu3 }
 0x183   : > { %v3933_v18 = vpop.eup %3932  ;;  %v2241_v19 = vadd.f32 %v2240_v58, %v2222_v52 }
 0x184   : > { %2523 = vst [vmem:[%s5359_s22 + $0xa0] sm:$0xff] %v3933_v18  ;;  %v2290_v24 = vpop.f32.mrf.mxu2 }
 0x185   : > { %3934 = vtanh.f32 %v2241_v19  ;;  %v2291_v61 = vadd.f32 %v2290_v24, %v2272_v59  ;;  %v574_v24 = vperm.slane %v5791_v42, 7 }
 0x186   : > { %v2254_v25 = vpop.f32.mrf.mxu0 }
 0x187   : > { %v2255_v44 = vadd.f32 %v2254_v25, %v572_v46 }
 0x188   : > { %v2273_v63 = vpop.f32.mrf.mxu1 }
 0x189   : > { %v2274_v51 = vadd.f32 %v2273_v63, %v2255_v44 }
 0x18a   : > { %v2309_v0 = vpop.f32.mrf.mxu3 }
 0x18b   : > { %v3935_v1 = vpop.eup %3934  ;;  %v2310_v2 = vadd.f32 %v2309_v0, %v2291_v61 }
 0x18c   : > { %2531 = vst [vmem:[%s5359_s22 + $0xe0] sm:$0xff] %v3935_v1  ;;  %v2292_v3 = vpop.f32.mrf.mxu2 }
 0x18d   : > { %3936 = vtanh.f32 %v2310_v2  ;;  %v2293_v4 = vadd.f32 %v2292_v3, %v2274_v51 }
 0x18e   : > { %v2257_v5 = vpop.f32.mrf.mxu0 }
 0x18f   : > { %v2258_v6 = vadd.f32 %v2257_v5, %v572_v46 }
 0x190   : > { %v2276_v7 = vpop.f32.mrf.mxu1 }
 0x191   : > { %v2277_v40 = vadd.f32 %v2276_v7, %v2258_v6 }
 0x192   : > { %v2311_v8 = vpop.f32.mrf.mxu3 }
 0x193   : > { %v3937_v34 = vpop.eup %3936  ;;  %v2312_v9 = vadd.f32 %v2311_v8, %v2293_v4 }
 0x194   : > { %2508 = vst [vmem:[%s5359_s22 + $0x28] sm:$0xff] %v3937_v34  ;;  %v2295_v10 = vpop.f32.mrf.mxu2 }
 0x195   : > { %3938 = vtanh.f32 %v2312_v9  ;;  %v2296_v41 = vadd.f32 %v2295_v10, %v2277_v40 }
 0x196   : > { %v2259_v27 = vpop.f32.mrf.mxu0 }
 0x197   : > { %v2260_v28 = vadd.f32 %v2259_v27, %v572_v46 }
 0x198   : > { %v2278_v55 = vpop.f32.mrf.mxu1 }
 0x199   : > { %v2279_v14 = vadd.f32 %v2278_v55, %v2260_v28 }
 0x19a   : > { %v2314_v11 = vpop.f32.mrf.mxu3 }
 0x19b   : > { %v3939_v29 = vpop.eup %3938  ;;  %v2315_v12 = vadd.f32 %v2314_v11, %v2296_v41 }
 0x19c   : > { %2516 = vst [vmem:[%s5359_s22 + $0x68] sm:$0xff] %v3939_v29  ;;  %v2297_v15 = vpop.f32.mrf.mxu2 }
 0x19d   : > { %3940 = vtanh.f32 %v2315_v12  ;;  %v2298_v62 = vadd.f32 %v2297_v15, %v2279_v14 }
 0x19e   : > { %v2328_v16 = vpop.f32.mrf.mxu0 }
 0x19f   : > { %v2329_v17 = vadd.f32 %v2328_v16, %v573_v13 }
 0x1a0   : > { %v2347_v20 = vpop.f32.mrf.mxu1 }
 0x1a1   : > { %v2348_v22 = vadd.f32 %v2347_v20, %v2329_v17 }
 0x1a2   : > { %v2316_v33 = vpop.f32.mrf.mxu3 }
 0x1a3   : > { %v3941_v21 = vpop.eup %3940  ;;  %v2317_v48 = vadd.f32 %v2316_v33, %v2298_v62 }
 0x1a4   : > { %2524 = vst [vmem:[%s5359_s22 + $0xa8] sm:$0xff] %v3941_v21  ;;  %v2366_v23 = vpop.f32.mrf.mxu2 }
 0x1a5   : > { %3942 = vtanh.f32 %v2317_v48  ;;  %v2367_v26 = vadd.f32 %v2366_v23, %v2348_v22 }
 0x1a6   : > { %v2330_v30 = vpop.f32.mrf.mxu0 }
 0x1a7   : > { %v2331_v32 = vadd.f32 %v2330_v30, %v573_v13 }
 0x1a8   : > { %v2349_v31 = vpop.f32.mrf.mxu1 }
 0x1a9   : > { %v2350_v37 = vadd.f32 %v2349_v31, %v2331_v32 }
 0x1aa   : > { %v2385_v47 = vpop.f32.mrf.mxu3 }
 0x1ab   : > { %v3943_v35 = vpop.eup %3942  ;;  %v2386_v36 = vadd.f32 %v2385_v47, %v2367_v26 }
 0x1ac   : > { %2532 = vst [vmem:[%s5359_s22 + $0xe8] sm:$0xff] %v3943_v35  ;;  %v2368_v38 = vpop.f32.mrf.mxu2 }
 0x1ad   : > { %3944 = vtanh.f32 %v2386_v36  ;;  %v2369_v39 = vadd.f32 %v2368_v38, %v2350_v37 }
 0x1ae   : > { %v2333_v43 = vpop.f32.mrf.mxu0 }
 0x1af   : > { %v2334_v60 = vadd.f32 %v2333_v43, %v573_v13 }
 0x1b0   : > { %v2352_v54 = vpop.f32.mrf.mxu1 }
 0x1b1   : > { %v2353_v50 = vadd.f32 %v2352_v54, %v2334_v60 }
 0x1b2   : > { %v2387_v45 = vpop.f32.mrf.mxu3 }
 0x1b3   : > { %v3945_v46 = vpop.eup %3944  ;;  %v2388_v49 = vadd.f32 %v2387_v45, %v2369_v39 }
 0x1b4   : > { %2509 = vst [vmem:[%s5359_s22 + $0x30] sm:$0xff] %v3945_v46  ;;  %v2371_v52 = vpop.f32.mrf.mxu2 }
 0x1b5   : > { %3946 = vtanh.f32 %v2388_v49  ;;  %v2372_v53 = vadd.f32 %v2371_v52, %v2353_v50 }
 0x1b6   : > { %v2335_v56 = vpop.f32.mrf.mxu0 }
 0x1b7   : > { %v2336_v18 = vadd.f32 %v2335_v56, %v573_v13 }
 0x1b8   : > { %v2354_v57 = vpop.f32.mrf.mxu1 }
 0x1b9   : > { %v2355_v61 = vadd.f32 %v2354_v57, %v2336_v18 }
 0x1ba   : > { %v2390_v58 = vpop.f32.mrf.mxu3 }
 0x1bb   : > { %v3947_v19 = vpop.eup %3946  ;;  %v2391_v59 = vadd.f32 %v2390_v58, %v2372_v53 }
 0x1bc   : > { %2517 = vst [vmem:[%s5359_s22 + $0x70] sm:$0xff] %v3947_v19  ;;  %v2373_v25 = vpop.f32.mrf.mxu2 }
 0x1bd   : > { %3948 = vtanh.f32 %v2391_v59  ;;  %v2374_v63 = vadd.f32 %v2373_v25, %v2355_v61 }
 0x1be   : > { %v2404_v0 = vpop.f32.mrf.mxu0 }
 0x1bf   : > { %v2405_v44 = vadd.f32 %v2404_v0, %v574_v24 }
 0x1c0   : > { %v2423_v1 = vpop.f32.mrf.mxu1 }
 0x1c1   : > { %v2424_v4 = vadd.f32 %v2423_v1, %v2405_v44 }
 0x1c2   : > { %v2392_v2 = vpop.f32.mrf.mxu3 }
 0x1c3   : > { %v3949_v51 = vpop.eup %3948  ;;  %v2393_v3 = vadd.f32 %v2392_v2, %v2374_v63 }
 0x1c4   : > { %2525 = vst [vmem:[%s5359_s22 + $0xb0] sm:$0xff] %v3949_v51  ;;  %v2442_v5 = vpop.f32.mrf.mxu2 }
 0x1c5   : > { %3950 = vtanh.f32 %v2393_v3  ;;  %v2443_v6 = vadd.f32 %v2442_v5, %v2424_v4 }
 0x1c6   : > { %v2406_v7 = vpop.f32.mrf.mxu0 }
 0x1c7   : > { %v2407_v42 = vadd.f32 %v2406_v7, %v574_v24 }
 0x1c8   : > { %v2425_v8 = vpop.f32.mrf.mxu1 }
 0x1c9   : > { %v2426_v10 = vadd.f32 %v2425_v8, %v2407_v42 }
 0x1ca   : > { %v2461_v34 = vpop.f32.mrf.mxu3 }
 0x1cb   : > { %v3951_v9 = vpop.eup %3950  ;;  %v2462_v40 = vadd.f32 %v2461_v34, %v2443_v6 }
 0x1cc   : > { %2533 = vst [vmem:[%s5359_s22 + $0xf0] sm:$0xff] %v3951_v9  ;;  %v2444_v41 = vpop.f32.mrf.mxu2 }
 0x1cd   : > { %3952 = vtanh.f32 %v2462_v40  ;;  %v2445_v27 = vadd.f32 %v2444_v41, %v2426_v10 }
 0x1ce   : > { %v2409_v55 = vpop.f32.mrf.mxu0 }
 0x1cf   : > { %v2410_v11 = vadd.f32 %v2409_v55, %v574_v24 }
 0x1d0   : > { %v2428_v13 = vpop.f32.mrf.mxu1 }
 0x1d1   : > { %v2429_v14 = vadd.f32 %v2428_v13, %v2410_v11 }
 0x1d2   : > { %v2463_v28 = vpop.f32.mrf.mxu3 }
 0x1d3   : > { %v3953_v29 = vpop.eup %3952  ;;  %v2464_v12 = vadd.f32 %v2463_v28, %v2445_v27 }
 0x1d4   : > { %2510 = vst [vmem:[%s5359_s22 + $0x38] sm:$0xff] %v3953_v29  ;;  %v2447_v15 = vpop.f32.mrf.mxu2 }
 0x1d5   : > { %3954 = vtanh.f32 %v2464_v12  ;;  %v2448_v62 = vadd.f32 %v2447_v15, %v2429_v14 }
 0x1d6   : > { %v2411_v16 = vpop.f32.mrf.mxu0 }
 0x1d7   : > { %v2412_v20 = vadd.f32 %v2411_v16, %v574_v24 }
 0x1d8   : > { %v2430_v48 = vpop.f32.mrf.mxu1 }
 0x1d9   : > { %v2431_v22 = vadd.f32 %v2430_v48, %v2412_v20 }
 0x1da   : > { %v2466_v17 = vpop.f32.mrf.mxu3 }
 0x1db   : > { %v3955_v33 = vpop.eup %3954  ;;  %v2467_v21 = vadd.f32 %v2466_v17, %v2448_v62 }
 0x1dc   : > { %2518 = vst [vmem:[%s5359_s22 + $0x78] sm:$0xff] %v3955_v33  ;;  %v2449_v23 = vpop.f32.mrf.mxu2 }
 0x1dd   : > { %3956 = vtanh.f32 %v2467_v21  ;;  %v2450_v26 = vadd.f32 %v2449_v23, %v2431_v22 }
 0x1e2   : > { %v2468_v30 = vpop.f32.mrf.mxu3 }
 0x1e3   : > { %v3957_v31 = vpop.eup %3956  ;;  %v2469_v47 = vadd.f32 %v2468_v30, %v2450_v26 }
 0x1e4   : > { %2526 = vst [vmem:[%s5359_s22 + $0xb8] sm:$0xff] %v3957_v31 }
 0x1e5   : > { %3958 = vtanh.f32 %v2469_v47 }
 0x1eb   : > { %v3959_v32 = vpop.eup %3958 }
 0x1ec   : > { %2534 = vst [vmem:[%s5359_s22 + $0xf8] sm:$0xff] %v3959_v32 }
 0x1ed PF: > { %s15_s18 = sadd.s32 1, %s3967_s18  }
 0x1ee   : > { %p12_p4 = scmp.ge.s32.totalorder %s15_s18, 4  }
 0x1f0   :  { %14 = sbr.rel (!%p12_p4) target bundleno = 1 (0x1), region = 70 }

</bundles_post_ra>
